<compile_context>
chip_gen: v7x
topology: tpu7x:2x2x1
jax: 0.10.0
libtpu: 0.0.40
codegen_flags: <defaults>
</compile_context>

<pallas_src>
import functools
import math

import numpy as np
import jax
import jax.numpy as jnp
from jax import lax
from jax.experimental import pallas as pl
from jax.experimental.pallas import tpu as pltpu


# ----------------------------- fused kernel ---------------------------------


def _fused_forward_kernel(ids_ref, m_ref, emb_ref, pe_ref,
                          bidc_ref, bidr_ref, pbid_ref,
                          w_q_ref, b_q_ref, w_k_ref, b_k_ref, w_v_ref, b_v_ref,
                          w_o_ref, b_o_ref, g1_ref, be1_ref,
                          w_f1_ref, b_f1_ref, w_f2_ref, b_f2_ref, g2_ref, be2_ref,
                          wc1_ref, bc1_ref, gc_ref, bec_ref, wc2_ref, bc2_ref,
                          o_ref, *, num_heads, num_layers):
    f32, bf16 = jnp.float32, jnp.bfloat16
    ids = ids_ref[0]                    # (R, 1) int32, token ids along sublanes
    mask_row = m_ref[0]                 # (1, R) f32 key-validity mask along lanes
    R = ids.shape[0]
    vocab, E = emb_ref.shape

    # ---- fused embedding gather (one-hot matmul) + positional encoding ----
    oh = (ids == lax.broadcasted_iota(jnp.int32, (R, vocab), 1)).astype(bf16)
    x = jnp.dot(oh, emb_ref[...], preferred_element_type=f32) + pe_ref[...]

    # ---- block-diagonal additive attention bias, built ONCE, reused L*H times ----
    same_seq = bidr_ref[...] == bidc_ref[...]            # (R, R): same batch element
    key_ok = jnp.logical_and(same_seq, mask_row > 0.0)   # and key token is valid
    attn_bias = jnp.where(key_ok, 0.0, -9e15).astype(f32)

    def layernorm(h, g, b):
        mu = jnp.mean(h, axis=-1, keepdims=True)
        var = jnp.mean(jnp.square(h - mu), axis=-1, keepdims=True)
        return (h - mu) * lax.rsqrt(var + 1e-5) * g + b

    for l in range(num_layers):                          # static unroll (small L)
        # --- MultiheadAttention (per-head weight slabs, accumulate through W_out) ---
        xb = x.astype(bf16)
        attn_acc = jnp.zeros((R, E), f32)
        for h in range(num_heads):                       # static unroll
            q = (jnp.dot(xb, w_q_ref[l, h], preferred_element_type=f32)
                 + b_q_ref[l, h]).astype(bf16)           # 1/sqrt(hd) folded in at pack time
            k = (jnp.dot(xb, w_k_ref[l, h], preferred_element_type=f32)
                 + b_k_ref[l, h]).astype(bf16)
            v = (jnp.dot(xb, w_v_ref[l, h], preferred_element_type=f32)
                 + b_v_ref[l, h]).astype(bf16)
            logits = lax.dot_general(q, k, (((1,), (1,)), ((), ())),
                                     preferred_element_type=f32) + attn_bias
            logits = logits - jnp.max(logits, axis=-1, keepdims=True)
            p = jnp.exp(logits)
            attn = p * pl.reciprocal(jnp.sum(p, axis=-1, keepdims=True), approx=True)
            ho = jnp.dot(attn.astype(bf16), v, preferred_element_type=f32)
            attn_acc = attn_acc + jnp.dot(ho.astype(bf16), w_o_ref[l, h],
                                          preferred_element_type=f32)
        # residual + norm1 (dropout p=0 -> identity)
        x = layernorm(x + attn_acc + b_o_ref[l], g1_ref[l], be1_ref[l])

        # --- FFN ---
        xb = x.astype(bf16)
        h1 = jnp.dot(xb, w_f1_ref[l], preferred_element_type=f32) + b_f1_ref[l]
        h1 = jnp.maximum(h1, 0.0).astype(bf16)                       # ReLU
        ffn = jnp.dot(h1, w_f2_ref[l], preferred_element_type=f32) + b_f2_ref[l]
        # residual + norm2
        x = layernorm(x + ffn, g2_ref[l], be2_ref[l])

    # ---- masked mean pooling: one (block_b, R) @ (R, E) matmul, no transposes ----
    pool_w = jnp.where(pbid_ref[...] == bidc_ref[...], mask_row, 0.0)   # (block_b, R)
    counts = jnp.maximum(jnp.sum(pool_w, axis=-1, keepdims=True), 1e-9)
    pooled = jnp.dot(pool_w, x, preferred_element_type=f32) / counts    # (block_b, E)

    # ---- classifier: Linear -> LayerNorm -> LeakyReLU -> Linear ----
    hc = (jnp.dot(pooled.astype(bf16), wc1_ref[...], preferred_element_type=f32)
          + bc1_ref[...])
    hc = layernorm(hc, gc_ref[...], bec_ref[...])
    hc = jnp.where(hc > 0, hc, 0.01 * hc)                # LeakyReLU slope 0.01
    o_ref[0] = (jnp.dot(hc.astype(bf16), wc2_ref[...], preferred_element_type=f32)
                + bc2_ref[...])                          # dense (block_b, C) store


# ----------------------------- parameters -----------------------------------


def init_params(key, *, vocab_size, padding_idx, embedding_dim, num_layers,
                num_heads, ffn_dim, num_classes, max_length=64):
    """Initialize in PyTorch (out_features, in_features) layout."""
    del num_heads
    keys = jax.random.split(key, 3 + num_layers)

    def nrm(k, shape, scale=0.02):
        return (scale * jax.random.normal(k, shape)).astype(jnp.float32)

    emb = nrm(keys[0], (vocab_size, embedding_dim))
    emb = emb.at[padding_idx].set(0.0)              # nn.Embedding padding_idx row = 0

    # sinusoidal positional encoding (same formula as PositionalEncoding)
    pos = jnp.arange(max_length, dtype=jnp.float32)[:, None]
    div = jnp.exp(-jnp.arange(0, embedding_dim, 2, dtype=jnp.float32)
                  / embedding_dim * np.log(10000.0))
    pe = jnp.zeros((max_length, embedding_dim), jnp.float32)
    pe = pe.at[:, 0::2].set(jnp.sin(pos * div))
    pe = pe.at[:, 1::2].set(jnp.cos(pos * div))

    layers = []
    for li in range(num_layers):
        lk = jax.random.split(keys[2 + li], 4)
        layers.append(dict(
            w_in=nrm(lk[0], (3 * embedding_dim, embedding_dim)),
            b_in=jnp.zeros((3 * embedding_dim,), jnp.float32),
            w_out=nrm(lk[1], (embedding_dim, embedding_dim)),
            b_out=jnp.zeros((embedding_dim,), jnp.float32),
            g1=jnp.ones((embedding_dim,), jnp.float32),
            be1=jnp.zeros((embedding_dim,), jnp.float32),
            w_f1=nrm(lk[2], (ffn_dim, embedding_dim)),
            b_f1=jnp.zeros((ffn_dim,), jnp.float32),
            w_f2=nrm(lk[3], (embedding_dim, ffn_dim)),
            b_f2=jnp.zeros((embedding_dim,), jnp.float32),
            g2=jnp.ones((embedding_dim,), jnp.float32),
            be2=jnp.zeros((embedding_dim,), jnp.float32),
        ))

    ck = jax.random.split(keys[1], 2)
    return dict(
        emb=emb, pe=pe, layers=layers,
        wc1=nrm(ck[0], (embedding_dim, embedding_dim)),
        bc1=jnp.zeros((embedding_dim,), jnp.float32),
        gc=jnp.ones((embedding_dim,), jnp.float32),
        bec=jnp.zeros((embedding_dim,), jnp.float32),
        wc2=nrm(ck[1], (num_classes, embedding_dim)),
        bc2=jnp.zeros((num_classes,), jnp.float32),
    )


def pack_params(params, *, num_heads):
    """One-time packing (outside the forward):
       * weights transposed to (in, out) and cast to bf16 (MXU-native),
       * per-head q/k/v/out weight slabs (no lane slicing in the kernel),
       * 1/sqrt(hd) scale folded into W_q / b_q,
       * biases / LN params reshaped to (1, N) and stacked over layers."""
    E = params["emb"].shape[1]
    hd = E // num_heads
    scale = 1.0 / math.sqrt(hd)
    bf16 = jnp.bfloat16

    w_q, w_k, w_v, b_q, b_k, b_v, w_o = [], [], [], [], [], [], []
    b_o, g1, be1, w_f1, b_f1, w_f2, b_f2, g2, be2 = ([] for _ in range(9))
    for lp in params["layers"]:
        w_in_t = jnp.transpose(lp["w_in"])        # (E, 3E); torch chunk layout [q|k|v] per head
        w_out_t = jnp.transpose(lp["w_out"])      # (E, E)
        qs, ks, vs, bqs, bks, bvs, wos = [], [], [], [], [], [], []
        for h in range(num_heads):
            base = 3 * hd * h
            qs.append(w_in_t[:, base:base + hd] * scale)
            ks.append(w_in_t[:, base + hd:base + 2 * hd])
            vs.append(w_in_t[:, base + 2 * hd:base + 3 * hd])
            bqs.append(lp["b_in"][base:base + hd].reshape(1, hd) * scale)
            bks.append(lp["b_in"][base + hd:base + 2 * hd].reshape(1, hd))
            bvs.append(lp["b_in"][base + 2 * hd:base + 3 * hd].reshape(1, hd))
            wos.append(w_out_t[h * hd:(h + 1) * hd, :])
        w_q.append(jnp.stack(qs)); w_k.append(jnp.stack(ks)); w_v.append(jnp.stack(vs))
        b_q.append(jnp.stack(bqs)); b_k.append(jnp.stack(bks)); b_v.append(jnp.stack(bvs))
        w_o.append(jnp.stack(wos)); b_o.append(lp["b_out"].reshape(1, E))
        g1.append(lp["g1"].reshape(1, E)); be1.append(lp["be1"].reshape(1, E))
        w_f1.append(jnp.transpose(lp["w_f1"])); b_f1.append(lp["b_f1"].reshape(1, -1))
        w_f2.append(jnp.transpose(lp["w_f2"])); b_f2.append(lp["b_f2"].reshape(1, E))
        g2.append(lp["g2"].reshape(1, E)); be2.append(lp["be2"].reshape(1, E))

    def st(xs, dt=jnp.float32):
        return jnp.stack(xs).astype(dt)

    return dict(
        emb=params["emb"].astype(bf16), pe=params["pe"],
        w_q=st(w_q, bf16), b_q=st(b_q), w_k=st(w_k, bf16), b_k=st(b_k),
        w_v=st(w_v, bf16), b_v=st(b_v), w_o=st(w_o, bf16), b_o=st(b_o),
        g1=st(g1), be1=st(be1),
        w_f1=st(w_f1, bf16), b_f1=st(b_f1), w_f2=st(w_f2, bf16), b_f2=st(b_f2),
        g2=st(g2), be2=st(be2),
        wc1=jnp.transpose(params["wc1"]).astype(bf16), bc1=params["bc1"].reshape(1, -1),
        gc=params["gc"].reshape(1, -1), bec=params["bec"].reshape(1, -1),
        wc2=jnp.transpose(params["wc2"]).astype(bf16), bc2=params["bc2"].reshape(1, -1),
    )


# ----------------------------- forward ---------------------------------------


_RESIDENT_NAMES = ("w_q", "b_q", "w_k", "b_k", "w_v", "b_v", "w_o", "b_o",
                   "g1", "be1", "w_f1", "b_f1", "w_f2", "b_f2", "g2", "be2",
                   "wc1", "bc1", "gc", "bec", "wc2", "bc2")


def antibody_classifier_forward(packed, input_ids, attention_mask, *,
                                num_heads, num_layers, block_rows=128):
    """input_ids: (B, S) int; attention_mask: (B, S) -> logits (B, num_classes)."""
    B, S = input_ids.shape
    C = packed["bc2"].shape[-1]

    # Batch-block: each grid step handles block_b sequences = block_b*S token rows
    # (target ~128 rows to fill sublanes / MXU M); keep >= 2 grid steps when B > 1
    # so both v7x TensorCores get work.
    block_b = min(B, max(1, block_rows // S))
    nb = -(-B // block_b)
    if nb == 1 and B > 1:
        block_b = -(-B // 2)
        nb = -(-B // block_b)
    B_pad = nb * block_b
    R = block_b * S

    ids = input_ids.astype(jnp.int32)
    maskf = attention_mask.astype(jnp.float32)
    if B_pad != B:
        ids = jnp.pad(ids, ((0, B_pad - B), (0, 0)))
        maskf = jnp.pad(maskf, ((0, B_pad - B), (0, 0)))
    ids_in = ids.reshape(nb, R, 1)        # token ids along sublanes (no in-kernel relayout)
    mask_in = maskf.reshape(nb, 1, R)     # key mask along lanes

    # Tiny constants: PE tiled over the batch block; sequence-id vectors used to
    # build the block-diagonal attention bias and the pooling matrix in-kernel.
    pe_block = jnp.tile(packed["pe"][:S], (block_b, 1))                  # (R, E) f32
    seq_id = np.repeat(np.arange(block_b, dtype=np.float32), S)
    bid_col = jnp.asarray(seq_id.reshape(1, R))
    bid_row = jnp.asarray(seq_id.reshape(R, 1))
    pool_bid = jnp.asarray(np.arange(block_b, dtype=np.float32).reshape(block_b, 1))

    residents = ([packed["emb"], pe_block, bid_col, bid_row, pool_bid]
                 + [packed[n] for n in _RESIDENT_NAMES])

    def resident_spec(arr):               # whole-array VMEM resident, constant block
        nd = arr.ndim
        return pl.BlockSpec(arr.shape, lambda b, _nd=nd: (0,) * _nd)

    kern = functools.partial(_fused_forward_kernel,
                             num_heads=num_heads, num_layers=num_layers)

    out = pl.pallas_call(
        kern,
        out_shape=jax.ShapeDtypeStruct((nb, block_b, C), jnp.float32),
        grid=(nb,),
        in_specs=[pl.BlockSpec((1, R, 1), lambda b: (b, 0, 0)),
                  pl.BlockSpec((1, 1, R), lambda b: (b, 0, 0))]
                 + [resident_spec(a) for a in residents],
        out_specs=pl.BlockSpec((1, block_b, C), lambda b: (b, 0, 0)),
        compiler_params=pltpu.CompilerParams(
            dimension_semantics=("parallel",)),
    )(ids_in, mask_in, *residents)
    return out.reshape(B_pad, C)[:B]


# ----------------------------- main ------------------------------------------


if __name__ == "__main__":
    key = jax.random.PRNGKey(0)
    vocab_size, padding_idx = 24, 0
    embedding_dim, num_layers, num_heads = 32, 2, 4
    ffn_dim, num_classes = 64, 2
    B, S = 2, 8

    pkey, dkey = jax.random.split(key)
    params = init_params(pkey,
                         vocab_size=vocab_size, padding_idx=padding_idx,
                         embedding_dim=embedding_dim, num_layers=num_layers,
                         num_heads=num_heads, ffn_dim=ffn_dim,
                         num_classes=num_classes)
    packed = pack_params(params, num_heads=num_heads)   # one-time weight repack/cast

    input_ids = jax.random.randint(dkey, (B, S), 1, vocab_size, dtype=jnp.int32)
    attention_mask = jnp.array([[1, 1, 1, 1, 1, 1, 1, 1],
                                [1, 1, 1, 1, 1, 1, 0, 0]], dtype=jnp.int32)
    input_ids = input_ids * attention_mask  # padded positions -> padding_idx (0)

    fwd = jax.jit(functools.partial(antibody_classifier_forward,
                                    num_heads=num_heads, num_layers=num_layers))
    logits = fwd(packed, input_ids, attention_mask)
    jax.block_until_ready(logits)
    assert logits.shape == (B, num_classes)
    assert bool(jnp.all(jnp.isfinite(logits)))
    # TODO(synk): dropout modules are treated as identity (p=0.0 / eval mode).
    print("KERNEL_OK")
</pallas_src>

<mosaic_0001>
module attributes {stable_mosaic.version = 11 : i64} {
  func.func @_fused_forward_kernel(%arg0: i32, %arg1: memref<1x8x1xi32, #tpu.memory_space<vmem>>, %arg2: memref<1x1x8xf32, #tpu.memory_space<vmem>>, %arg3: memref<24x32xbf16, #tpu.memory_space<vmem>>, %arg4: memref<8x32xf32, #tpu.memory_space<vmem>>, %arg5: memref<1x8xf32, #tpu.memory_space<vmem>>, %arg6: memref<8x1xf32, #tpu.memory_space<vmem>>, %arg7: memref<1x1xf32, #tpu.memory_space<vmem>>, %arg8: memref<2x4x32x8xbf16, #tpu.memory_space<vmem>>, %arg9: memref<2x4x1x8xf32, #tpu.memory_space<vmem>>, %arg10: memref<2x4x32x8xbf16, #tpu.memory_space<vmem>>, %arg11: memref<2x4x1x8xf32, #tpu.memory_space<vmem>>, %arg12: memref<2x4x32x8xbf16, #tpu.memory_space<vmem>>, %arg13: memref<2x4x1x8xf32, #tpu.memory_space<vmem>>, %arg14: memref<2x4x8x32xbf16, #tpu.memory_space<vmem>>, %arg15: memref<2x1x32xf32, #tpu.memory_space<vmem>>, %arg16: memref<2x1x32xf32, #tpu.memory_space<vmem>>, %arg17: memref<2x1x32xf32, #tpu.memory_space<vmem>>, %arg18: memref<2x32x64xbf16, #tpu.memory_space<vmem>>, %arg19: memref<2x1x64xf32, #tpu.memory_space<vmem>>, %arg20: memref<2x64x32xbf16, #tpu.memory_space<vmem>>, %arg21: memref<2x1x32xf32, #tpu.memory_space<vmem>>, %arg22: memref<2x1x32xf32, #tpu.memory_space<vmem>>, %arg23: memref<2x1x32xf32, #tpu.memory_space<vmem>>, %arg24: memref<32x32xbf16, #tpu.memory_space<vmem>>, %arg25: memref<1x32xf32, #tpu.memory_space<vmem>>, %arg26: memref<1x32xf32, #tpu.memory_space<vmem>>, %arg27: memref<1x32xf32, #tpu.memory_space<vmem>>, %arg28: memref<32x2xbf16, #tpu.memory_space<vmem>>, %arg29: memref<1x2xf32, #tpu.memory_space<vmem>>, %arg30: memref<1x1x2xf32, #tpu.memory_space<vmem>>) attributes {dimension_semantics = [#tpu.dimension_semantics<parallel>], iteration_bounds = array<i64: 2>, scalar_prefetch = 0 : i64, scratch_operands = 0 : i64, tpu.core_type = #tpu.core_type<tc>, window_params = [{transform_indices = @transform_0, window_bounds = array<i64: 1, 8, 1>}, {transform_indices = @transform_1, window_bounds = array<i64: 1, 1, 8>}, {pipeline_mode = #tpu.pipeline_mode<synchronous>, transform_indices = @transform_2, window_bounds = array<i64: 24, 32>}, {pipeline_mode = #tpu.pipeline_mode<synchronous>, transform_indices = @transform_3, window_bounds = array<i64: 8, 32>}, {pipeline_mode = #tpu.pipeline_mode<synchronous>, transform_indices = @transform_4, window_bounds = array<i64: 1, 8>}, {pipeline_mode = #tpu.pipeline_mode<synchronous>, transform_indices = @transform_5, window_bounds = array<i64: 8, 1>}, {pipeline_mode = #tpu.pipeline_mode<synchronous>, transform_indices = @transform_6, window_bounds = array<i64: 1, 1>}, {pipeline_mode = #tpu.pipeline_mode<synchronous>, transform_indices = @transform_7, window_bounds = array<i64: 2, 4, 32, 8>}, {pipeline_mode = #tpu.pipeline_mode<synchronous>, transform_indices = @transform_8, window_bounds = array<i64: 2, 4, 1, 8>}, {pipeline_mode = #tpu.pipeline_mode<synchronous>, transform_indices = @transform_9, window_bounds = array<i64: 2, 4, 32, 8>}, {pipeline_mode = #tpu.pipeline_mode<synchronous>, transform_indices = @transform_10, window_bounds = array<i64: 2, 4, 1, 8>}, {pipeline_mode = #tpu.pipeline_mode<synchronous>, transform_indices = @transform_11, window_bounds = array<i64: 2, 4, 32, 8>}, {pipeline_mode = #tpu.pipeline_mode<synchronous>, transform_indices = @transform_12, window_bounds = array<i64: 2, 4, 1, 8>}, {pipeline_mode = #tpu.pipeline_mode<synchronous>, transform_indices = @transform_13, window_bounds = array<i64: 2, 4, 8, 32>}, {pipeline_mode = #tpu.pipeline_mode<synchronous>, transform_indices = @transform_14, window_bounds = array<i64: 2, 1, 32>}, {pipeline_mode = #tpu.pipeline_mode<synchronous>, transform_indices = @transform_15, window_bounds = array<i64: 2, 1, 32>}, {pipeline_mode = #tpu.pipeline_mode<synchronous>, transform_indices = @transform_16, window_bounds = array<i64: 2, 1, 32>}, {pipeline_mode = #tpu.pipeline_mode<synchronous>, transform_indices = @transform_17, window_bounds = array<i64: 2, 32, 64>}, {pipeline_mode = #tpu.pipeline_mode<synchronous>, transform_indices = @transform_18, window_bounds = array<i64: 2, 1, 64>}, {pipeline_mode = #tpu.pipeline_mode<synchronous>, transform_indices = @transform_19, window_bounds = array<i64: 2, 64, 32>}, {pipeline_mode = #tpu.pipeline_mode<synchronous>, transform_indices = @transform_20, window_bounds = array<i64: 2, 1, 32>}, {pipeline_mode = #tpu.pipeline_mode<synchronous>, transform_indices = @transform_21, window_bounds = array<i64: 2, 1, 32>}, {pipeline_mode = #tpu.pipeline_mode<synchronous>, transform_indices = @transform_22, window_bounds = array<i64: 2, 1, 32>}, {pipeline_mode = #tpu.pipeline_mode<synchronous>, transform_indices = @transform_23, window_bounds = array<i64: 32, 32>}, {pipeline_mode = #tpu.pipeline_mode<synchronous>, transform_indices = @transform_24, window_bounds = array<i64: 1, 32>}, {pipeline_mode = #tpu.pipeline_mode<synchronous>, transform_indices = @transform_25, window_bounds = array<i64: 1, 32>}, {pipeline_mode = #tpu.pipeline_mode<synchronous>, transform_indices = @transform_26, window_bounds = array<i64: 1, 32>}, {pipeline_mode = #tpu.pipeline_mode<synchronous>, transform_indices = @transform_27, window_bounds = array<i64: 32, 2>}, {pipeline_mode = #tpu.pipeline_mode<synchronous>, transform_indices = @transform_28, window_bounds = array<i64: 1, 2>}, {transform_indices = @transform_29, window_bounds = array<i64: 1, 1, 2>}]} {
    %c0 = arith.constant 0 : index
    %c0_0 = arith.constant 0 : index
    %c0_1 = arith.constant 0 : index
    %0 = vector.load %arg1[%c0, %c0_0, %c0_1] : memref<1x8x1xi32, #tpu.memory_space<vmem>>, vector<1x8x1xi32>
    %1 = vector.shape_cast %0 : vector<1x8x1xi32> to vector<8x1xi32>
    %c0_2 = arith.constant 0 : index
    %c0_3 = arith.constant 0 : index
    %c0_4 = arith.constant 0 : index
    %2 = vector.load %arg2[%c0_2, %c0_3, %c0_4] : memref<1x1x8xf32, #tpu.memory_space<vmem>>, vector<1x1x8xf32>
    %3 = vector.shape_cast %2 : vector<1x1x8xf32> to vector<1x8xf32>
    %4 = tpu.iota {dimensions = array<i32: 1>} : vector<8x24xi32>
    %5 = vector.broadcast %1 : vector<8x1xi32> to vector<8x24xi32>
    %6 = arith.cmpi eq, %5, %4 : vector<8x24xi32>
    %7 = arith.extui %6 : vector<8x24xi1> to vector<8x24xi32>
    %8 = arith.sitofp %7 : vector<8x24xi32> to vector<8x24xf32>
    %9 = arith.truncf %8 : vector<8x24xf32> to vector<8x24xbf16>
    %c0_5 = arith.constant 0 : index
    %c0_6 = arith.constant 0 : index
    %10 = vector.load %arg3[%c0_5, %c0_6] : memref<24x32xbf16, #tpu.memory_space<vmem>>, vector<24x32xbf16>
    %cst = arith.constant dense<0.000000e+00> : vector<8x32xf32>
    %11 = tpu.matmul %9, %10, %cst {dimension_numbers = #tpu.dot_dimension_numbers<[1], [0], [0], [1], [0, 0, 1, 1], [], []>} : vector<8x24xbf16>, vector<24x32xbf16>, vector<8x32xf32> -> vector<8x32xf32>
    %c0_7 = arith.constant 0 : index
    %c0_8 = arith.constant 0 : index
    %12 = vector.load %arg4[%c0_7, %c0_8] : memref<8x32xf32, #tpu.memory_space<vmem>>, vector<8x32xf32>
    %13 = arith.addf %11, %12 : vector<8x32xf32>
    %c0_9 = arith.constant 0 : index
    %c0_10 = arith.constant 0 : index
    %14 = vector.load %arg6[%c0_9, %c0_10] : memref<8x1xf32, #tpu.memory_space<vmem>>, vector<8x1xf32>
    %c0_11 = arith.constant 0 : index
    %c0_12 = arith.constant 0 : index
    %15 = vector.load %arg5[%c0_11, %c0_12] : memref<1x8xf32, #tpu.memory_space<vmem>>, vector<1x8xf32>
    %16 = vector.broadcast %14 : vector<8x1xf32> to vector<8x8xf32>
    %17 = vector.broadcast %15 : vector<1x8xf32> to vector<8x8xf32>
    %18 = arith.cmpf oeq, %16, %17 : vector<8x8xf32>
    %cst_13 = arith.constant 0.000000e+00 : f32
    %19 = vector.broadcast %cst_13 : f32 to vector<1x8xf32>
    %20 = arith.cmpf ogt, %3, %19 : vector<1x8xf32>
    %21 = vector.broadcast %20 : vector<1x8xi1> to vector<8x8xi1>
    %22 = arith.andi %18, %21 : vector<8x8xi1>
    %cst_14 = arith.constant 0.000000e+00 : f32
    %cst_15 = arith.constant -9.000000e+15 : f32
    %23 = vector.broadcast %cst_14 : f32 to vector<8x8xf32>
    %24 = vector.broadcast %cst_15 : f32 to vector<8x8xf32>
    %25 = arith.select %22, %23, %24 : vector<8x8xi1>, vector<8x8xf32>
    %26 = arith.truncf %13 : vector<8x32xf32> to vector<8x32xbf16>
    %cst_16 = arith.constant 0.000000e+00 : f32
    %27 = vector.broadcast %cst_16 : f32 to vector<8x32xf32>
    %c0_17 = arith.constant 0 : index
    %c0_18 = arith.constant 0 : index
    %c0_19 = arith.constant 0 : index
    %c0_20 = arith.constant 0 : index
    %28 = vector.load %arg8[%c0_17, %c0_18, %c0_19, %c0_20] : memref<2x4x32x8xbf16, #tpu.memory_space<vmem>>, vector<1x1x32x8xbf16>
    %29 = vector.shape_cast %28 : vector<1x1x32x8xbf16> to vector<32x8xbf16>
    %cst_21 = arith.constant dense<0.000000e+00> : vector<8x8xf32>
    %30 = tpu.matmul %26, %29, %cst_21 {dimension_numbers = #tpu.dot_dimension_numbers<[1], [0], [0], [1], [0, 0, 1, 1], [], []>} : vector<8x32xbf16>, vector<32x8xbf16>, vector<8x8xf32> -> vector<8x8xf32>
    %c0_22 = arith.constant 0 : index
    %c0_23 = arith.constant 0 : index
    %c0_24 = arith.constant 0 : index
    %c0_25 = arith.constant 0 : index
    %31 = vector.load %arg9[%c0_22, %c0_23, %c0_24, %c0_25] : memref<2x4x1x8xf32, #tpu.memory_space<vmem>>, vector<1x1x1x8xf32>
    %32 = vector.shape_cast %31 : vector<1x1x1x8xf32> to vector<1x8xf32>
    %33 = vector.broadcast %32 : vector<1x8xf32> to vector<8x8xf32>
    %34 = arith.addf %30, %33 : vector<8x8xf32>
    %35 = arith.truncf %34 : vector<8x8xf32> to vector<8x8xbf16>
    %c0_26 = arith.constant 0 : index
    %c0_27 = arith.constant 0 : index
    %c0_28 = arith.constant 0 : index
    %c0_29 = arith.constant 0 : index
    %36 = vector.load %arg10[%c0_26, %c0_27, %c0_28, %c0_29] : memref<2x4x32x8xbf16, #tpu.memory_space<vmem>>, vector<1x1x32x8xbf16>
    %37 = vector.shape_cast %36 : vector<1x1x32x8xbf16> to vector<32x8xbf16>
    %cst_30 = arith.constant dense<0.000000e+00> : vector<8x8xf32>
    %38 = tpu.matmul %26, %37, %cst_30 {dimension_numbers = #tpu.dot_dimension_numbers<[1], [0], [0], [1], [0, 0, 1, 1], [], []>} : vector<8x32xbf16>, vector<32x8xbf16>, vector<8x8xf32> -> vector<8x8xf32>
    %c0_31 = arith.constant 0 : index
    %c0_32 = arith.constant 0 : index
    %c0_33 = arith.constant 0 : index
    %c0_34 = arith.constant 0 : index
    %39 = vector.load %arg11[%c0_31, %c0_32, %c0_33, %c0_34] : memref<2x4x1x8xf32, #tpu.memory_space<vmem>>, vector<1x1x1x8xf32>
    %40 = vector.shape_cast %39 : vector<1x1x1x8xf32> to vector<1x8xf32>
    %41 = vector.broadcast %40 : vector<1x8xf32> to vector<8x8xf32>
    %42 = arith.addf %38, %41 : vector<8x8xf32>
    %43 = arith.truncf %42 : vector<8x8xf32> to vector<8x8xbf16>
    %c0_35 = arith.constant 0 : index
    %c0_36 = arith.constant 0 : index
    %c0_37 = arith.constant 0 : index
    %c0_38 = arith.constant 0 : index
    %44 = vector.load %arg12[%c0_35, %c0_36, %c0_37, %c0_38] : memref<2x4x32x8xbf16, #tpu.memory_space<vmem>>, vector<1x1x32x8xbf16>
    %45 = vector.shape_cast %44 : vector<1x1x32x8xbf16> to vector<32x8xbf16>
    %cst_39 = arith.constant dense<0.000000e+00> : vector<8x8xf32>
    %46 = tpu.matmul %26, %45, %cst_39 {dimension_numbers = #tpu.dot_dimension_numbers<[1], [0], [0], [1], [0, 0, 1, 1], [], []>} : vector<8x32xbf16>, vector<32x8xbf16>, vector<8x8xf32> -> vector<8x8xf32>
    %c0_40 = arith.constant 0 : index
    %c0_41 = arith.constant 0 : index
    %c0_42 = arith.constant 0 : index
    %c0_43 = arith.constant 0 : index
    %47 = vector.load %arg13[%c0_40, %c0_41, %c0_42, %c0_43] : memref<2x4x1x8xf32, #tpu.memory_space<vmem>>, vector<1x1x1x8xf32>
    %48 = vector.shape_cast %47 : vector<1x1x1x8xf32> to vector<1x8xf32>
    %49 = vector.broadcast %48 : vector<1x8xf32> to vector<8x8xf32>
    %50 = arith.addf %46, %49 : vector<8x8xf32>
    %51 = arith.truncf %50 : vector<8x8xf32> to vector<8x8xbf16>
    %cst_44 = arith.constant dense<0.000000e+00> : vector<8x8xf32>
    %52 = tpu.matmul %35, %43, %cst_44 {dimension_numbers = #tpu.dot_dimension_numbers<[1], [1], [0], [0], [0, 0, 1, 0], [], []>} : vector<8x8xbf16>, vector<8x8xbf16>, vector<8x8xf32> -> vector<8x8xf32>
    %53 = arith.addf %52, %25 : vector<8x8xf32>
    %cst_45 = arith.constant dense<0xFF800000> : vector<8xf32>
    %54 = vector.multi_reduction <maximumf>, %53, %cst_45 [1] : vector<8x8xf32> to vector<8xf32>
    %55 = vector.shape_cast %54 : vector<8xf32> to vector<8x1xf32>
    %56 = vector.broadcast %55 : vector<8x1xf32> to vector<8x8xf32>
    %57 = arith.subf %53, %56 : vector<8x8xf32>
    %58 = math.exp %57 : vector<8x8xf32>
    %cst_46 = arith.constant dense<0.000000e+00> : vector<8xf32>
    %59 = vector.multi_reduction <add>, %58, %cst_46 [1] : vector<8x8xf32> to vector<8xf32>
    %60 = vector.shape_cast %59 : vector<8xf32> to vector<8x1xf32>
    %61 = tpu.reciprocal %60 {approx = true} : vector<8x1xf32> -> vector<8x1xf32>
    %62 = vector.broadcast %61 : vector<8x1xf32> to vector<8x8xf32>
    %63 = arith.mulf %58, %62 : vector<8x8xf32>
    %64 = arith.truncf %63 : vector<8x8xf32> to vector<8x8xbf16>
    %cst_47 = arith.constant dense<0.000000e+00> : vector<8x8xf32>
    %65 = tpu.matmul %64, %51, %cst_47 {dimension_numbers = #tpu.dot_dimension_numbers<[1], [0], [0], [1], [0, 0, 1, 1], [], []>} : vector<8x8xbf16>, vector<8x8xbf16>, vector<8x8xf32> -> vector<8x8xf32>
    %66 = arith.truncf %65 : vector<8x8xf32> to vector<8x8xbf16>
    %c0_48 = arith.constant 0 : index
    %c0_49 = arith.constant 0 : index
    %c0_50 = arith.constant 0 : index
    %c0_51 = arith.constant 0 : index
    %67 = vector.load %arg14[%c0_48, %c0_49, %c0_50, %c0_51] : memref<2x4x8x32xbf16, #tpu.memory_space<vmem>>, vector<1x1x8x32xbf16>
    %68 = vector.shape_cast %67 : vector<1x1x8x32xbf16> to vector<8x32xbf16>
    %cst_52 = arith.constant dense<0.000000e+00> : vector<8x32xf32>
    %69 = tpu.matmul %66, %68, %cst_52 {dimension_numbers = #tpu.dot_dimension_numbers<[1], [0], [0], [1], [0, 0, 1, 1], [], []>} : vector<8x8xbf16>, vector<8x32xbf16>, vector<8x32xf32> -> vector<8x32xf32>
    %70 = arith.addf %27, %69 : vector<8x32xf32>
    %c0_53 = arith.constant 0 : index
    %c1 = arith.constant 1 : index
    %c0_54 = arith.constant 0 : index
    %c0_55 = arith.constant 0 : index
    %71 = vector.load %arg8[%c0_53, %c1, %c0_54, %c0_55] : memref<2x4x32x8xbf16, #tpu.memory_space<vmem>>, vector<1x1x32x8xbf16>
    %72 = vector.shape_cast %71 : vector<1x1x32x8xbf16> to vector<32x8xbf16>
    %cst_56 = arith.constant dense<0.000000e+00> : vector<8x8xf32>
    %73 = tpu.matmul %26, %72, %cst_56 {dimension_numbers = #tpu.dot_dimension_numbers<[1], [0], [0], [1], [0, 0, 1, 1], [], []>} : vector<8x32xbf16>, vector<32x8xbf16>, vector<8x8xf32> -> vector<8x8xf32>
    %c0_57 = arith.constant 0 : index
    %c1_58 = arith.constant 1 : index
    %c0_59 = arith.constant 0 : index
    %c0_60 = arith.constant 0 : index
    %74 = vector.load %arg9[%c0_57, %c1_58, %c0_59, %c0_60] : memref<2x4x1x8xf32, #tpu.memory_space<vmem>>, vector<1x1x1x8xf32>
    %75 = vector.shape_cast %74 : vector<1x1x1x8xf32> to vector<1x8xf32>
    %76 = vector.broadcast %75 : vector<1x8xf32> to vector<8x8xf32>
    %77 = arith.addf %73, %76 : vector<8x8xf32>
    %78 = arith.truncf %77 : vector<8x8xf32> to vector<8x8xbf16>
    %c0_61 = arith.constant 0 : index
    %c1_62 = arith.constant 1 : index
    %c0_63 = arith.constant 0 : index
    %c0_64 = arith.constant 0 : index
    %79 = vector.load %arg10[%c0_61, %c1_62, %c0_63, %c0_64] : memref<2x4x32x8xbf16, #tpu.memory_space<vmem>>, vector<1x1x32x8xbf16>
    %80 = vector.shape_cast %79 : vector<1x1x32x8xbf16> to vector<32x8xbf16>
    %cst_65 = arith.constant dense<0.000000e+00> : vector<8x8xf32>
    %81 = tpu.matmul %26, %80, %cst_65 {dimension_numbers = #tpu.dot_dimension_numbers<[1], [0], [0], [1], [0, 0, 1, 1], [], []>} : vector<8x32xbf16>, vector<32x8xbf16>, vector<8x8xf32> -> vector<8x8xf32>
    %c0_66 = arith.constant 0 : index
    %c1_67 = arith.constant 1 : index
    %c0_68 = arith.constant 0 : index
    %c0_69 = arith.constant 0 : index
    %82 = vector.load %arg11[%c0_66, %c1_67, %c0_68, %c0_69] : memref<2x4x1x8xf32, #tpu.memory_space<vmem>>, vector<1x1x1x8xf32>
    %83 = vector.shape_cast %82 : vector<1x1x1x8xf32> to vector<1x8xf32>
    %84 = vector.broadcast %83 : vector<1x8xf32> to vector<8x8xf32>
    %85 = arith.addf %81, %84 : vector<8x8xf32>
    %86 = arith.truncf %85 : vector<8x8xf32> to vector<8x8xbf16>
    %c0_70 = arith.constant 0 : index
    %c1_71 = arith.constant 1 : index
    %c0_72 = arith.constant 0 : index
    %c0_73 = arith.constant 0 : index
    %87 = vector.load %arg12[%c0_70, %c1_71, %c0_72, %c0_73] : memref<2x4x32x8xbf16, #tpu.memory_space<vmem>>, vector<1x1x32x8xbf16>
    %88 = vector.shape_cast %87 : vector<1x1x32x8xbf16> to vector<32x8xbf16>
    %cst_74 = arith.constant dense<0.000000e+00> : vector<8x8xf32>
    %89 = tpu.matmul %26, %88, %cst_74 {dimension_numbers = #tpu.dot_dimension_numbers<[1], [0], [0], [1], [0, 0, 1, 1], [], []>} : vector<8x32xbf16>, vector<32x8xbf16>, vector<8x8xf32> -> vector<8x8xf32>
    %c0_75 = arith.constant 0 : index
    %c1_76 = arith.constant 1 : index
    %c0_77 = arith.constant 0 : index
    %c0_78 = arith.constant 0 : index
    %90 = vector.load %arg13[%c0_75, %c1_76, %c0_77, %c0_78] : memref<2x4x1x8xf32, #tpu.memory_space<vmem>>, vector<1x1x1x8xf32>
    %91 = vector.shape_cast %90 : vector<1x1x1x8xf32> to vector<1x8xf32>
    %92 = vector.broadcast %91 : vector<1x8xf32> to vector<8x8xf32>
    %93 = arith.addf %89, %92 : vector<8x8xf32>
    %94 = arith.truncf %93 : vector<8x8xf32> to vector<8x8xbf16>
    %cst_79 = arith.constant dense<0.000000e+00> : vector<8x8xf32>
    %95 = tpu.matmul %78, %86, %cst_79 {dimension_numbers = #tpu.dot_dimension_numbers<[1], [1], [0], [0], [0, 0, 1, 0], [], []>} : vector<8x8xbf16>, vector<8x8xbf16>, vector<8x8xf32> -> vector<8x8xf32>
    %96 = arith.addf %95, %25 : vector<8x8xf32>
    %cst_80 = arith.constant dense<0xFF800000> : vector<8xf32>
    %97 = vector.multi_reduction <maximumf>, %96, %cst_80 [1] : vector<8x8xf32> to vector<8xf32>
    %98 = vector.shape_cast %97 : vector<8xf32> to vector<8x1xf32>
    %99 = vector.broadcast %98 : vector<8x1xf32> to vector<8x8xf32>
    %100 = arith.subf %96, %99 : vector<8x8xf32>
    %101 = math.exp %100 : vector<8x8xf32>
    %cst_81 = arith.constant dense<0.000000e+00> : vector<8xf32>
    %102 = vector.multi_reduction <add>, %101, %cst_81 [1] : vector<8x8xf32> to vector<8xf32>
    %103 = vector.shape_cast %102 : vector<8xf32> to vector<8x1xf32>
    %104 = tpu.reciprocal %103 {approx = true} : vector<8x1xf32> -> vector<8x1xf32>
    %105 = vector.broadcast %104 : vector<8x1xf32> to vector<8x8xf32>
    %106 = arith.mulf %101, %105 : vector<8x8xf32>
    %107 = arith.truncf %106 : vector<8x8xf32> to vector<8x8xbf16>
    %cst_82 = arith.constant dense<0.000000e+00> : vector<8x8xf32>
    %108 = tpu.matmul %107, %94, %cst_82 {dimension_numbers = #tpu.dot_dimension_numbers<[1], [0], [0], [1], [0, 0, 1, 1], [], []>} : vector<8x8xbf16>, vector<8x8xbf16>, vector<8x8xf32> -> vector<8x8xf32>
    %109 = arith.truncf %108 : vector<8x8xf32> to vector<8x8xbf16>
    %c0_83 = arith.constant 0 : index
    %c1_84 = arith.constant 1 : index
    %c0_85 = arith.constant 0 : index
    %c0_86 = arith.constant 0 : index
    %110 = vector.load %arg14[%c0_83, %c1_84, %c0_85, %c0_86] : memref<2x4x8x32xbf16, #tpu.memory_space<vmem>>, vector<1x1x8x32xbf16>
    %111 = vector.shape_cast %110 : vector<1x1x8x32xbf16> to vector<8x32xbf16>
    %cst_87 = arith.constant dense<0.000000e+00> : vector<8x32xf32>
    %112 = tpu.matmul %109, %111, %cst_87 {dimension_numbers = #tpu.dot_dimension_numbers<[1], [0], [0], [1], [0, 0, 1, 1], [], []>} : vector<8x8xbf16>, vector<8x32xbf16>, vector<8x32xf32> -> vector<8x32xf32>
    %113 = arith.addf %70, %112 : vector<8x32xf32>
    %c0_88 = arith.constant 0 : index
    %c2 = arith.constant 2 : index
    %c0_89 = arith.constant 0 : index
    %c0_90 = arith.constant 0 : index
    %114 = vector.load %arg8[%c0_88, %c2, %c0_89, %c0_90] : memref<2x4x32x8xbf16, #tpu.memory_space<vmem>>, vector<1x1x32x8xbf16>
    %115 = vector.shape_cast %114 : vector<1x1x32x8xbf16> to vector<32x8xbf16>
    %cst_91 = arith.constant dense<0.000000e+00> : vector<8x8xf32>
    %116 = tpu.matmul %26, %115, %cst_91 {dimension_numbers = #tpu.dot_dimension_numbers<[1], [0], [0], [1], [0, 0, 1, 1], [], []>} : vector<8x32xbf16>, vector<32x8xbf16>, vector<8x8xf32> -> vector<8x8xf32>
    %c0_92 = arith.constant 0 : index
    %c2_93 = arith.constant 2 : index
    %c0_94 = arith.constant 0 : index
    %c0_95 = arith.constant 0 : index
    %117 = vector.load %arg9[%c0_92, %c2_93, %c0_94, %c0_95] : memref<2x4x1x8xf32, #tpu.memory_space<vmem>>, vector<1x1x1x8xf32>
    %118 = vector.shape_cast %117 : vector<1x1x1x8xf32> to vector<1x8xf32>
    %119 = vector.broadcast %118 : vector<1x8xf32> to vector<8x8xf32>
    %120 = arith.addf %116, %119 : vector<8x8xf32>
    %121 = arith.truncf %120 : vector<8x8xf32> to vector<8x8xbf16>
    %c0_96 = arith.constant 0 : index
    %c2_97 = arith.constant 2 : index
    %c0_98 = arith.constant 0 : index
    %c0_99 = arith.constant 0 : index
    %122 = vector.load %arg10[%c0_96, %c2_97, %c0_98, %c0_99] : memref<2x4x32x8xbf16, #tpu.memory_space<vmem>>, vector<1x1x32x8xbf16>
    %123 = vector.shape_cast %122 : vector<1x1x32x8xbf16> to vector<32x8xbf16>
    %cst_100 = arith.constant dense<0.000000e+00> : vector<8x8xf32>
    %124 = tpu.matmul %26, %123, %cst_100 {dimension_numbers = #tpu.dot_dimension_numbers<[1], [0], [0], [1], [0, 0, 1, 1], [], []>} : vector<8x32xbf16>, vector<32x8xbf16>, vector<8x8xf32> -> vector<8x8xf32>
    %c0_101 = arith.constant 0 : index
    %c2_102 = arith.constant 2 : index
    %c0_103 = arith.constant 0 : index
    %c0_104 = arith.constant 0 : index
    %125 = vector.load %arg11[%c0_101, %c2_102, %c0_103, %c0_104] : memref<2x4x1x8xf32, #tpu.memory_space<vmem>>, vector<1x1x1x8xf32>
    %126 = vector.shape_cast %125 : vector<1x1x1x8xf32> to vector<1x8xf32>
    %127 = vector.broadcast %126 : vector<1x8xf32> to vector<8x8xf32>
    %128 = arith.addf %124, %127 : vector<8x8xf32>
    %129 = arith.truncf %128 : vector<8x8xf32> to vector<8x8xbf16>
    %c0_105 = arith.constant 0 : index
    %c2_106 = arith.constant 2 : index
    %c0_107 = arith.constant 0 : index
    %c0_108 = arith.constant 0 : index
    %130 = vector.load %arg12[%c0_105, %c2_106, %c0_107, %c0_108] : memref<2x4x32x8xbf16, #tpu.memory_space<vmem>>, vector<1x1x32x8xbf16>
    %131 = vector.shape_cast %130 : vector<1x1x32x8xbf16> to vector<32x8xbf16>
    %cst_109 = arith.constant dense<0.000000e+00> : vector<8x8xf32>
    %132 = tpu.matmul %26, %131, %cst_109 {dimension_numbers = #tpu.dot_dimension_numbers<[1], [0], [0], [1], [0, 0, 1, 1], [], []>} : vector<8x32xbf16>, vector<32x8xbf16>, vector<8x8xf32> -> vector<8x8xf32>
    %c0_110 = arith.constant 0 : index
    %c2_111 = arith.constant 2 : index
    %c0_112 = arith.constant 0 : index
    %c0_113 = arith.constant 0 : index
    %133 = vector.load %arg13[%c0_110, %c2_111, %c0_112, %c0_113] : memref<2x4x1x8xf32, #tpu.memory_space<vmem>>, vector<1x1x1x8xf32>
    %134 = vector.shape_cast %133 : vector<1x1x1x8xf32> to vector<1x8xf32>
    %135 = vector.broadcast %134 : vector<1x8xf32> to vector<8x8xf32>
    %136 = arith.addf %132, %135 : vector<8x8xf32>
    %137 = arith.truncf %136 : vector<8x8xf32> to vector<8x8xbf16>
    %cst_114 = arith.constant dense<0.000000e+00> : vector<8x8xf32>
    %138 = tpu.matmul %121, %129, %cst_114 {dimension_numbers = #tpu.dot_dimension_numbers<[1], [1], [0], [0], [0, 0, 1, 0], [], []>} : vector<8x8xbf16>, vector<8x8xbf16>, vector<8x8xf32> -> vector<8x8xf32>
    %139 = arith.addf %138, %25 : vector<8x8xf32>
    %cst_115 = arith.constant dense<0xFF800000> : vector<8xf32>
    %140 = vector.multi_reduction <maximumf>, %139, %cst_115 [1] : vector<8x8xf32> to vector<8xf32>
    %141 = vector.shape_cast %140 : vector<8xf32> to vector<8x1xf32>
    %142 = vector.broadcast %141 : vector<8x1xf32> to vector<8x8xf32>
    %143 = arith.subf %139, %142 : vector<8x8xf32>
    %144 = math.exp %143 : vector<8x8xf32>
    %cst_116 = arith.constant dense<0.000000e+00> : vector<8xf32>
    %145 = vector.multi_reduction <add>, %144, %cst_116 [1] : vector<8x8xf32> to vector<8xf32>
    %146 = vector.shape_cast %145 : vector<8xf32> to vector<8x1xf32>
    %147 = tpu.reciprocal %146 {approx = true} : vector<8x1xf32> -> vector<8x1xf32>
    %148 = vector.broadcast %147 : vector<8x1xf32> to vector<8x8xf32>
    %149 = arith.mulf %144, %148 : vector<8x8xf32>
    %150 = arith.truncf %149 : vector<8x8xf32> to vector<8x8xbf16>
    %cst_117 = arith.constant dense<0.000000e+00> : vector<8x8xf32>
    %151 = tpu.matmul %150, %137, %cst_117 {dimension_numbers = #tpu.dot_dimension_numbers<[1], [0], [0], [1], [0, 0, 1, 1], [], []>} : vector<8x8xbf16>, vector<8x8xbf16>, vector<8x8xf32> -> vector<8x8xf32>
    %152 = arith.truncf %151 : vector<8x8xf32> to vector<8x8xbf16>
    %c0_118 = arith.constant 0 : index
    %c2_119 = arith.constant 2 : index
    %c0_120 = arith.constant 0 : index
    %c0_121 = arith.constant 0 : index
    %153 = vector.load %arg14[%c0_118, %c2_119, %c0_120, %c0_121] : memref<2x4x8x32xbf16, #tpu.memory_space<vmem>>, vector<1x1x8x32xbf16>
    %154 = vector.shape_cast %153 : vector<1x1x8x32xbf16> to vector<8x32xbf16>
    %cst_122 = arith.constant dense<0.000000e+00> : vector<8x32xf32>
    %155 = tpu.matmul %152, %154, %cst_122 {dimension_numbers = #tpu.dot_dimension_numbers<[1], [0], [0], [1], [0, 0, 1, 1], [], []>} : vector<8x8xbf16>, vector<8x32xbf16>, vector<8x32xf32> -> vector<8x32xf32>
    %156 = arith.addf %113, %155 : vector<8x32xf32>
    %c0_123 = arith.constant 0 : index
    %c3 = arith.constant 3 : index
    %c0_124 = arith.constant 0 : index
    %c0_125 = arith.constant 0 : index
    %157 = vector.load %arg8[%c0_123, %c3, %c0_124, %c0_125] : memref<2x4x32x8xbf16, #tpu.memory_space<vmem>>, vector<1x1x32x8xbf16>
    %158 = vector.shape_cast %157 : vector<1x1x32x8xbf16> to vector<32x8xbf16>
    %cst_126 = arith.constant dense<0.000000e+00> : vector<8x8xf32>
    %159 = tpu.matmul %26, %158, %cst_126 {dimension_numbers = #tpu.dot_dimension_numbers<[1], [0], [0], [1], [0, 0, 1, 1], [], []>} : vector<8x32xbf16>, vector<32x8xbf16>, vector<8x8xf32> -> vector<8x8xf32>
    %c0_127 = arith.constant 0 : index
    %c3_128 = arith.constant 3 : index
    %c0_129 = arith.constant 0 : index
    %c0_130 = arith.constant 0 : index
    %160 = vector.load %arg9[%c0_127, %c3_128, %c0_129, %c0_130] : memref<2x4x1x8xf32, #tpu.memory_space<vmem>>, vector<1x1x1x8xf32>
    %161 = vector.shape_cast %160 : vector<1x1x1x8xf32> to vector<1x8xf32>
    %162 = vector.broadcast %161 : vector<1x8xf32> to vector<8x8xf32>
    %163 = arith.addf %159, %162 : vector<8x8xf32>
    %164 = arith.truncf %163 : vector<8x8xf32> to vector<8x8xbf16>
    %c0_131 = arith.constant 0 : index
    %c3_132 = arith.constant 3 : index
    %c0_133 = arith.constant 0 : index
    %c0_134 = arith.constant 0 : index
    %165 = vector.load %arg10[%c0_131, %c3_132, %c0_133, %c0_134] : memref<2x4x32x8xbf16, #tpu.memory_space<vmem>>, vector<1x1x32x8xbf16>
    %166 = vector.shape_cast %165 : vector<1x1x32x8xbf16> to vector<32x8xbf16>
    %cst_135 = arith.constant dense<0.000000e+00> : vector<8x8xf32>
    %167 = tpu.matmul %26, %166, %cst_135 {dimension_numbers = #tpu.dot_dimension_numbers<[1], [0], [0], [1], [0, 0, 1, 1], [], []>} : vector<8x32xbf16>, vector<32x8xbf16>, vector<8x8xf32> -> vector<8x8xf32>
    %c0_136 = arith.constant 0 : index
    %c3_137 = arith.constant 3 : index
    %c0_138 = arith.constant 0 : index
    %c0_139 = arith.constant 0 : index
    %168 = vector.load %arg11[%c0_136, %c3_137, %c0_138, %c0_139] : memref<2x4x1x8xf32, #tpu.memory_space<vmem>>, vector<1x1x1x8xf32>
    %169 = vector.shape_cast %168 : vector<1x1x1x8xf32> to vector<1x8xf32>
    %170 = vector.broadcast %169 : vector<1x8xf32> to vector<8x8xf32>
    %171 = arith.addf %167, %170 : vector<8x8xf32>
    %172 = arith.truncf %171 : vector<8x8xf32> to vector<8x8xbf16>
    %c0_140 = arith.constant 0 : index
    %c3_141 = arith.constant 3 : index
    %c0_142 = arith.constant 0 : index
    %c0_143 = arith.constant 0 : index
    %173 = vector.load %arg12[%c0_140, %c3_141, %c0_142, %c0_143] : memref<2x4x32x8xbf16, #tpu.memory_space<vmem>>, vector<1x1x32x8xbf16>
    %174 = vector.shape_cast %173 : vector<1x1x32x8xbf16> to vector<32x8xbf16>
    %cst_144 = arith.constant dense<0.000000e+00> : vector<8x8xf32>
    %175 = tpu.matmul %26, %174, %cst_144 {dimension_numbers = #tpu.dot_dimension_numbers<[1], [0], [0], [1], [0, 0, 1, 1], [], []>} : vector<8x32xbf16>, vector<32x8xbf16>, vector<8x8xf32> -> vector<8x8xf32>
    %c0_145 = arith.constant 0 : index
    %c3_146 = arith.constant 3 : index
    %c0_147 = arith.constant 0 : index
    %c0_148 = arith.constant 0 : index
    %176 = vector.load %arg13[%c0_145, %c3_146, %c0_147, %c0_148] : memref<2x4x1x8xf32, #tpu.memory_space<vmem>>, vector<1x1x1x8xf32>
    %177 = vector.shape_cast %176 : vector<1x1x1x8xf32> to vector<1x8xf32>
    %178 = vector.broadcast %177 : vector<1x8xf32> to vector<8x8xf32>
    %179 = arith.addf %175, %178 : vector<8x8xf32>
    %180 = arith.truncf %179 : vector<8x8xf32> to vector<8x8xbf16>
    %cst_149 = arith.constant dense<0.000000e+00> : vector<8x8xf32>
    %181 = tpu.matmul %164, %172, %cst_149 {dimension_numbers = #tpu.dot_dimension_numbers<[1], [1], [0], [0], [0, 0, 1, 0], [], []>} : vector<8x8xbf16>, vector<8x8xbf16>, vector<8x8xf32> -> vector<8x8xf32>
    %182 = arith.addf %181, %25 : vector<8x8xf32>
    %cst_150 = arith.constant dense<0xFF800000> : vector<8xf32>
    %183 = vector.multi_reduction <maximumf>, %182, %cst_150 [1] : vector<8x8xf32> to vector<8xf32>
    %184 = vector.shape_cast %183 : vector<8xf32> to vector<8x1xf32>
    %185 = vector.broadcast %184 : vector<8x1xf32> to vector<8x8xf32>
    %186 = arith.subf %182, %185 : vector<8x8xf32>
    %187 = math.exp %186 : vector<8x8xf32>
    %cst_151 = arith.constant dense<0.000000e+00> : vector<8xf32>
    %188 = vector.multi_reduction <add>, %187, %cst_151 [1] : vector<8x8xf32> to vector<8xf32>
    %189 = vector.shape_cast %188 : vector<8xf32> to vector<8x1xf32>
    %190 = tpu.reciprocal %189 {approx = true} : vector<8x1xf32> -> vector<8x1xf32>
    %191 = vector.broadcast %190 : vector<8x1xf32> to vector<8x8xf32>
    %192 = arith.mulf %187, %191 : vector<8x8xf32>
    %193 = arith.truncf %192 : vector<8x8xf32> to vector<8x8xbf16>
    %cst_152 = arith.constant dense<0.000000e+00> : vector<8x8xf32>
    %194 = tpu.matmul %193, %180, %cst_152 {dimension_numbers = #tpu.dot_dimension_numbers<[1], [0], [0], [1], [0, 0, 1, 1], [], []>} : vector<8x8xbf16>, vector<8x8xbf16>, vector<8x8xf32> -> vector<8x8xf32>
    %195 = arith.truncf %194 : vector<8x8xf32> to vector<8x8xbf16>
    %c0_153 = arith.constant 0 : index
    %c3_154 = arith.constant 3 : index
    %c0_155 = arith.constant 0 : index
    %c0_156 = arith.constant 0 : index
    %196 = vector.load %arg14[%c0_153, %c3_154, %c0_155, %c0_156] : memref<2x4x8x32xbf16, #tpu.memory_space<vmem>>, vector<1x1x8x32xbf16>
    %197 = vector.shape_cast %196 : vector<1x1x8x32xbf16> to vector<8x32xbf16>
    %cst_157 = arith.constant dense<0.000000e+00> : vector<8x32xf32>
    %198 = tpu.matmul %195, %197, %cst_157 {dimension_numbers = #tpu.dot_dimension_numbers<[1], [0], [0], [1], [0, 0, 1, 1], [], []>} : vector<8x8xbf16>, vector<8x32xbf16>, vector<8x32xf32> -> vector<8x32xf32>
    %199 = arith.addf %156, %198 : vector<8x32xf32>
    %200 = arith.addf %13, %199 : vector<8x32xf32>
    %c0_158 = arith.constant 0 : index
    %c0_159 = arith.constant 0 : index
    %c0_160 = arith.constant 0 : index
    %201 = vector.load %arg15[%c0_158, %c0_159, %c0_160] : memref<2x1x32xf32, #tpu.memory_space<vmem>>, vector<1x1x32xf32>
    %202 = vector.shape_cast %201 : vector<1x1x32xf32> to vector<1x32xf32>
    %203 = vector.broadcast %202 : vector<1x32xf32> to vector<8x32xf32>
    %204 = arith.addf %200, %203 : vector<8x32xf32>
    %c0_161 = arith.constant 0 : index
    %c0_162 = arith.constant 0 : index
    %c0_163 = arith.constant 0 : index
    %205 = vector.load %arg16[%c0_161, %c0_162, %c0_163] : memref<2x1x32xf32, #tpu.memory_space<vmem>>, vector<1x1x32xf32>
    %206 = vector.shape_cast %205 : vector<1x1x32xf32> to vector<1x32xf32>
    %c0_164 = arith.constant 0 : index
    %c0_165 = arith.constant 0 : index
    %c0_166 = arith.constant 0 : index
    %207 = vector.load %arg17[%c0_164, %c0_165, %c0_166] : memref<2x1x32xf32, #tpu.memory_space<vmem>>, vector<1x1x32xf32>
    %208 = vector.shape_cast %207 : vector<1x1x32xf32> to vector<1x32xf32>
    %cst_167 = arith.constant dense<0.000000e+00> : vector<8xf32>
    %209 = vector.multi_reduction <add>, %204, %cst_167 [1] : vector<8x32xf32> to vector<8xf32>
    %210 = vector.shape_cast %209 : vector<8xf32> to vector<8x1xf32>
    %cst_168 = arith.constant 3.200000e+01 : f32
    %211 = vector.broadcast %cst_168 : f32 to vector<8x1xf32>
    %212 = arith.divf %210, %211 : vector<8x1xf32>
    %213 = vector.broadcast %212 : vector<8x1xf32> to vector<8x32xf32>
    %214 = arith.subf %204, %213 : vector<8x32xf32>
    %215 = arith.mulf %214, %214 : vector<8x32xf32>
    %cst_169 = arith.constant dense<0.000000e+00> : vector<8xf32>
    %216 = vector.multi_reduction <add>, %215, %cst_169 [1] : vector<8x32xf32> to vector<8xf32>
    %217 = vector.shape_cast %216 : vector<8xf32> to vector<8x1xf32>
    %cst_170 = arith.constant 3.200000e+01 : f32
    %218 = vector.broadcast %cst_170 : f32 to vector<8x1xf32>
    %219 = arith.divf %217, %218 : vector<8x1xf32>
    %220 = vector.broadcast %212 : vector<8x1xf32> to vector<8x32xf32>
    %221 = arith.subf %204, %220 : vector<8x32xf32>
    %cst_171 = arith.constant 9.99999974E-6 : f32
    %222 = vector.broadcast %cst_171 : f32 to vector<8x1xf32>
    %223 = arith.addf %219, %222 : vector<8x1xf32>
    %224 = math.rsqrt %223 : vector<8x1xf32>
    %225 = vector.broadcast %224 : vector<8x1xf32> to vector<8x32xf32>
    %226 = arith.mulf %221, %225 : vector<8x32xf32>
    %227 = vector.broadcast %206 : vector<1x32xf32> to vector<8x32xf32>
    %228 = arith.mulf %226, %227 : vector<8x32xf32>
    %229 = vector.broadcast %208 : vector<1x32xf32> to vector<8x32xf32>
    %230 = arith.addf %228, %229 : vector<8x32xf32>
    %231 = arith.truncf %230 : vector<8x32xf32> to vector<8x32xbf16>
    %c0_172 = arith.constant 0 : index
    %c0_173 = arith.constant 0 : index
    %c0_174 = arith.constant 0 : index
    %232 = vector.load %arg18[%c0_172, %c0_173, %c0_174] : memref<2x32x64xbf16, #tpu.memory_space<vmem>>, vector<1x32x64xbf16>
    %233 = vector.shape_cast %232 : vector<1x32x64xbf16> to vector<32x64xbf16>
    %cst_175 = arith.constant dense<0.000000e+00> : vector<8x64xf32>
    %234 = tpu.matmul %231, %233, %cst_175 {dimension_numbers = #tpu.dot_dimension_numbers<[1], [0], [0], [1], [0, 0, 1, 1], [], []>} : vector<8x32xbf16>, vector<32x64xbf16>, vector<8x64xf32> -> vector<8x64xf32>
    %c0_176 = arith.constant 0 : index
    %c0_177 = arith.constant 0 : index
    %c0_178 = arith.constant 0 : index
    %235 = vector.load %arg19[%c0_176, %c0_177, %c0_178] : memref<2x1x64xf32, #tpu.memory_space<vmem>>, vector<1x1x64xf32>
    %236 = vector.shape_cast %235 : vector<1x1x64xf32> to vector<1x64xf32>
    %237 = vector.broadcast %236 : vector<1x64xf32> to vector<8x64xf32>
    %238 = arith.addf %234, %237 : vector<8x64xf32>
    %cst_179 = arith.constant 0.000000e+00 : f32
    %239 = vector.broadcast %cst_179 : f32 to vector<8x64xf32>
    %240 = arith.maximumf %238, %239 : vector<8x64xf32>
    %241 = arith.truncf %240 : vector<8x64xf32> to vector<8x64xbf16>
    %c0_180 = arith.constant 0 : index
    %c0_181 = arith.constant 0 : index
    %c0_182 = arith.constant 0 : index
    %242 = vector.load %arg20[%c0_180, %c0_181, %c0_182] : memref<2x64x32xbf16, #tpu.memory_space<vmem>>, vector<1x64x32xbf16>
    %243 = vector.shape_cast %242 : vector<1x64x32xbf16> to vector<64x32xbf16>
    %cst_183 = arith.constant dense<0.000000e+00> : vector<8x32xf32>
    %244 = tpu.matmul %241, %243, %cst_183 {dimension_numbers = #tpu.dot_dimension_numbers<[1], [0], [0], [1], [0, 0, 1, 1], [], []>} : vector<8x64xbf16>, vector<64x32xbf16>, vector<8x32xf32> -> vector<8x32xf32>
    %c0_184 = arith.constant 0 : index
    %c0_185 = arith.constant 0 : index
    %c0_186 = arith.constant 0 : index
    %245 = vector.load %arg21[%c0_184, %c0_185, %c0_186] : memref<2x1x32xf32, #tpu.memory_space<vmem>>, vector<1x1x32xf32>
    %246 = vector.shape_cast %245 : vector<1x1x32xf32> to vector<1x32xf32>
    %247 = vector.broadcast %246 : vector<1x32xf32> to vector<8x32xf32>
    %248 = arith.addf %244, %247 : vector<8x32xf32>
    %249 = arith.addf %230, %248 : vector<8x32xf32>
    %c0_187 = arith.constant 0 : index
    %c0_188 = arith.constant 0 : index
    %c0_189 = arith.constant 0 : index
    %250 = vector.load %arg22[%c0_187, %c0_188, %c0_189] : memref<2x1x32xf32, #tpu.memory_space<vmem>>, vector<1x1x32xf32>
    %251 = vector.shape_cast %250 : vector<1x1x32xf32> to vector<1x32xf32>
    %c0_190 = arith.constant 0 : index
    %c0_191 = arith.constant 0 : index
    %c0_192 = arith.constant 0 : index
    %252 = vector.load %arg23[%c0_190, %c0_191, %c0_192] : memref<2x1x32xf32, #tpu.memory_space<vmem>>, vector<1x1x32xf32>
    %253 = vector.shape_cast %252 : vector<1x1x32xf32> to vector<1x32xf32>
    %cst_193 = arith.constant dense<0.000000e+00> : vector<8xf32>
    %254 = vector.multi_reduction <add>, %249, %cst_193 [1] : vector<8x32xf32> to vector<8xf32>
    %255 = vector.shape_cast %254 : vector<8xf32> to vector<8x1xf32>
    %cst_194 = arith.constant 3.200000e+01 : f32
    %256 = vector.broadcast %cst_194 : f32 to vector<8x1xf32>
    %257 = arith.divf %255, %256 : vector<8x1xf32>
    %258 = vector.broadcast %257 : vector<8x1xf32> to vector<8x32xf32>
    %259 = arith.subf %249, %258 : vector<8x32xf32>
    %260 = arith.mulf %259, %259 : vector<8x32xf32>
    %cst_195 = arith.constant dense<0.000000e+00> : vector<8xf32>
    %261 = vector.multi_reduction <add>, %260, %cst_195 [1] : vector<8x32xf32> to vector<8xf32>
    %262 = vector.shape_cast %261 : vector<8xf32> to vector<8x1xf32>
    %cst_196 = arith.constant 3.200000e+01 : f32
    %263 = vector.broadcast %cst_196 : f32 to vector<8x1xf32>
    %264 = arith.divf %262, %263 : vector<8x1xf32>
    %265 = vector.broadcast %257 : vector<8x1xf32> to vector<8x32xf32>
    %266 = arith.subf %249, %265 : vector<8x32xf32>
    %cst_197 = arith.constant 9.99999974E-6 : f32
    %267 = vector.broadcast %cst_197 : f32 to vector<8x1xf32>
    %268 = arith.addf %264, %267 : vector<8x1xf32>
    %269 = math.rsqrt %268 : vector<8x1xf32>
    %270 = vector.broadcast %269 : vector<8x1xf32> to vector<8x32xf32>
    %271 = arith.mulf %266, %270 : vector<8x32xf32>
    %272 = vector.broadcast %251 : vector<1x32xf32> to vector<8x32xf32>
    %273 = arith.mulf %271, %272 : vector<8x32xf32>
    %274 = vector.broadcast %253 : vector<1x32xf32> to vector<8x32xf32>
    %275 = arith.addf %273, %274 : vector<8x32xf32>
    %276 = arith.truncf %275 : vector<8x32xf32> to vector<8x32xbf16>
    %cst_198 = arith.constant 0.000000e+00 : f32
    %277 = vector.broadcast %cst_198 : f32 to vector<8x32xf32>
    %c1_199 = arith.constant 1 : index
    %c0_200 = arith.constant 0 : index
    %c0_201 = arith.constant 0 : index
    %c0_202 = arith.constant 0 : index
    %278 = vector.load %arg8[%c1_199, %c0_200, %c0_201, %c0_202] : memref<2x4x32x8xbf16, #tpu.memory_space<vmem>>, vector<1x1x32x8xbf16>
    %279 = vector.shape_cast %278 : vector<1x1x32x8xbf16> to vector<32x8xbf16>
    %cst_203 = arith.constant dense<0.000000e+00> : vector<8x8xf32>
    %280 = tpu.matmul %276, %279, %cst_203 {dimension_numbers = #tpu.dot_dimension_numbers<[1], [0], [0], [1], [0, 0, 1, 1], [], []>} : vector<8x32xbf16>, vector<32x8xbf16>, vector<8x8xf32> -> vector<8x8xf32>
    %c1_204 = arith.constant 1 : index
    %c0_205 = arith.constant 0 : index
    %c0_206 = arith.constant 0 : index
    %c0_207 = arith.constant 0 : index
    %281 = vector.load %arg9[%c1_204, %c0_205, %c0_206, %c0_207] : memref<2x4x1x8xf32, #tpu.memory_space<vmem>>, vector<1x1x1x8xf32>
    %282 = vector.shape_cast %281 : vector<1x1x1x8xf32> to vector<1x8xf32>
    %283 = vector.broadcast %282 : vector<1x8xf32> to vector<8x8xf32>
    %284 = arith.addf %280, %283 : vector<8x8xf32>
    %285 = arith.truncf %284 : vector<8x8xf32> to vector<8x8xbf16>
    %c1_208 = arith.constant 1 : index
    %c0_209 = arith.constant 0 : index
    %c0_210 = arith.constant 0 : index
    %c0_211 = arith.constant 0 : index
    %286 = vector.load %arg10[%c1_208, %c0_209, %c0_210, %c0_211] : memref<2x4x32x8xbf16, #tpu.memory_space<vmem>>, vector<1x1x32x8xbf16>
    %287 = vector.shape_cast %286 : vector<1x1x32x8xbf16> to vector<32x8xbf16>
    %cst_212 = arith.constant dense<0.000000e+00> : vector<8x8xf32>
    %288 = tpu.matmul %276, %287, %cst_212 {dimension_numbers = #tpu.dot_dimension_numbers<[1], [0], [0], [1], [0, 0, 1, 1], [], []>} : vector<8x32xbf16>, vector<32x8xbf16>, vector<8x8xf32> -> vector<8x8xf32>
    %c1_213 = arith.constant 1 : index
    %c0_214 = arith.constant 0 : index
    %c0_215 = arith.constant 0 : index
    %c0_216 = arith.constant 0 : index
    %289 = vector.load %arg11[%c1_213, %c0_214, %c0_215, %c0_216] : memref<2x4x1x8xf32, #tpu.memory_space<vmem>>, vector<1x1x1x8xf32>
    %290 = vector.shape_cast %289 : vector<1x1x1x8xf32> to vector<1x8xf32>
    %291 = vector.broadcast %290 : vector<1x8xf32> to vector<8x8xf32>
    %292 = arith.addf %288, %291 : vector<8x8xf32>
    %293 = arith.truncf %292 : vector<8x8xf32> to vector<8x8xbf16>
    %c1_217 = arith.constant 1 : index
    %c0_218 = arith.constant 0 : index
    %c0_219 = arith.constant 0 : index
    %c0_220 = arith.constant 0 : index
    %294 = vector.load %arg12[%c1_217, %c0_218, %c0_219, %c0_220] : memref<2x4x32x8xbf16, #tpu.memory_space<vmem>>, vector<1x1x32x8xbf16>
    %295 = vector.shape_cast %294 : vector<1x1x32x8xbf16> to vector<32x8xbf16>
    %cst_221 = arith.constant dense<0.000000e+00> : vector<8x8xf32>
    %296 = tpu.matmul %276, %295, %cst_221 {dimension_numbers = #tpu.dot_dimension_numbers<[1], [0], [0], [1], [0, 0, 1, 1], [], []>} : vector<8x32xbf16>, vector<32x8xbf16>, vector<8x8xf32> -> vector<8x8xf32>
    %c1_222 = arith.constant 1 : index
    %c0_223 = arith.constant 0 : index
    %c0_224 = arith.constant 0 : index
    %c0_225 = arith.constant 0 : index
    %297 = vector.load %arg13[%c1_222, %c0_223, %c0_224, %c0_225] : memref<2x4x1x8xf32, #tpu.memory_space<vmem>>, vector<1x1x1x8xf32>
    %298 = vector.shape_cast %297 : vector<1x1x1x8xf32> to vector<1x8xf32>
    %299 = vector.broadcast %298 : vector<1x8xf32> to vector<8x8xf32>
    %300 = arith.addf %296, %299 : vector<8x8xf32>
    %301 = arith.truncf %300 : vector<8x8xf32> to vector<8x8xbf16>
    %cst_226 = arith.constant dense<0.000000e+00> : vector<8x8xf32>
    %302 = tpu.matmul %285, %293, %cst_226 {dimension_numbers = #tpu.dot_dimension_numbers<[1], [1], [0], [0], [0, 0, 1, 0], [], []>} : vector<8x8xbf16>, vector<8x8xbf16>, vector<8x8xf32> -> vector<8x8xf32>
    %303 = arith.addf %302, %25 : vector<8x8xf32>
    %cst_227 = arith.constant dense<0xFF800000> : vector<8xf32>
    %304 = vector.multi_reduction <maximumf>, %303, %cst_227 [1] : vector<8x8xf32> to vector<8xf32>
    %305 = vector.shape_cast %304 : vector<8xf32> to vector<8x1xf32>
    %306 = vector.broadcast %305 : vector<8x1xf32> to vector<8x8xf32>
    %307 = arith.subf %303, %306 : vector<8x8xf32>
    %308 = math.exp %307 : vector<8x8xf32>
    %cst_228 = arith.constant dense<0.000000e+00> : vector<8xf32>
    %309 = vector.multi_reduction <add>, %308, %cst_228 [1] : vector<8x8xf32> to vector<8xf32>
    %310 = vector.shape_cast %309 : vector<8xf32> to vector<8x1xf32>
    %311 = tpu.reciprocal %310 {approx = true} : vector<8x1xf32> -> vector<8x1xf32>
    %312 = vector.broadcast %311 : vector<8x1xf32> to vector<8x8xf32>
    %313 = arith.mulf %308, %312 : vector<8x8xf32>
    %314 = arith.truncf %313 : vector<8x8xf32> to vector<8x8xbf16>
    %cst_229 = arith.constant dense<0.000000e+00> : vector<8x8xf32>
    %315 = tpu.matmul %314, %301, %cst_229 {dimension_numbers = #tpu.dot_dimension_numbers<[1], [0], [0], [1], [0, 0, 1, 1], [], []>} : vector<8x8xbf16>, vector<8x8xbf16>, vector<8x8xf32> -> vector<8x8xf32>
    %316 = arith.truncf %315 : vector<8x8xf32> to vector<8x8xbf16>
    %c1_230 = arith.constant 1 : index
    %c0_231 = arith.constant 0 : index
    %c0_232 = arith.constant 0 : index
    %c0_233 = arith.constant 0 : index
    %317 = vector.load %arg14[%c1_230, %c0_231, %c0_232, %c0_233] : memref<2x4x8x32xbf16, #tpu.memory_space<vmem>>, vector<1x1x8x32xbf16>
    %318 = vector.shape_cast %317 : vector<1x1x8x32xbf16> to vector<8x32xbf16>
    %cst_234 = arith.constant dense<0.000000e+00> : vector<8x32xf32>
    %319 = tpu.matmul %316, %318, %cst_234 {dimension_numbers = #tpu.dot_dimension_numbers<[1], [0], [0], [1], [0, 0, 1, 1], [], []>} : vector<8x8xbf16>, vector<8x32xbf16>, vector<8x32xf32> -> vector<8x32xf32>
    %320 = arith.addf %277, %319 : vector<8x32xf32>
    %c1_235 = arith.constant 1 : index
    %c1_236 = arith.constant 1 : index
    %c0_237 = arith.constant 0 : index
    %c0_238 = arith.constant 0 : index
    %321 = vector.load %arg8[%c1_235, %c1_236, %c0_237, %c0_238] : memref<2x4x32x8xbf16, #tpu.memory_space<vmem>>, vector<1x1x32x8xbf16>
    %322 = vector.shape_cast %321 : vector<1x1x32x8xbf16> to vector<32x8xbf16>
    %cst_239 = arith.constant dense<0.000000e+00> : vector<8x8xf32>
    %323 = tpu.matmul %276, %322, %cst_239 {dimension_numbers = #tpu.dot_dimension_numbers<[1], [0], [0], [1], [0, 0, 1, 1], [], []>} : vector<8x32xbf16>, vector<32x8xbf16>, vector<8x8xf32> -> vector<8x8xf32>
    %c1_240 = arith.constant 1 : index
    %c1_241 = arith.constant 1 : index
    %c0_242 = arith.constant 0 : index
    %c0_243 = arith.constant 0 : index
    %324 = vector.load %arg9[%c1_240, %c1_241, %c0_242, %c0_243] : memref<2x4x1x8xf32, #tpu.memory_space<vmem>>, vector<1x1x1x8xf32>
    %325 = vector.shape_cast %324 : vector<1x1x1x8xf32> to vector<1x8xf32>
    %326 = vector.broadcast %325 : vector<1x8xf32> to vector<8x8xf32>
    %327 = arith.addf %323, %326 : vector<8x8xf32>
    %328 = arith.truncf %327 : vector<8x8xf32> to vector<8x8xbf16>
    %c1_244 = arith.constant 1 : index
    %c1_245 = arith.constant 1 : index
    %c0_246 = arith.constant 0 : index
    %c0_247 = arith.constant 0 : index
    %329 = vector.load %arg10[%c1_244, %c1_245, %c0_246, %c0_247] : memref<2x4x32x8xbf16, #tpu.memory_space<vmem>>, vector<1x1x32x8xbf16>
    %330 = vector.shape_cast %329 : vector<1x1x32x8xbf16> to vector<32x8xbf16>
    %cst_248 = arith.constant dense<0.000000e+00> : vector<8x8xf32>
    %331 = tpu.matmul %276, %330, %cst_248 {dimension_numbers = #tpu.dot_dimension_numbers<[1], [0], [0], [1], [0, 0, 1, 1], [], []>} : vector<8x32xbf16>, vector<32x8xbf16>, vector<8x8xf32> -> vector<8x8xf32>
    %c1_249 = arith.constant 1 : index
    %c1_250 = arith.constant 1 : index
    %c0_251 = arith.constant 0 : index
    %c0_252 = arith.constant 0 : index
    %332 = vector.load %arg11[%c1_249, %c1_250, %c0_251, %c0_252] : memref<2x4x1x8xf32, #tpu.memory_space<vmem>>, vector<1x1x1x8xf32>
    %333 = vector.shape_cast %332 : vector<1x1x1x8xf32> to vector<1x8xf32>
    %334 = vector.broadcast %333 : vector<1x8xf32> to vector<8x8xf32>
    %335 = arith.addf %331, %334 : vector<8x8xf32>
    %336 = arith.truncf %335 : vector<8x8xf32> to vector<8x8xbf16>
    %c1_253 = arith.constant 1 : index
    %c1_254 = arith.constant 1 : index
    %c0_255 = arith.constant 0 : index
    %c0_256 = arith.constant 0 : index
    %337 = vector.load %arg12[%c1_253, %c1_254, %c0_255, %c0_256] : memref<2x4x32x8xbf16, #tpu.memory_space<vmem>>, vector<1x1x32x8xbf16>
    %338 = vector.shape_cast %337 : vector<1x1x32x8xbf16> to vector<32x8xbf16>
    %cst_257 = arith.constant dense<0.000000e+00> : vector<8x8xf32>
    %339 = tpu.matmul %276, %338, %cst_257 {dimension_numbers = #tpu.dot_dimension_numbers<[1], [0], [0], [1], [0, 0, 1, 1], [], []>} : vector<8x32xbf16>, vector<32x8xbf16>, vector<8x8xf32> -> vector<8x8xf32>
    %c1_258 = arith.constant 1 : index
    %c1_259 = arith.constant 1 : index
    %c0_260 = arith.constant 0 : index
    %c0_261 = arith.constant 0 : index
    %340 = vector.load %arg13[%c1_258, %c1_259, %c0_260, %c0_261] : memref<2x4x1x8xf32, #tpu.memory_space<vmem>>, vector<1x1x1x8xf32>
    %341 = vector.shape_cast %340 : vector<1x1x1x8xf32> to vector<1x8xf32>
    %342 = vector.broadcast %341 : vector<1x8xf32> to vector<8x8xf32>
    %343 = arith.addf %339, %342 : vector<8x8xf32>
    %344 = arith.truncf %343 : vector<8x8xf32> to vector<8x8xbf16>
    %cst_262 = arith.constant dense<0.000000e+00> : vector<8x8xf32>
    %345 = tpu.matmul %328, %336, %cst_262 {dimension_numbers = #tpu.dot_dimension_numbers<[1], [1], [0], [0], [0, 0, 1, 0], [], []>} : vector<8x8xbf16>, vector<8x8xbf16>, vector<8x8xf32> -> vector<8x8xf32>
    %346 = arith.addf %345, %25 : vector<8x8xf32>
    %cst_263 = arith.constant dense<0xFF800000> : vector<8xf32>
    %347 = vector.multi_reduction <maximumf>, %346, %cst_263 [1] : vector<8x8xf32> to vector<8xf32>
    %348 = vector.shape_cast %347 : vector<8xf32> to vector<8x1xf32>
    %349 = vector.broadcast %348 : vector<8x1xf32> to vector<8x8xf32>
    %350 = arith.subf %346, %349 : vector<8x8xf32>
    %351 = math.exp %350 : vector<8x8xf32>
    %cst_264 = arith.constant dense<0.000000e+00> : vector<8xf32>
    %352 = vector.multi_reduction <add>, %351, %cst_264 [1] : vector<8x8xf32> to vector<8xf32>
    %353 = vector.shape_cast %352 : vector<8xf32> to vector<8x1xf32>
    %354 = tpu.reciprocal %353 {approx = true} : vector<8x1xf32> -> vector<8x1xf32>
    %355 = vector.broadcast %354 : vector<8x1xf32> to vector<8x8xf32>
    %356 = arith.mulf %351, %355 : vector<8x8xf32>
    %357 = arith.truncf %356 : vector<8x8xf32> to vector<8x8xbf16>
    %cst_265 = arith.constant dense<0.000000e+00> : vector<8x8xf32>
    %358 = tpu.matmul %357, %344, %cst_265 {dimension_numbers = #tpu.dot_dimension_numbers<[1], [0], [0], [1], [0, 0, 1, 1], [], []>} : vector<8x8xbf16>, vector<8x8xbf16>, vector<8x8xf32> -> vector<8x8xf32>
    %359 = arith.truncf %358 : vector<8x8xf32> to vector<8x8xbf16>
    %c1_266 = arith.constant 1 : index
    %c1_267 = arith.constant 1 : index
    %c0_268 = arith.constant 0 : index
    %c0_269 = arith.constant 0 : index
    %360 = vector.load %arg14[%c1_266, %c1_267, %c0_268, %c0_269] : memref<2x4x8x32xbf16, #tpu.memory_space<vmem>>, vector<1x1x8x32xbf16>
    %361 = vector.shape_cast %360 : vector<1x1x8x32xbf16> to vector<8x32xbf16>
    %cst_270 = arith.constant dense<0.000000e+00> : vector<8x32xf32>
    %362 = tpu.matmul %359, %361, %cst_270 {dimension_numbers = #tpu.dot_dimension_numbers<[1], [0], [0], [1], [0, 0, 1, 1], [], []>} : vector<8x8xbf16>, vector<8x32xbf16>, vector<8x32xf32> -> vector<8x32xf32>
    %363 = arith.addf %320, %362 : vector<8x32xf32>
    %c1_271 = arith.constant 1 : index
    %c2_272 = arith.constant 2 : index
    %c0_273 = arith.constant 0 : index
    %c0_274 = arith.constant 0 : index
    %364 = vector.load %arg8[%c1_271, %c2_272, %c0_273, %c0_274] : memref<2x4x32x8xbf16, #tpu.memory_space<vmem>>, vector<1x1x32x8xbf16>
    %365 = vector.shape_cast %364 : vector<1x1x32x8xbf16> to vector<32x8xbf16>
    %cst_275 = arith.constant dense<0.000000e+00> : vector<8x8xf32>
    %366 = tpu.matmul %276, %365, %cst_275 {dimension_numbers = #tpu.dot_dimension_numbers<[1], [0], [0], [1], [0, 0, 1, 1], [], []>} : vector<8x32xbf16>, vector<32x8xbf16>, vector<8x8xf32> -> vector<8x8xf32>
    %c1_276 = arith.constant 1 : index
    %c2_277 = arith.constant 2 : index
    %c0_278 = arith.constant 0 : index
    %c0_279 = arith.constant 0 : index
    %367 = vector.load %arg9[%c1_276, %c2_277, %c0_278, %c0_279] : memref<2x4x1x8xf32, #tpu.memory_space<vmem>>, vector<1x1x1x8xf32>
    %368 = vector.shape_cast %367 : vector<1x1x1x8xf32> to vector<1x8xf32>
    %369 = vector.broadcast %368 : vector<1x8xf32> to vector<8x8xf32>
    %370 = arith.addf %366, %369 : vector<8x8xf32>
    %371 = arith.truncf %370 : vector<8x8xf32> to vector<8x8xbf16>
    %c1_280 = arith.constant 1 : index
    %c2_281 = arith.constant 2 : index
    %c0_282 = arith.constant 0 : index
    %c0_283 = arith.constant 0 : index
    %372 = vector.load %arg10[%c1_280, %c2_281, %c0_282, %c0_283] : memref<2x4x32x8xbf16, #tpu.memory_space<vmem>>, vector<1x1x32x8xbf16>
    %373 = vector.shape_cast %372 : vector<1x1x32x8xbf16> to vector<32x8xbf16>
    %cst_284 = arith.constant dense<0.000000e+00> : vector<8x8xf32>
    %374 = tpu.matmul %276, %373, %cst_284 {dimension_numbers = #tpu.dot_dimension_numbers<[1], [0], [0], [1], [0, 0, 1, 1], [], []>} : vector<8x32xbf16>, vector<32x8xbf16>, vector<8x8xf32> -> vector<8x8xf32>
    %c1_285 = arith.constant 1 : index
    %c2_286 = arith.constant 2 : index
    %c0_287 = arith.constant 0 : index
    %c0_288 = arith.constant 0 : index
    %375 = vector.load %arg11[%c1_285, %c2_286, %c0_287, %c0_288] : memref<2x4x1x8xf32, #tpu.memory_space<vmem>>, vector<1x1x1x8xf32>
    %376 = vector.shape_cast %375 : vector<1x1x1x8xf32> to vector<1x8xf32>
    %377 = vector.broadcast %376 : vector<1x8xf32> to vector<8x8xf32>
    %378 = arith.addf %374, %377 : vector<8x8xf32>
    %379 = arith.truncf %378 : vector<8x8xf32> to vector<8x8xbf16>
    %c1_289 = arith.constant 1 : index
    %c2_290 = arith.constant 2 : index
    %c0_291 = arith.constant 0 : index
    %c0_292 = arith.constant 0 : index
    %380 = vector.load %arg12[%c1_289, %c2_290, %c0_291, %c0_292] : memref<2x4x32x8xbf16, #tpu.memory_space<vmem>>, vector<1x1x32x8xbf16>
    %381 = vector.shape_cast %380 : vector<1x1x32x8xbf16> to vector<32x8xbf16>
    %cst_293 = arith.constant dense<0.000000e+00> : vector<8x8xf32>
    %382 = tpu.matmul %276, %381, %cst_293 {dimension_numbers = #tpu.dot_dimension_numbers<[1], [0], [0], [1], [0, 0, 1, 1], [], []>} : vector<8x32xbf16>, vector<32x8xbf16>, vector<8x8xf32> -> vector<8x8xf32>
    %c1_294 = arith.constant 1 : index
    %c2_295 = arith.constant 2 : index
    %c0_296 = arith.constant 0 : index
    %c0_297 = arith.constant 0 : index
    %383 = vector.load %arg13[%c1_294, %c2_295, %c0_296, %c0_297] : memref<2x4x1x8xf32, #tpu.memory_space<vmem>>, vector<1x1x1x8xf32>
    %384 = vector.shape_cast %383 : vector<1x1x1x8xf32> to vector<1x8xf32>
    %385 = vector.broadcast %384 : vector<1x8xf32> to vector<8x8xf32>
    %386 = arith.addf %382, %385 : vector<8x8xf32>
    %387 = arith.truncf %386 : vector<8x8xf32> to vector<8x8xbf16>
    %cst_298 = arith.constant dense<0.000000e+00> : vector<8x8xf32>
    %388 = tpu.matmul %371, %379, %cst_298 {dimension_numbers = #tpu.dot_dimension_numbers<[1], [1], [0], [0], [0, 0, 1, 0], [], []>} : vector<8x8xbf16>, vector<8x8xbf16>, vector<8x8xf32> -> vector<8x8xf32>
    %389 = arith.addf %388, %25 : vector<8x8xf32>
    %cst_299 = arith.constant dense<0xFF800000> : vector<8xf32>
    %390 = vector.multi_reduction <maximumf>, %389, %cst_299 [1] : vector<8x8xf32> to vector<8xf32>
    %391 = vector.shape_cast %390 : vector<8xf32> to vector<8x1xf32>
    %392 = vector.broadcast %391 : vector<8x1xf32> to vector<8x8xf32>
    %393 = arith.subf %389, %392 : vector<8x8xf32>
    %394 = math.exp %393 : vector<8x8xf32>
    %cst_300 = arith.constant dense<0.000000e+00> : vector<8xf32>
    %395 = vector.multi_reduction <add>, %394, %cst_300 [1] : vector<8x8xf32> to vector<8xf32>
    %396 = vector.shape_cast %395 : vector<8xf32> to vector<8x1xf32>
    %397 = tpu.reciprocal %396 {approx = true} : vector<8x1xf32> -> vector<8x1xf32>
    %398 = vector.broadcast %397 : vector<8x1xf32> to vector<8x8xf32>
    %399 = arith.mulf %394, %398 : vector<8x8xf32>
    %400 = arith.truncf %399 : vector<8x8xf32> to vector<8x8xbf16>
    %cst_301 = arith.constant dense<0.000000e+00> : vector<8x8xf32>
    %401 = tpu.matmul %400, %387, %cst_301 {dimension_numbers = #tpu.dot_dimension_numbers<[1], [0], [0], [1], [0, 0, 1, 1], [], []>} : vector<8x8xbf16>, vector<8x8xbf16>, vector<8x8xf32> -> vector<8x8xf32>
    %402 = arith.truncf %401 : vector<8x8xf32> to vector<8x8xbf16>
    %c1_302 = arith.constant 1 : index
    %c2_303 = arith.constant 2 : index
    %c0_304 = arith.constant 0 : index
    %c0_305 = arith.constant 0 : index
    %403 = vector.load %arg14[%c1_302, %c2_303, %c0_304, %c0_305] : memref<2x4x8x32xbf16, #tpu.memory_space<vmem>>, vector<1x1x8x32xbf16>
    %404 = vector.shape_cast %403 : vector<1x1x8x32xbf16> to vector<8x32xbf16>
    %cst_306 = arith.constant dense<0.000000e+00> : vector<8x32xf32>
    %405 = tpu.matmul %402, %404, %cst_306 {dimension_numbers = #tpu.dot_dimension_numbers<[1], [0], [0], [1], [0, 0, 1, 1], [], []>} : vector<8x8xbf16>, vector<8x32xbf16>, vector<8x32xf32> -> vector<8x32xf32>
    %406 = arith.addf %363, %405 : vector<8x32xf32>
    %c1_307 = arith.constant 1 : index
    %c3_308 = arith.constant 3 : index
    %c0_309 = arith.constant 0 : index
    %c0_310 = arith.constant 0 : index
    %407 = vector.load %arg8[%c1_307, %c3_308, %c0_309, %c0_310] : memref<2x4x32x8xbf16, #tpu.memory_space<vmem>>, vector<1x1x32x8xbf16>
    %408 = vector.shape_cast %407 : vector<1x1x32x8xbf16> to vector<32x8xbf16>
    %cst_311 = arith.constant dense<0.000000e+00> : vector<8x8xf32>
    %409 = tpu.matmul %276, %408, %cst_311 {dimension_numbers = #tpu.dot_dimension_numbers<[1], [0], [0], [1], [0, 0, 1, 1], [], []>} : vector<8x32xbf16>, vector<32x8xbf16>, vector<8x8xf32> -> vector<8x8xf32>
    %c1_312 = arith.constant 1 : index
    %c3_313 = arith.constant 3 : index
    %c0_314 = arith.constant 0 : index
    %c0_315 = arith.constant 0 : index
    %410 = vector.load %arg9[%c1_312, %c3_313, %c0_314, %c0_315] : memref<2x4x1x8xf32, #tpu.memory_space<vmem>>, vector<1x1x1x8xf32>
    %411 = vector.shape_cast %410 : vector<1x1x1x8xf32> to vector<1x8xf32>
    %412 = vector.broadcast %411 : vector<1x8xf32> to vector<8x8xf32>
    %413 = arith.addf %409, %412 : vector<8x8xf32>
    %414 = arith.truncf %413 : vector<8x8xf32> to vector<8x8xbf16>
    %c1_316 = arith.constant 1 : index
    %c3_317 = arith.constant 3 : index
    %c0_318 = arith.constant 0 : index
    %c0_319 = arith.constant 0 : index
    %415 = vector.load %arg10[%c1_316, %c3_317, %c0_318, %c0_319] : memref<2x4x32x8xbf16, #tpu.memory_space<vmem>>, vector<1x1x32x8xbf16>
    %416 = vector.shape_cast %415 : vector<1x1x32x8xbf16> to vector<32x8xbf16>
    %cst_320 = arith.constant dense<0.000000e+00> : vector<8x8xf32>
    %417 = tpu.matmul %276, %416, %cst_320 {dimension_numbers = #tpu.dot_dimension_numbers<[1], [0], [0], [1], [0, 0, 1, 1], [], []>} : vector<8x32xbf16>, vector<32x8xbf16>, vector<8x8xf32> -> vector<8x8xf32>
    %c1_321 = arith.constant 1 : index
    %c3_322 = arith.constant 3 : index
    %c0_323 = arith.constant 0 : index
    %c0_324 = arith.constant 0 : index
    %418 = vector.load %arg11[%c1_321, %c3_322, %c0_323, %c0_324] : memref<2x4x1x8xf32, #tpu.memory_space<vmem>>, vector<1x1x1x8xf32>
    %419 = vector.shape_cast %418 : vector<1x1x1x8xf32> to vector<1x8xf32>
    %420 = vector.broadcast %419 : vector<1x8xf32> to vector<8x8xf32>
    %421 = arith.addf %417, %420 : vector<8x8xf32>
    %422 = arith.truncf %421 : vector<8x8xf32> to vector<8x8xbf16>
    %c1_325 = arith.constant 1 : index
    %c3_326 = arith.constant 3 : index
    %c0_327 = arith.constant 0 : index
    %c0_328 = arith.constant 0 : index
    %423 = vector.load %arg12[%c1_325, %c3_326, %c0_327, %c0_328] : memref<2x4x32x8xbf16, #tpu.memory_space<vmem>>, vector<1x1x32x8xbf16>
    %424 = vector.shape_cast %423 : vector<1x1x32x8xbf16> to vector<32x8xbf16>
    %cst_329 = arith.constant dense<0.000000e+00> : vector<8x8xf32>
    %425 = tpu.matmul %276, %424, %cst_329 {dimension_numbers = #tpu.dot_dimension_numbers<[1], [0], [0], [1], [0, 0, 1, 1], [], []>} : vector<8x32xbf16>, vector<32x8xbf16>, vector<8x8xf32> -> vector<8x8xf32>
    %c1_330 = arith.constant 1 : index
    %c3_331 = arith.constant 3 : index
    %c0_332 = arith.constant 0 : index
    %c0_333 = arith.constant 0 : index
    %426 = vector.load %arg13[%c1_330, %c3_331, %c0_332, %c0_333] : memref<2x4x1x8xf32, #tpu.memory_space<vmem>>, vector<1x1x1x8xf32>
    %427 = vector.shape_cast %426 : vector<1x1x1x8xf32> to vector<1x8xf32>
    %428 = vector.broadcast %427 : vector<1x8xf32> to vector<8x8xf32>
    %429 = arith.addf %425, %428 : vector<8x8xf32>
    %430 = arith.truncf %429 : vector<8x8xf32> to vector<8x8xbf16>
    %cst_334 = arith.constant dense<0.000000e+00> : vector<8x8xf32>
    %431 = tpu.matmul %414, %422, %cst_334 {dimension_numbers = #tpu.dot_dimension_numbers<[1], [1], [0], [0], [0, 0, 1, 0], [], []>} : vector<8x8xbf16>, vector<8x8xbf16>, vector<8x8xf32> -> vector<8x8xf32>
    %432 = arith.addf %431, %25 : vector<8x8xf32>
    %cst_335 = arith.constant dense<0xFF800000> : vector<8xf32>
    %433 = vector.multi_reduction <maximumf>, %432, %cst_335 [1] : vector<8x8xf32> to vector<8xf32>
    %434 = vector.shape_cast %433 : vector<8xf32> to vector<8x1xf32>
    %435 = vector.broadcast %434 : vector<8x1xf32> to vector<8x8xf32>
    %436 = arith.subf %432, %435 : vector<8x8xf32>
    %437 = math.exp %436 : vector<8x8xf32>
    %cst_336 = arith.constant dense<0.000000e+00> : vector<8xf32>
    %438 = vector.multi_reduction <add>, %437, %cst_336 [1] : vector<8x8xf32> to vector<8xf32>
    %439 = vector.shape_cast %438 : vector<8xf32> to vector<8x1xf32>
    %440 = tpu.reciprocal %439 {approx = true} : vector<8x1xf32> -> vector<8x1xf32>
    %441 = vector.broadcast %440 : vector<8x1xf32> to vector<8x8xf32>
    %442 = arith.mulf %437, %441 : vector<8x8xf32>
    %443 = arith.truncf %442 : vector<8x8xf32> to vector<8x8xbf16>
    %cst_337 = arith.constant dense<0.000000e+00> : vector<8x8xf32>
    %444 = tpu.matmul %443, %430, %cst_337 {dimension_numbers = #tpu.dot_dimension_numbers<[1], [0], [0], [1], [0, 0, 1, 1], [], []>} : vector<8x8xbf16>, vector<8x8xbf16>, vector<8x8xf32> -> vector<8x8xf32>
    %445 = arith.truncf %444 : vector<8x8xf32> to vector<8x8xbf16>
    %c1_338 = arith.constant 1 : index
    %c3_339 = arith.constant 3 : index
    %c0_340 = arith.constant 0 : index
    %c0_341 = arith.constant 0 : index
    %446 = vector.load %arg14[%c1_338, %c3_339, %c0_340, %c0_341] : memref<2x4x8x32xbf16, #tpu.memory_space<vmem>>, vector<1x1x8x32xbf16>
    %447 = vector.shape_cast %446 : vector<1x1x8x32xbf16> to vector<8x32xbf16>
    %cst_342 = arith.constant dense<0.000000e+00> : vector<8x32xf32>
    %448 = tpu.matmul %445, %447, %cst_342 {dimension_numbers = #tpu.dot_dimension_numbers<[1], [0], [0], [1], [0, 0, 1, 1], [], []>} : vector<8x8xbf16>, vector<8x32xbf16>, vector<8x32xf32> -> vector<8x32xf32>
    %449 = arith.addf %406, %448 : vector<8x32xf32>
    %450 = arith.addf %275, %449 : vector<8x32xf32>
    %c1_343 = arith.constant 1 : index
    %c0_344 = arith.constant 0 : index
    %c0_345 = arith.constant 0 : index
    %451 = vector.load %arg15[%c1_343, %c0_344, %c0_345] : memref<2x1x32xf32, #tpu.memory_space<vmem>>, vector<1x1x32xf32>
    %452 = vector.shape_cast %451 : vector<1x1x32xf32> to vector<1x32xf32>
    %453 = vector.broadcast %452 : vector<1x32xf32> to vector<8x32xf32>
    %454 = arith.addf %450, %453 : vector<8x32xf32>
    %c1_346 = arith.constant 1 : index
    %c0_347 = arith.constant 0 : index
    %c0_348 = arith.constant 0 : index
    %455 = vector.load %arg16[%c1_346, %c0_347, %c0_348] : memref<2x1x32xf32, #tpu.memory_space<vmem>>, vector<1x1x32xf32>
    %456 = vector.shape_cast %455 : vector<1x1x32xf32> to vector<1x32xf32>
    %c1_349 = arith.constant 1 : index
    %c0_350 = arith.constant 0 : index
    %c0_351 = arith.constant 0 : index
    %457 = vector.load %arg17[%c1_349, %c0_350, %c0_351] : memref<2x1x32xf32, #tpu.memory_space<vmem>>, vector<1x1x32xf32>
    %458 = vector.shape_cast %457 : vector<1x1x32xf32> to vector<1x32xf32>
    %cst_352 = arith.constant dense<0.000000e+00> : vector<8xf32>
    %459 = vector.multi_reduction <add>, %454, %cst_352 [1] : vector<8x32xf32> to vector<8xf32>
    %460 = vector.shape_cast %459 : vector<8xf32> to vector<8x1xf32>
    %cst_353 = arith.constant 3.200000e+01 : f32
    %461 = vector.broadcast %cst_353 : f32 to vector<8x1xf32>
    %462 = arith.divf %460, %461 : vector<8x1xf32>
    %463 = vector.broadcast %462 : vector<8x1xf32> to vector<8x32xf32>
    %464 = arith.subf %454, %463 : vector<8x32xf32>
    %465 = arith.mulf %464, %464 : vector<8x32xf32>
    %cst_354 = arith.constant dense<0.000000e+00> : vector<8xf32>
    %466 = vector.multi_reduction <add>, %465, %cst_354 [1] : vector<8x32xf32> to vector<8xf32>
    %467 = vector.shape_cast %466 : vector<8xf32> to vector<8x1xf32>
    %cst_355 = arith.constant 3.200000e+01 : f32
    %468 = vector.broadcast %cst_355 : f32 to vector<8x1xf32>
    %469 = arith.divf %467, %468 : vector<8x1xf32>
    %470 = vector.broadcast %462 : vector<8x1xf32> to vector<8x32xf32>
    %471 = arith.subf %454, %470 : vector<8x32xf32>
    %cst_356 = arith.constant 9.99999974E-6 : f32
    %472 = vector.broadcast %cst_356 : f32 to vector<8x1xf32>
    %473 = arith.addf %469, %472 : vector<8x1xf32>
    %474 = math.rsqrt %473 : vector<8x1xf32>
    %475 = vector.broadcast %474 : vector<8x1xf32> to vector<8x32xf32>
    %476 = arith.mulf %471, %475 : vector<8x32xf32>
    %477 = vector.broadcast %456 : vector<1x32xf32> to vector<8x32xf32>
    %478 = arith.mulf %476, %477 : vector<8x32xf32>
    %479 = vector.broadcast %458 : vector<1x32xf32> to vector<8x32xf32>
    %480 = arith.addf %478, %479 : vector<8x32xf32>
    %481 = arith.truncf %480 : vector<8x32xf32> to vector<8x32xbf16>
    %c1_357 = arith.constant 1 : index
    %c0_358 = arith.constant 0 : index
    %c0_359 = arith.constant 0 : index
    %482 = vector.load %arg18[%c1_357, %c0_358, %c0_359] : memref<2x32x64xbf16, #tpu.memory_space<vmem>>, vector<1x32x64xbf16>
    %483 = vector.shape_cast %482 : vector<1x32x64xbf16> to vector<32x64xbf16>
    %cst_360 = arith.constant dense<0.000000e+00> : vector<8x64xf32>
    %484 = tpu.matmul %481, %483, %cst_360 {dimension_numbers = #tpu.dot_dimension_numbers<[1], [0], [0], [1], [0, 0, 1, 1], [], []>} : vector<8x32xbf16>, vector<32x64xbf16>, vector<8x64xf32> -> vector<8x64xf32>
    %c1_361 = arith.constant 1 : index
    %c0_362 = arith.constant 0 : index
    %c0_363 = arith.constant 0 : index
    %485 = vector.load %arg19[%c1_361, %c0_362, %c0_363] : memref<2x1x64xf32, #tpu.memory_space<vmem>>, vector<1x1x64xf32>
    %486 = vector.shape_cast %485 : vector<1x1x64xf32> to vector<1x64xf32>
    %487 = vector.broadcast %486 : vector<1x64xf32> to vector<8x64xf32>
    %488 = arith.addf %484, %487 : vector<8x64xf32>
    %cst_364 = arith.constant 0.000000e+00 : f32
    %489 = vector.broadcast %cst_364 : f32 to vector<8x64xf32>
    %490 = arith.maximumf %488, %489 : vector<8x64xf32>
    %491 = arith.truncf %490 : vector<8x64xf32> to vector<8x64xbf16>
    %c1_365 = arith.constant 1 : index
    %c0_366 = arith.constant 0 : index
    %c0_367 = arith.constant 0 : index
    %492 = vector.load %arg20[%c1_365, %c0_366, %c0_367] : memref<2x64x32xbf16, #tpu.memory_space<vmem>>, vector<1x64x32xbf16>
    %493 = vector.shape_cast %492 : vector<1x64x32xbf16> to vector<64x32xbf16>
    %cst_368 = arith.constant dense<0.000000e+00> : vector<8x32xf32>
    %494 = tpu.matmul %491, %493, %cst_368 {dimension_numbers = #tpu.dot_dimension_numbers<[1], [0], [0], [1], [0, 0, 1, 1], [], []>} : vector<8x64xbf16>, vector<64x32xbf16>, vector<8x32xf32> -> vector<8x32xf32>
    %c1_369 = arith.constant 1 : index
    %c0_370 = arith.constant 0 : index
    %c0_371 = arith.constant 0 : index
    %495 = vector.load %arg21[%c1_369, %c0_370, %c0_371] : memref<2x1x32xf32, #tpu.memory_space<vmem>>, vector<1x1x32xf32>
    %496 = vector.shape_cast %495 : vector<1x1x32xf32> to vector<1x32xf32>
    %497 = vector.broadcast %496 : vector<1x32xf32> to vector<8x32xf32>
    %498 = arith.addf %494, %497 : vector<8x32xf32>
    %499 = arith.addf %480, %498 : vector<8x32xf32>
    %c1_372 = arith.constant 1 : index
    %c0_373 = arith.constant 0 : index
    %c0_374 = arith.constant 0 : index
    %500 = vector.load %arg22[%c1_372, %c0_373, %c0_374] : memref<2x1x32xf32, #tpu.memory_space<vmem>>, vector<1x1x32xf32>
    %501 = vector.shape_cast %500 : vector<1x1x32xf32> to vector<1x32xf32>
    %c1_375 = arith.constant 1 : index
    %c0_376 = arith.constant 0 : index
    %c0_377 = arith.constant 0 : index
    %502 = vector.load %arg23[%c1_375, %c0_376, %c0_377] : memref<2x1x32xf32, #tpu.memory_space<vmem>>, vector<1x1x32xf32>
    %503 = vector.shape_cast %502 : vector<1x1x32xf32> to vector<1x32xf32>
    %cst_378 = arith.constant dense<0.000000e+00> : vector<8xf32>
    %504 = vector.multi_reduction <add>, %499, %cst_378 [1] : vector<8x32xf32> to vector<8xf32>
    %505 = vector.shape_cast %504 : vector<8xf32> to vector<8x1xf32>
    %cst_379 = arith.constant 3.200000e+01 : f32
    %506 = vector.broadcast %cst_379 : f32 to vector<8x1xf32>
    %507 = arith.divf %505, %506 : vector<8x1xf32>
    %508 = vector.broadcast %507 : vector<8x1xf32> to vector<8x32xf32>
    %509 = arith.subf %499, %508 : vector<8x32xf32>
    %510 = arith.mulf %509, %509 : vector<8x32xf32>
    %cst_380 = arith.constant dense<0.000000e+00> : vector<8xf32>
    %511 = vector.multi_reduction <add>, %510, %cst_380 [1] : vector<8x32xf32> to vector<8xf32>
    %512 = vector.shape_cast %511 : vector<8xf32> to vector<8x1xf32>
    %cst_381 = arith.constant 3.200000e+01 : f32
    %513 = vector.broadcast %cst_381 : f32 to vector<8x1xf32>
    %514 = arith.divf %512, %513 : vector<8x1xf32>
    %515 = vector.broadcast %507 : vector<8x1xf32> to vector<8x32xf32>
    %516 = arith.subf %499, %515 : vector<8x32xf32>
    %cst_382 = arith.constant 9.99999974E-6 : f32
    %517 = vector.broadcast %cst_382 : f32 to vector<8x1xf32>
    %518 = arith.addf %514, %517 : vector<8x1xf32>
    %519 = math.rsqrt %518 : vector<8x1xf32>
    %520 = vector.broadcast %519 : vector<8x1xf32> to vector<8x32xf32>
    %521 = arith.mulf %516, %520 : vector<8x32xf32>
    %522 = vector.broadcast %501 : vector<1x32xf32> to vector<8x32xf32>
    %523 = arith.mulf %521, %522 : vector<8x32xf32>
    %524 = vector.broadcast %503 : vector<1x32xf32> to vector<8x32xf32>
    %525 = arith.addf %523, %524 : vector<8x32xf32>
    %c0_383 = arith.constant 0 : index
    %c0_384 = arith.constant 0 : index
    %526 = vector.load %arg7[%c0_383, %c0_384] : memref<1x1xf32, #tpu.memory_space<vmem>>, vector<1x1xf32>
    %c0_385 = arith.constant 0 : index
    %c0_386 = arith.constant 0 : index
    %527 = vector.load %arg5[%c0_385, %c0_386] : memref<1x8xf32, #tpu.memory_space<vmem>>, vector<1x8xf32>
    %528 = vector.broadcast %526 : vector<1x1xf32> to vector<1x8xf32>
    %529 = arith.cmpf oeq, %528, %527 : vector<1x8xf32>
    %cst_387 = arith.constant 0.000000e+00 : f32
    %530 = vector.broadcast %cst_387 : f32 to vector<1x8xf32>
    %531 = arith.select %529, %3, %530 : vector<1x8xi1>, vector<1x8xf32>
    %cst_388 = arith.constant dense<0.000000e+00> : vector<1xf32>
    %532 = vector.multi_reduction <add>, %531, %cst_388 [1] : vector<1x8xf32> to vector<1xf32>
    %533 = vector.shape_cast %532 : vector<1xf32> to vector<1x1xf32>
    %cst_389 = arith.constant 9.99999971E-10 : f32
    %534 = vector.broadcast %cst_389 : f32 to vector<1x1xf32>
    %535 = arith.maximumf %533, %534 : vector<1x1xf32>
    %cst_390 = arith.constant dense<0.000000e+00> : vector<1x32xf32>
    %536 = tpu.matmul %531, %525, %cst_390 {dimension_numbers = #tpu.dot_dimension_numbers<[1], [0], [0], [1], [0, 0, 1, 1], [], []>} : vector<1x8xf32>, vector<8x32xf32>, vector<1x32xf32> -> vector<1x32xf32>
    %537 = vector.broadcast %535 : vector<1x1xf32> to vector<1x32xf32>
    %538 = arith.divf %536, %537 : vector<1x32xf32>
    %539 = arith.truncf %538 : vector<1x32xf32> to vector<1x32xbf16>
    %c0_391 = arith.constant 0 : index
    %c0_392 = arith.constant 0 : index
    %540 = vector.load %arg24[%c0_391, %c0_392] : memref<32x32xbf16, #tpu.memory_space<vmem>>, vector<32x32xbf16>
    %cst_393 = arith.constant dense<0.000000e+00> : vector<1x32xf32>
    %541 = tpu.matmul %539, %540, %cst_393 {dimension_numbers = #tpu.dot_dimension_numbers<[1], [0], [0], [1], [0, 0, 1, 1], [], []>} : vector<1x32xbf16>, vector<32x32xbf16>, vector<1x32xf32> -> vector<1x32xf32>
    %c0_394 = arith.constant 0 : index
    %c0_395 = arith.constant 0 : index
    %542 = vector.load %arg25[%c0_394, %c0_395] : memref<1x32xf32, #tpu.memory_space<vmem>>, vector<1x32xf32>
    %543 = arith.addf %541, %542 : vector<1x32xf32>
    %c0_396 = arith.constant 0 : index
    %c0_397 = arith.constant 0 : index
    %544 = vector.load %arg26[%c0_396, %c0_397] : memref<1x32xf32, #tpu.memory_space<vmem>>, vector<1x32xf32>
    %c0_398 = arith.constant 0 : index
    %c0_399 = arith.constant 0 : index
    %545 = vector.load %arg27[%c0_398, %c0_399] : memref<1x32xf32, #tpu.memory_space<vmem>>, vector<1x32xf32>
    %cst_400 = arith.constant dense<0.000000e+00> : vector<1xf32>
    %546 = vector.multi_reduction <add>, %543, %cst_400 [1] : vector<1x32xf32> to vector<1xf32>
    %547 = vector.shape_cast %546 : vector<1xf32> to vector<1x1xf32>
    %cst_401 = arith.constant 3.200000e+01 : f32
    %548 = vector.broadcast %cst_401 : f32 to vector<1x1xf32>
    %549 = arith.divf %547, %548 : vector<1x1xf32>
    %550 = vector.broadcast %549 : vector<1x1xf32> to vector<1x32xf32>
    %551 = arith.subf %543, %550 : vector<1x32xf32>
    %552 = arith.mulf %551, %551 : vector<1x32xf32>
    %cst_402 = arith.constant dense<0.000000e+00> : vector<1xf32>
    %553 = vector.multi_reduction <add>, %552, %cst_402 [1] : vector<1x32xf32> to vector<1xf32>
    %554 = vector.shape_cast %553 : vector<1xf32> to vector<1x1xf32>
    %cst_403 = arith.constant 3.200000e+01 : f32
    %555 = vector.broadcast %cst_403 : f32 to vector<1x1xf32>
    %556 = arith.divf %554, %555 : vector<1x1xf32>
    %557 = vector.broadcast %549 : vector<1x1xf32> to vector<1x32xf32>
    %558 = arith.subf %543, %557 : vector<1x32xf32>
    %cst_404 = arith.constant 9.99999974E-6 : f32
    %559 = vector.broadcast %cst_404 : f32 to vector<1x1xf32>
    %560 = arith.addf %556, %559 : vector<1x1xf32>
    %561 = math.rsqrt %560 : vector<1x1xf32>
    %562 = vector.broadcast %561 : vector<1x1xf32> to vector<1x32xf32>
    %563 = arith.mulf %558, %562 : vector<1x32xf32>
    %564 = arith.mulf %563, %544 : vector<1x32xf32>
    %565 = arith.addf %564, %545 : vector<1x32xf32>
    %cst_405 = arith.constant 0.000000e+00 : f32
    %566 = vector.broadcast %cst_405 : f32 to vector<1x32xf32>
    %567 = arith.cmpf ogt, %565, %566 : vector<1x32xf32>
    %cst_406 = arith.constant 0.00999999977 : f32
    %568 = vector.broadcast %cst_406 : f32 to vector<1x32xf32>
    %569 = arith.mulf %568, %565 : vector<1x32xf32>
    %570 = arith.select %567, %565, %569 : vector<1x32xi1>, vector<1x32xf32>
    %571 = arith.truncf %570 : vector<1x32xf32> to vector<1x32xbf16>
    %c0_407 = arith.constant 0 : index
    %c0_408 = arith.constant 0 : index
    %572 = vector.load %arg28[%c0_407, %c0_408] : memref<32x2xbf16, #tpu.memory_space<vmem>>, vector<32x2xbf16>
    %cst_409 = arith.constant dense<0.000000e+00> : vector<1x2xf32>
    %573 = tpu.matmul %571, %572, %cst_409 {dimension_numbers = #tpu.dot_dimension_numbers<[1], [0], [0], [1], [0, 0, 1, 1], [], []>} : vector<1x32xbf16>, vector<32x2xbf16>, vector<1x2xf32> -> vector<1x2xf32>
    %c0_410 = arith.constant 0 : index
    %c0_411 = arith.constant 0 : index
    %574 = vector.load %arg29[%c0_410, %c0_411] : memref<1x2xf32, #tpu.memory_space<vmem>>, vector<1x2xf32>
    %575 = arith.addf %573, %574 : vector<1x2xf32>
    %c0_412 = arith.constant 0 : index
    %c0_413 = arith.constant 0 : index
    %c0_414 = arith.constant 0 : index
    %576 = vector.load %arg30[%c0_412, %c0_413, %c0_414] : memref<1x1x2xf32, #tpu.memory_space<vmem>>, vector<1x1x2xf32>
    %577 = vector.shape_cast %576 : vector<1x1x2xf32> to vector<1x2xf32>
    %578 = vector.shape_cast %575 : vector<1x2xf32> to vector<1x1x2xf32>
    tpu.vector_store %arg30[%c0_412, %c0_413, %c0_414], %578 {strides = array<i32>} : memref<1x1x2xf32, #tpu.memory_space<vmem>>, vector<1x1x2xf32>,
    return
  }
  func.func @transform_0(%arg0: i32) -> (i32, i32, i32) {
    %c0_i32 = arith.constant 0 : i32
    %c0_i32_0 = arith.constant 0 : i32
    %c0_i32_1 = arith.constant 0 : i32
    return %arg0, %c0_i32, %c0_i32_0 : i32, i32, i32
  }
  func.func @transform_1(%arg0: i32) -> (i32, i32, i32) {
    %c0_i32 = arith.constant 0 : i32
    %c0_i32_0 = arith.constant 0 : i32
    %c0_i32_1 = arith.constant 0 : i32
    return %arg0, %c0_i32, %c0_i32_0 : i32, i32, i32
  }
  func.func @transform_2(%arg0: i32) -> (i32, i32) {
    %c0_i32 = arith.constant 0 : i32
    %c0_i32_0 = arith.constant 0 : i32
    %c0_i32_1 = arith.constant 0 : i32
    return %c0_i32, %c0_i32_0 : i32, i32
  }
  func.func @transform_3(%arg0: i32) -> (i32, i32) {
    %c0_i32 = arith.constant 0 : i32
    %c0_i32_0 = arith.constant 0 : i32
    %c0_i32_1 = arith.constant 0 : i32
    return %c0_i32, %c0_i32_0 : i32, i32
  }
  func.func @transform_4(%arg0: i32) -> (i32, i32) {
    %c0_i32 = arith.constant 0 : i32
    %c0_i32_0 = arith.constant 0 : i32
    %c0_i32_1 = arith.constant 0 : i32
    return %c0_i32, %c0_i32_0 : i32, i32
  }
  func.func @transform_5(%arg0: i32) -> (i32, i32) {
    %c0_i32 = arith.constant 0 : i32
    %c0_i32_0 = arith.constant 0 : i32
    %c0_i32_1 = arith.constant 0 : i32
    return %c0_i32, %c0_i32_0 : i32, i32
  }
  func.func @transform_6(%arg0: i32) -> (i32, i32) {
    %c0_i32 = arith.constant 0 : i32
    %c0_i32_0 = arith.constant 0 : i32
    %c0_i32_1 = arith.constant 0 : i32
    return %c0_i32, %c0_i32_0 : i32, i32
  }
  func.func @transform_7(%arg0: i32) -> (i32, i32, i32, i32) {
    %c0_i32 = arith.constant 0 : i32
    %c0_i32_0 = arith.constant 0 : i32
    %c0_i32_1 = arith.constant 0 : i32
    %c0_i32_2 = arith.constant 0 : i32
    %c0_i32_3 = arith.constant 0 : i32
    return %c0_i32, %c0_i32_0, %c0_i32_1, %c0_i32_2 : i32, i32, i32, i32
  }
  func.func @transform_8(%arg0: i32) -> (i32, i32, i32, i32) {
    %c0_i32 = arith.constant 0 : i32
    %c0_i32_0 = arith.constant 0 : i32
    %c0_i32_1 = arith.constant 0 : i32
    %c0_i32_2 = arith.constant 0 : i32
    %c0_i32_3 = arith.constant 0 : i32
    return %c0_i32, %c0_i32_0, %c0_i32_1, %c0_i32_2 : i32, i32, i32, i32
  }
  func.func @transform_9(%arg0: i32) -> (i32, i32, i32, i32) {
    %c0_i32 = arith.constant 0 : i32
    %c0_i32_0 = arith.constant 0 : i32
    %c0_i32_1 = arith.constant 0 : i32
    %c0_i32_2 = arith.constant 0 : i32
    %c0_i32_3 = arith.constant 0 : i32
    return %c0_i32, %c0_i32_0, %c0_i32_1, %c0_i32_2 : i32, i32, i32, i32
  }
  func.func @transform_10(%arg0: i32) -> (i32, i32, i32, i32) {
    %c0_i32 = arith.constant 0 : i32
    %c0_i32_0 = arith.constant 0 : i32
    %c0_i32_1 = arith.constant 0 : i32
    %c0_i32_2 = arith.constant 0 : i32
    %c0_i32_3 = arith.constant 0 : i32
    return %c0_i32, %c0_i32_0, %c0_i32_1, %c0_i32_2 : i32, i32, i32, i32
  }
  func.func @transform_11(%arg0: i32) -> (i32, i32, i32, i32) {
    %c0_i32 = arith.constant 0 : i32
    %c0_i32_0 = arith.constant 0 : i32
    %c0_i32_1 = arith.constant 0 : i32
    %c0_i32_2 = arith.constant 0 : i32
    %c0_i32_3 = arith.constant 0 : i32
    return %c0_i32, %c0_i32_0, %c0_i32_1, %c0_i32_2 : i32, i32, i32, i32
  }
  func.func @transform_12(%arg0: i32) -> (i32, i32, i32, i32) {
    %c0_i32 = arith.constant 0 : i32
    %c0_i32_0 = arith.constant 0 : i32
    %c0_i32_1 = arith.constant 0 : i32
    %c0_i32_2 = arith.constant 0 : i32
    %c0_i32_3 = arith.constant 0 : i32
    return %c0_i32, %c0_i32_0, %c0_i32_1, %c0_i32_2 : i32, i32, i32, i32
  }
  func.func @transform_13(%arg0: i32) -> (i32, i32, i32, i32) {
    %c0_i32 = arith.constant 0 : i32
    %c0_i32_0 = arith.constant 0 : i32
    %c0_i32_1 = arith.constant 0 : i32
    %c0_i32_2 = arith.constant 0 : i32
    %c0_i32_3 = arith.constant 0 : i32
    return %c0_i32, %c0_i32_0, %c0_i32_1, %c0_i32_2 : i32, i32, i32, i32
  }
  func.func @transform_14(%arg0: i32) -> (i32, i32, i32) {
    %c0_i32 = arith.constant 0 : i32
    %c0_i32_0 = arith.constant 0 : i32
    %c0_i32_1 = arith.constant 0 : i32
    %c0_i32_2 = arith.constant 0 : i32
    return %c0_i32, %c0_i32_0, %c0_i32_1 : i32, i32, i32
  }
  func.func @transform_15(%arg0: i32) -> (i32, i32, i32) {
    %c0_i32 = arith.constant 0 : i32
    %c0_i32_0 = arith.constant 0 : i32
    %c0_i32_1 = arith.constant 0 : i32
    %c0_i32_2 = arith.constant 0 : i32
    return %c0_i32, %c0_i32_0, %c0_i32_1 : i32, i32, i32
  }
  func.func @transform_16(%arg0: i32) -> (i32, i32, i32) {
    %c0_i32 = arith.constant 0 : i32
    %c0_i32_0 = arith.constant 0 : i32
    %c0_i32_1 = arith.constant 0 : i32
    %c0_i32_2 = arith.constant 0 : i32
    return %c0_i32, %c0_i32_0, %c0_i32_1 : i32, i32, i32
  }
  func.func @transform_17(%arg0: i32) -> (i32, i32, i32) {
    %c0_i32 = arith.constant 0 : i32
    %c0_i32_0 = arith.constant 0 : i32
    %c0_i32_1 = arith.constant 0 : i32
    %c0_i32_2 = arith.constant 0 : i32
    return %c0_i32, %c0_i32_0, %c0_i32_1 : i32, i32, i32
  }
  func.func @transform_18(%arg0: i32) -> (i32, i32, i32) {
    %c0_i32 = arith.constant 0 : i32
    %c0_i32_0 = arith.constant 0 : i32
    %c0_i32_1 = arith.constant 0 : i32
    %c0_i32_2 = arith.constant 0 : i32
    return %c0_i32, %c0_i32_0, %c0_i32_1 : i32, i32, i32
  }
  func.func @transform_19(%arg0: i32) -> (i32, i32, i32) {
    %c0_i32 = arith.constant 0 : i32
    %c0_i32_0 = arith.constant 0 : i32
    %c0_i32_1 = arith.constant 0 : i32
    %c0_i32_2 = arith.constant 0 : i32
    return %c0_i32, %c0_i32_0, %c0_i32_1 : i32, i32, i32
  }
  func.func @transform_20(%arg0: i32) -> (i32, i32, i32) {
    %c0_i32 = arith.constant 0 : i32
    %c0_i32_0 = arith.constant 0 : i32
    %c0_i32_1 = arith.constant 0 : i32
    %c0_i32_2 = arith.constant 0 : i32
    return %c0_i32, %c0_i32_0, %c0_i32_1 : i32, i32, i32
  }
  func.func @transform_21(%arg0: i32) -> (i32, i32, i32) {
    %c0_i32 = arith.constant 0 : i32
    %c0_i32_0 = arith.constant 0 : i32
    %c0_i32_1 = arith.constant 0 : i32
    %c0_i32_2 = arith.constant 0 : i32
    return %c0_i32, %c0_i32_0, %c0_i32_1 : i32, i32, i32
  }
  func.func @transform_22(%arg0: i32) -> (i32, i32, i32) {
    %c0_i32 = arith.constant 0 : i32
    %c0_i32_0 = arith.constant 0 : i32
    %c0_i32_1 = arith.constant 0 : i32
    %c0_i32_2 = arith.constant 0 : i32
    return %c0_i32, %c0_i32_0, %c0_i32_1 : i32, i32, i32
  }
  func.func @transform_23(%arg0: i32) -> (i32, i32) {
    %c0_i32 = arith.constant 0 : i32
    %c0_i32_0 = arith.constant 0 : i32
    %c0_i32_1 = arith.constant 0 : i32
    return %c0_i32, %c0_i32_0 : i32, i32
  }
  func.func @transform_24(%arg0: i32) -> (i32, i32) {
    %c0_i32 = arith.constant 0 : i32
    %c0_i32_0 = arith.constant 0 : i32
    %c0_i32_1 = arith.constant 0 : i32
    return %c0_i32, %c0_i32_0 : i32, i32
  }
  func.func @transform_25(%arg0: i32) -> (i32, i32) {
    %c0_i32 = arith.constant 0 : i32
    %c0_i32_0 = arith.constant 0 : i32
    %c0_i32_1 = arith.constant 0 : i32
    return %c0_i32, %c0_i32_0 : i32, i32
  }
  func.func @transform_26(%arg0: i32) -> (i32, i32) {
    %c0_i32 = arith.constant 0 : i32
    %c0_i32_0 = arith.constant 0 : i32
    %c0_i32_1 = arith.constant 0 : i32
    return %c0_i32, %c0_i32_0 : i32, i32
  }
  func.func @transform_27(%arg0: i32) -> (i32, i32) {
    %c0_i32 = arith.constant 0 : i32
    %c0_i32_0 = arith.constant 0 : i32
    %c0_i32_1 = arith.constant 0 : i32
    return %c0_i32, %c0_i32_0 : i32, i32
  }
  func.func @transform_28(%arg0: i32) -> (i32, i32) {
    %c0_i32 = arith.constant 0 : i32
    %c0_i32_0 = arith.constant 0 : i32
    %c0_i32_1 = arith.constant 0 : i32
    return %c0_i32, %c0_i32_0 : i32, i32
  }
  func.func @transform_29(%arg0: i32) -> (i32, i32, i32) {
    %c0_i32 = arith.constant 0 : i32
    %c0_i32_0 = arith.constant 0 : i32
    %c0_i32_1 = arith.constant 0 : i32
    return %arg0, %c0_i32, %c0_i32_0 : i32, i32, i32
  }
}

</mosaic_0001>

<bundles_post_ra>
// kernel: antibody_classifier_forward.1
= control target key start
LH: loop header
LB: loop body
LE: loop exit
PB: predicated region body
PF: predicated region fallthrough
CT: control target
= control target key end

     0   :  { %s5719_s6 = smov 1   ;;  %s5720_s10 = smov 2   ;;  %s6501_s0 = inlined_call_operand.smem [shape: u32[30], index: -1, kind: input, shape index: {}] }
   0x1   :  { %s5761_s5 = sld [smem:[%s6501_s0]]   ;;  %s5721_s14 = smov 3  }
   0x2   :  { %s5766_s9 = sld [smem:[%s6501_s0 + %s5719_s6]]   ;;  %s5722_s18 = smov 4  }
   0x3   :  { %s5771_s13 = sld [smem:[%s6501_s0 + %s5720_s10]]   ;;  %s5723_s22 = smov 5  }
   0x4   :  { %s5776_s17 = sld [smem:[%s6501_s0 + %s5721_s14]]   ;;  %s5724_s26 = smov 6  }
   0x5   :  { %s5781_s21 = sld [smem:[%s6501_s0 + %s5722_s18]]   ;;  %s5725_s30 = smov 7  }
   0x6   :  { %s5786_s25 = sld [smem:[%s6501_s0 + %s5723_s22]]   ;;  %s5726_s4 = smov 8  }
   0x7   :  { %6520 = sst [smem:[#allocation6_spill]] %s5761_s5  ;;  %s5727_s10 = smov 9  }
   0x8   :  { %6521 = sst [smem:[#allocation7_spill]] %s5766_s9  ;;  %s5728_s15 = smov 10  }
   0x9   :  { %6522 = sst [smem:[#allocation8_spill]] %s5771_s13  ;;  %s5729_s20 = smov 11  }
   0xa   :  { %6523 = sst [smem:[#allocation9_spill]] %s5776_s17  ;;  %s5731_s1 = smov 13  }
   0xb   :  { %s4591_s29 = sld [smem:[%s6501_s0 + %s5724_s26]]   ;;  %s5730_s26 = smov 12  }
   0xc   :  { %6524 = sst [smem:[#allocation10_spill]] %s5786_s25  ;;  %s5732_s7 = smov 14  }
   0xd   :  { %s5794_s3 = sld [smem:[%s6501_s0 + %s5725_s30]]   ;;  %s5735_s27 = smov 17  }
   0xe   :  { %s5799_s8 = sld [smem:[%s6501_s0 + %s5726_s4]]   ;;  %s5736_s4 = smov 18  }
   0xf   :  { %s5804_s14 = sld [smem:[%s6501_s0 + %s5727_s10]]  }
  0x10   :  { %s5809_s19 = sld [smem:[%s6501_s0 + %s5728_s15]]   ;;  %s5733_s15 = smov 15  }
  0x11   :  { %s5814_s24 = sld [smem:[%s6501_s0 + %s5729_s20]]   ;;  %v64_v0 = vstv %s4591_s29  ;;  %s5734_s29 = smov 16  }
  0x12   :  { %s5819_s30 = sld [smem:[%s6501_s0 + %s5730_s26]]   ;;  %65 = vst [vmem:[#allocation2] sm:$0x1] %v64_v0 }
  0x13   :  { %6525 = sst [smem:[#allocation11_spill]] %s5794_s3 }
  0x14   :  { %6526 = sst [smem:[#allocation12_spill]] %s5799_s8 }
  0x15   :  { %s5824_s6 = sld [smem:[%s6501_s0 + %s5731_s1]]  }
  0x16   :  { %s5829_s12 = sld [smem:[%s6501_s0 + %s5732_s7]]  }
  0x17   :  { %s5834_s20 = sld [smem:[%s6501_s0 + %s5733_s15]]   ;;  %s5737_s15 = smov 19  }
  0x18   :  { %s5839_s26 = sld [smem:[%s6501_s0 + %s5734_s29]]   ;;  %s5738_s29 = smov 20  }
  0x19   :  { %s5844_s2 = sld [smem:[%s6501_s0 + %s5735_s27]]   ;;  %s5739_s27 = smov 21  }
  0x1a   :  { %s5849_s11 = sld [smem:[%s6501_s0 + %s5736_s4]]   ;;  %s5740_s4 = smov 22  }
  0x1b   :  { %6527 = sst [smem:[#allocation13_spill]] %s5824_s6 }
  0x1c   :  { %6528 = sst [smem:[#allocation14_spill]] %s5829_s12 }
  0x1d   :  { %6529 = sst [smem:[#allocation15_spill]] %s5834_s20 }
  0x1e   :  { %6530 = sst [smem:[#allocation16_spill]] %s5839_s26 }
  0x1f   :  { %6531 = sst [smem:[#allocation17_spill]] %s5844_s2 }
  0x20   :  { %6532 = sst [smem:[#allocation18_spill]] %s5849_s11 }
  0x21   :  { %s5854_s20 = sld [smem:[%s6501_s0 + %s5737_s15]]   ;;  %s5741_s15 = smov 23  }
  0x22   :  { %s5859_s26 = sld [smem:[%s6501_s0 + %s5738_s29]]   ;;  %s5742_s29 = smov 24  }
  0x23   :  { %s5864_s2 = sld [smem:[%s6501_s0 + %s5739_s27]]   ;;  %s5743_s27 = smov 25  }
  0x24   :  { %s5869_s11 = sld [smem:[%s6501_s0 + %s5740_s4]]   ;;  %s5744_s4 = smov 26  }
  0x27   :  { %6533 = sst [smem:[#allocation19_spill]] %s5854_s20 }
  0x28   :  { %6534 = sst [smem:[#allocation20_spill]] %s5859_s26 }
  0x29   :  { %6535 = sst [smem:[#allocation21_spill]] %s5864_s2 }
  0x2a   :  { %6536 = sst [smem:[#allocation22_spill]] %s5869_s11 }
  0x2b   :  { %s5874_s20 = sld [smem:[%s6501_s0 + %s5741_s15]]   ;;  %s5745_s15 = smov 27  }
  0x2c   :  { %s5879_s26 = sld [smem:[%s6501_s0 + %s5742_s29]]   ;;  %s5746_s29 = smov 28  }
  0x2d   :  { %s5884_s2 = sld [smem:[%s6501_s0 + %s5743_s27]]   ;;  %s5747_s27 = smov 29  }
  0x2e   :  { %s5889_s11 = sld [smem:[%s6501_s0 + %s5744_s4]]  }
  0x31   :  { %6537 = sst [smem:[#allocation23_spill]] %s5874_s20 }
  0x32   :  { %6538 = sst [smem:[#allocation24_spill]] %s5879_s26 }
  0x33   :  { %6539 = sst [smem:[#allocation25_spill]] %s5884_s2 }
  0x34   :  { %6540 = sst [smem:[#allocation26_spill]] %s5889_s11 }
  0x35   :  { %s5894_s20 = sld [smem:[%s6501_s0 + %s5745_s15]]  }
  0x36   :  { %s5899_s26 = sld [smem:[%s6501_s0 + %s5746_s29]]  }
  0x37   :  { %s5904_s2 = sld [smem:[%s6501_s0 + %s5747_s27]]  }
  0x38   :  { %66 = vsyncpa [#allocation4], 0 }
  0x39   :  { %68 = vsyncpa [#allocation4 + $0x1], 0  ;;  %s5906_s4 = smov 0   ;;  %s5908_s7 = smov 0  }
  0x3a   :  { %s5910_s10 = smov 0   ;;  %s5912_s15 = smov 0  }
  0x3b LB: > { %s6541_s12 = sld [smem:[#allocation14_spill]]  ;;  %s6542_s8 = sld [smem:[#allocation12_spill]]  ;;  %s5705_s4 = sphi %s5906_s4, %s6564_s4   ;;  %s5717_s15 = sphi %s5912_s15, %s6567_s15   ;;  %s5713_s10 = sphi %s5910_s10, %s6566_s10   ;;  %s5709_s7 = sphi %s5908_s7, %s6565_s7  }
  0x3c   : > { %s6543_s6 = sld [smem:[#allocation13_spill]]  ;;  %s6544_s3 = sld [smem:[#allocation11_spill]] }
  0x3d   : > { %s6545_s13 = sld [smem:[#allocation8_spill]]  ;;  %s5927_s0 = sadd.s32 4294967295, %s5717_s15  }
  0x3e   : > { %s4616_s16 = sadd.s32 4294967294, %s5717_s15   ;;  %s5931_s18 = sadd.s32 1, %s5717_s15  }
  0x3f   : > { %s700_s29 = sadd.s32 1, %s5713_s10  ;;  %s697_s22 = ssub.s32 %s5717_s15, %s5931_s18 }
  0x40   : > { %p710_p0 = scmp.ne.s32.totalorder %s5713_s10, %s5709_s7  ;;  %p698_p1 = scmp.eq.s32.totalorder %s697_s22, 0 }
  0x41   : > { %p711_p2 = scmp.eq.s32.totalorder %s5927_s0, 1  ;;  %p716_p3 = scmp.ne.s32.totalorder %s5709_s7, %s5705_s4 }
  0x42   : > { %p717_p4 = scmp.eq.s32.totalorder %s4616_s16, 1  ;;  %p4619_p7 = scmp.ge.s32.totalorder %s5717_s15, 1 }
  0x43   : > { %s5942_s23 = scalar_select %p698_p1, %s5713_s10, %s700_s29  }
  0x44   : > { %p5944_p5 = por %p711_p2, %p710_p0  ;;  %p5948_p6 = por %p717_p4, %p716_p3 }
  0x45   : > { %p829_p8 = scmp.lt.s32.totalorder %s5717_s15, 3 }
  0x47   : > { %p830_p9 = pnand %p4619_p7, %p829_p8 }
  0x48   : > { %s6548_s5 = sld [smem:[#allocation6_spill]] (!%p830_p9)  ;;  %p906_p10 = scmp.lt.s32.totalorder (!%p830_p9), %s5927_s0, 1  ;;  %v5748_v1 = vmov (!%p830_p9), 0   ;;  %v5749_v2 = vmov (!%p830_p9), 0.0   ;;  %v5542_v3 = vld [vmem:[%s6545_s13] sm:$0xff] (!%p830_p9)   ;;  %vm942_vm0 = vcmask (!%p830_p9), 1043456   ;;  %v916_v9 = vlaneseq (!%p830_p9) }
  0x49   : > { %833 = sbr.rel (%p830_p9) target bundleno = 11328 (0x2c40), region = 136  ;;  %5540 = vset.pattern.permute.xlu0 (!%p830_p9), %v5748_v1  ;;  %s6549_s25 = sld [smem:[#allocation10_spill]] (!%p830_p9)  ;;  %5063 = vmatprep.subr.bf16.mxu0 (!%p830_p9), %v5749_v2  ;;  %v5543_v4 = vld [vmem:[%s6545_s13 + $0x8] ss:$0 sps:$4 sm:$0xff] (!%p830_p9)   ;;  %vm5750_vm1 = vmmov (!%p830_p9), 0   ;;  %v5544_v8 = vld [vmem:[%s6544_s3] sm:$0xff] (!%p830_p9)  }
  0x4a   : > { %5071 = vmatprep.subr.bf16.mxu1 (!%p830_p9), %v5749_v2  ;;  %5541 = vset.pattern.permute.xlu1 (!%p830_p9), %v5748_v1  ;;  %v944_v6 = vsel (!%p830_p9), %vm942_vm0, %v5543_v4, 0  ;;  %v917_v10 = vand.u32 (!%p830_p9), 127, %v916_v9  ;;  %s6550_s17 = sld [smem:[#allocation9_spill]] (!%p830_p9)  ;;  %vm938_vm3 = vcmask (!%p830_p9), 195584   ;;  %v5545_v13 = vld [vmem:[%s5804_s14] sm:$0xff] (!%p830_p9)   ;;  %v5546_v15 = vld [vmem:[%s6544_s3 + $0x8] sm:$0xff] (!%p830_p9)  }
  0x4b   : > { %5064 = vmatpush3.bf16.msra.mxu0 (!%p830_p9), %v5542_v3  ;;  %5067 = vmatprep.mubr.msk.bf16.mxu0 (!%p830_p9), %vm5750_vm1, %v5749_v2  ;;  %v5547_v16 = vld [vmem:[%s5804_s14 + $0x8] sm:$0xff] (!%p830_p9)   ;;  %vm1033_vm4 = vcmask (!%p830_p9), 261120   ;;  %v5548_v22 = vld [vmem:[%s5814_s24] sm:$0xff] (!%p830_p9)   ;;  %vm1206_vm5 = vcmask (!%p830_p9), 64512   ;;  %v5550_v45 = vld [vmem:[%s6544_s3 + $0x10] sm:$0xff] (!%p830_p9)   ;;  %s6551_s9 = sld [smem:[#allocation7_spill]] (!%p830_p9) }
  0x4c   : > { %5065 = vmatprep.subr.bf16.mxu0 (!%p830_p9), %v5749_v2  ;;  %5075 = vmatprep.mubr.msk.bf16.mxu1 (!%p830_p9), %vm5750_vm1, %v5749_v2  ;;  %v5549_v25 = vld [vmem:[%s5814_s24 + $0x8] sm:$0xff] (!%p830_p9)   ;;  %v4629_v26 = vld [vmem:[%s5809_s19] ss:$0 sm:$0xff] (!%p830_p9)  ;;  %v5551_v50 = vld [vmem:[%s6544_s3 + $0x18] sm:$0xff] (!%p830_p9)   ;;  %v6041_v54 = vshrl.u32 (!%p830_p9), %v916_v9, 7  ;;  %s6557_s13 = sld [smem:[#allocation20_spill]] (!%p830_p9) }
  0x4d   : > { %5072 = vmatpush3.bf16.msra.mxu1 (!%p830_p9), %v5544_v8  ;;  %v4625_v37 = vld [vmem:[%s6542_s8] ss:$0 sm:$0xff] (!%p830_p9)  ;;  %v5552_v51 = vld [vmem:[%s5814_s24 + $0x10] sm:$0xff] (!%p830_p9)   ;;  %v5553_v52 = vld [vmem:[%s5814_s24 + $0x18] sm:$0xff] (!%p830_p9)   ;;  %v5751_v60 = vmov (!%p830_p9), -9e+15  }
  0x4e   : > { %5073 = vmatprep.subr.bf16.mxu1 (!%p830_p9), %v5749_v2  ;;  %v4633_v39 = vld [vmem:[%s5819_s30] ss:$0 sm:$0xff] (!%p830_p9)  ;;  %v996_v55 = vsub.s32 (!%p830_p9), 0, %v6041_v54  ;;  %v4662_v9 = vld [vmem:[%s5819_s30 + $0x1] ss:$0 sm:$0xff] (!%p830_p9)  ;;  %vm2561_vm10 = vcmask (!%p830_p9), 523264  }
  0x4f   : > { %v986_v7 = vld [vmem:[%s6549_s25] sm:$0xff] (!%p830_p9)  ;;  %5066 = vmatpush3.bf16.msra.mxu0 (!%p830_p9), %v944_v6  ;;  %s6559_s25 = sld [smem:[#allocation22_spill]] (!%p830_p9)  ;;  %vm4285_vm12 = vcmask (!%p830_p9), 57344   ;;  %vm4428_vm13 = vcmask (!%p830_p9), 253952   ;;  %s6563_s11 = sld [smem:[#allocation26_spill]] (!%p830_p9)  ;;  %vm4508_vm15 = vcmask (!%p830_p9), 8192  }
  0x50   : > { %s5959_s1 = scalar_select %p906_p10, %s5927_s0, 1  ;;  %5079 = vmatprep.subr.bf16.mxu0 %v5749_v2  ;;  %v928_v17 = vld [vmem:[%s6550_s17] sm:$0xff] }
  0x51   : > { %5074 = vmatpush3.bf16.msra.mxu1 %v5546_v15  ;;  %v5654_v56 = vld [vmem:[%s5781_s21] ss:$0 sm:$0xff]  ;;  %s6558_s17 = sld [smem:[#allocation21_spill]] }
  0x52   : > { %s4620_s16 = sshll.u32 %s5959_s1, 3  ;;  %5087 = vmatprep.subr.bf16.mxu1 %v5749_v2  ;;  %s6037_s22 = scalar_lea.vmem %s6551_s9, %s5959_s1 }
  0x53   : > { %s909_s29 = scalar_lea.vmem %s6548_s5, %s4620_s16  ;;  %v915_v53 = vld [vmem:[%s6037_s22] sm:$0x1]  ;;  %s6552_s1 = sld [smem:[#allocation17_spill]] }
  0x54   : > { %v914_v5 = vld [vmem:[%s909_s29] sm:$0xff]  ;;  %vm1000_vm6 = vcmp.gt.f32.partialorder %v915_v53, 0.0  ;;  %s6553_s16 = sld [smem:[#allocation19_spill]]  ;;  %s6554_s29 = sld [smem:[#allocation15_spill]] }
  0x55   : > { %919 = vperm.xlu0 %5540, %v914_v5   ;;  %v1001_v57 = vsel %vm1000_vm6, 1, %v5748_v1  ;;  %s6555_s5 = sld [smem:[#allocation16_spill]]  ;;  %s6556_s9 = sld [smem:[#allocation18_spill]] }
  0x56   : > { %v1005_v58 = vrot.slane %v1001_v57, %v996_v55 }
  0x58   : > { %vm1006_vm7 = vcmp.eq.s32.totalorder %v1005_v58, 1 }
  0x59   : > { %990 = vperm.xlu0 %5540, %v986_v7  }
  0xd4   : > { %v920_v11 = vpop.permute.xlu0 %919 }
  0xd5   : > { %vm921_vm2 = vcmp.eq.s32.totalorder %v920_v11, %v917_v10 }
  0xd6   : > { %v4621_v12 = vsel %vm921_vm2, 1.0, %v5749_v2 }
  0xd7   : > { %v924_v14 = vpack.c.bf16 %v4621_v12, %v4621_v12 }
  0xd8   : > { %v991_v59 = vpop.permute.xlu0 %990 }
  0xd9   : > { %5068 = vmatmul.mubr.msk.bf16.vlgmr.msra.gmra.mrb[0].mxu0 %vm938_vm3, %v924_v14  ;;  %vm999_vm8 = vcmp.eq.f32.partialorder %v991_v59, %v5654_v56 }
  0xda   : > { %5080 = vmatpush3.bf16.msra.mxu0 %v5545_v13  ;;  %5083 = vmatprep.mubr.msk.bf16.mxu0 %vm5750_vm1, %v5749_v2  ;;  %vm1007_vm9 = vmand %vm999_vm8, %vm1006_vm7 }
  0xdb   : > { %5081 = vmatprep.subr.bf16.mxu0 %v5749_v2  ;;  %v6048_v61 = vsel %vm1007_vm9, 0.0, %v5751_v60  ;;  %v1312_v60 = vld [vmem:[%s6543_s6] sm:$0xf] }
  0xde   : > { %5082 = vmatpush3.bf16.msra.mxu0 %v5547_v16 }
  0xdf   : > { %5095 = vmatprep.subr.bf16.mxu0 %v5749_v2 }
 0x1ac   : > { %v980_v18 = vpop.f32.mrb[0].mxu0 }
 0x1ad   : > { %v5987_v19 = vadd.f32 %v980_v18, %v928_v17  ;;  %v5069_v20 = vpop.f32.mrb[1].mxu0 }
 0x1ae   : > { %v983_v21 = vpop.f32.mrb[2].mxu0 }
 0x1af   : > { %v5992_v23 = vpack.c.bf16 %v5987_v19, %v5987_v19  ;;  %v5070_v24 = vpop.f32.mrb[3].mxu0 }
 0x1b1   : > { %5076 = vmatmul.mubr.msk.bf16.vlgmr.msra.gmra.mrb[0].mxu1 %vm1033_vm4, %v5992_v23  ;;  %5084 = vmatmul.mubr.msk.bf16.vlgmr.msra.gmra.mrb[4].mxu0 %vm1033_vm4, %v5992_v23 }
 0x1b2   : > { %5088 = vmatpush3.bf16.msra.mxu1 %v5548_v22  ;;  %5091 = vmatprep.mubr.msk.bf16.mxu1 %vm5750_vm1, %v5749_v2 }
 0x1b3   : > { %5089 = vmatprep.subr.bf16.mxu1 %v5749_v2  ;;  %5097 = vmatprep.mubr.msk.bf16.mxu0 %vm5750_vm1, %v5749_v2 }
 0x1b6   : > { %5090 = vmatpush3.bf16.msra.mxu1 %v5549_v25 }
 0x1b7   : > { %5101 = vmatprep.subr.bf16.mxu1 %v5749_v2 }
 0x1b9   : > { %5092 = vmatmul.mubr.msk.bf16.vlgmr.msra.gmra.mrb[4].mxu1 %vm1033_vm4, %v5992_v23 }
 0x1ba   : > { %5103 = vmatprep.mubr.msk.bf16.mxu1 %vm5750_vm1, %v5749_v2 }
 0x284   : > { %v1071_v27 = vpop.f32.mrb[0].mxu1  ;;  %v1135_v28 = vpop.f32.mrb[4].mxu0 }
 0x285   : > { %v1136_v29 = vadd.f32 %v4629_v26, %v1135_v28  ;;  %v5077_v30 = vpop.f32.mrb[1].mxu1  ;;  %v5085_v31 = vpop.f32.mrb[5].mxu0  ;;  %v1072_v40 = vadd.f32 %v4625_v37, %v1071_v27  ;;  %v5554_v27 = vld [vmem:[%s5804_s14 + $0x10] sm:$0xff]  }
 0x286   : > { %v1074_v32 = vpop.f32.mrb[2].mxu1  ;;  %v1138_v33 = vpop.f32.mrb[6].mxu0 }
 0x287   : > { %v1141_v34 = vpack.c.bf16 %v1136_v29, %v1136_v29  ;;  %v5078_v35 = vpop.f32.mrb[3].mxu1  ;;  %v5086_v36 = vpop.f32.mrb[7].mxu0  ;;  %v1077_v46 = vpack.c.bf16 %v1072_v40, %v1072_v40  ;;  %v5555_v29 = vld [vmem:[%s5804_s14 + $0x18] sm:$0xff]  }
 0x289   : > { %v1211_v38 = vsel %vm1206_vm5, %v1141_v34, 0  ;;  %v4653_v34 = vld [vmem:[%s5809_s19 + $0x1] ss:$0 sm:$0xff] }
 0x28a   : > { %5096 = vmatpush3.bf16.xpose.msra.mxu0 %v1211_v38 }
 0x28b   : > { %5107 = vmatprep.subr.bf16.mxu0 %v5749_v2 }
 0x28c   : > { %v1199_v41 = vpop.f32.mrb[4].mxu1 }
 0x28d   : > { %v1200_v42 = vadd.f32 %v4633_v39, %v1199_v41  ;;  %v5093_v43 = vpop.f32.mrb[5].mxu1  ;;  %v4644_v41 = vld [vmem:[%s6542_s8 + $0x1] ss:$0 sm:$0xff] }
 0x28e   : > { %v1202_v44 = vpop.f32.mrb[6].mxu1 }
 0x28f   : > { %v1205_v47 = vpack.c.bf16 %v1200_v42, %v1200_v42  ;;  %v5094_v48 = vpop.f32.mrb[7].mxu1 }
 0x291   : > { %v1269_v49 = vsel %vm942_vm0, %v1205_v47, 0  ;;  %5098 = vmatmul.mubr.msk.bf16.vlgmr.msra.gmra.mrb[8].mxu0 %vm1206_vm5, %v1077_v46 }
 0x292   : > { %5102 = vmatpush3.bf16.msra.mxu1 %v1269_v49  ;;  %5108 = vmatpush3.bf16.msra.mxu0 %v5550_v45 }
 0x293   : > { %5109 = vmatprep.subr.bf16.mxu0 %v5749_v2  ;;  %5111 = vmatprep.mubr.msk.bf16.mxu0 %vm5750_vm1, %v5749_v2 }
 0x294   : > { %5115 = vmatprep.subr.bf16.mxu1 %v5749_v2 }
 0x296   : > { %5110 = vmatpush3.bf16.msra.mxu0 %v5551_v50 }
 0x297   : > { %5123 = vmatprep.subr.bf16.mxu0 %v5749_v2 }
 0x299   : > { %5112 = vmatmul.mubr.msk.bf16.vlgmr.msra.gmra.mrb[12].mxu0 %vm1033_vm4, %v5992_v23 }
 0x29a   : > { %5124 = vmatpush3.bf16.msra.mxu0 %v5552_v51  ;;  %5127 = vmatprep.mubr.msk.bf16.mxu0 %vm5750_vm1, %v5749_v2 }
 0x29b   : > { %5125 = vmatprep.subr.bf16.mxu0 %v5749_v2 }
 0x29e   : > { %5126 = vmatpush3.bf16.msra.mxu0 %v5553_v52 }
 0x29f   : > { %5137 = vmatprep.subr.bf16.mxu0 %v5749_v2 }
 0x2a1   : > { %5128 = vmatmul.mubr.msk.bf16.vlgmr.msra.gmra.mrb[16].mxu0 %vm1033_vm4, %v5992_v23 }
 0x2a2   : > { %5139 = vmatprep.mubr.msk.bf16.mxu0 %vm5750_vm1, %v5749_v2 }
 0x364   : > { %v1247_v62 = vpop.f32.mrb[8].mxu0 }
 0x365   : > { %v1248_v63 = vadd.f32 %v1247_v62, %v6048_v61  ;;  %v5099_v0 = vpop.f32.mrb[9].mxu0 }
 0x366   : > { %v1250_v3 = vpop.f32.mrb[10].mxu0  ;;  %v1668_v0 = vsel %vm942_vm0, %v1312_v60, 0 }
 0x367   : > { %v5100_v4 = vpop.f32.mrb[11].mxu0  ;;  %v1253_v5 = vsel %vm1206_vm5, %v1248_v63, -inf  ;;  %v5556_v3 = vld [vmem:[%s5804_s14 + $0x20] sm:$0xff]  }
 0x368   : > { %1254 = vmax.xlane.f32.xlu1 %v1253_v5  ;;  %v5557_v5 = vld [vmem:[%s5804_s14 + $0x28] sm:$0xff]  }
 0x36c   : > { %v1372_v1 = vpop.f32.mrb[12].mxu0 }
 0x36d   : > { %v5113_v6 = vpop.f32.mrb[13].mxu0  ;;  %v1373_v43 = vadd.f32 %v4644_v41, %v1372_v1  ;;  %v4668_v1 = vld [vmem:[%s6543_s6 + $0x4] sm:$0xf] }
 0x36e   : > { %v1375_v7 = vpop.f32.mrb[14].mxu0  ;;  %v1622_v6 = vsel %vm942_vm0, %v4668_v1, 0 }
 0x36f   : > { %v5114_v8 = vpop.f32.mrb[15].mxu0  ;;  %v1378_v44 = vpack.c.bf16 %v1373_v43, %v1373_v43 }
 0x370   : > { %v5558_v8 = vld [vmem:[%s6544_s3 + $0x20] sm:$0xff]  }
 0x374   : > { %v1504_v10 = vpop.f32.mrb[16].mxu0 }
 0x375   : > { %v1505_v11 = vadd.f32 %v4662_v9, %v1504_v10  ;;  %v5129_v12 = vpop.f32.mrb[17].mxu0 }
 0x376   : > { %v1507_v13 = vpop.f32.mrb[18].mxu0 }
 0x377   : > { %v1510_v14 = vpack.c.bf16 %v1505_v11, %v1505_v11  ;;  %v5130_v15 = vpop.f32.mrb[19].mxu0  ;;  %v5559_v13 = vld [vmem:[%s6544_s3 + $0x28] sm:$0xff]  }
 0x378   : > { %v5560_v15 = vld [vmem:[%s5814_s24 + $0x20] sm:$0xff]  }
 0x379   : > { %v1573_v16 = vsel %vm942_vm0, %v1510_v14, 0 }
 0x37a   : > { %5138 = vmatpush3.bf16.msra.mxu0 %v1573_v16 }
 0x37b   : > { %5149 = vmatprep.subr.bf16.mxu0 %v5749_v2 }
 0x3f5   : > { %v1255_v17 = vpop.xlane.xlu1 %1254 }
 0x3f6   : > { %v1256_v18 = vsub.f32 %v1248_v63, %v1255_v17 }
 0x3f8   : > { %v1257_v20 = vmul.f32 1.442695, %v1256_v18 }
 0x3fa   : > { %5608 = vpow2.f32 %v1257_v20  ;;  %v5561_v20 = vld [vmem:[%s5814_s24 + $0x28] sm:$0xff]  }
 0x404   : > { %v5609_v21 = vpop.eup %5608 }
 0x405   : > { %v1259_v22 = vsel %vm1206_vm5, %v5609_v21, 0.0 }
 0x406   : > { %1260 = vadd.xlane.f32.xlu1 %v1259_v22 }
 0x493   : > { %v1261_v24 = vpop.xlane.xlu1 %1260 }
 0x494   : > { %5610 = vrcp.f32 %v1261_v24 }
 0x49e   : > { %v5611_v25 = vpop.eup %5610 }
 0x49f   : > { %v1263_v26 = vmul.f32 %v5611_v25, %v5609_v21  ;;  %v4685_v21 = vld [vmem:[%s5809_s19 + $0x2] ss:$0 sm:$0xff] }
 0x4a1   : > { %v1264_v28 = vpack.c.bf16 %v1263_v26, %v1263_v26 }
 0x4a3   : > { %5104 = vmatmul.mubr.msk.bf16.vlgmr.msra.gmra.mrb[8].mxu1 %vm1206_vm5, %v1264_v28 }
 0x4a4   : > { %5116 = vmatpush3.bf16.msra.mxu1 %v5554_v27  ;;  %5119 = vmatprep.mubr.msk.bf16.mxu1 %vm5750_vm1, %v5749_v2 }
 0x4a5   : > { %5117 = vmatprep.subr.bf16.mxu1 %v5749_v2 }
 0x4a8   : > { %5118 = vmatpush3.bf16.msra.mxu1 %v5555_v29 }
 0x4a9   : > { %5131 = vmatprep.subr.bf16.mxu1 %v5749_v2 }
 0x4ab   : > { %5120 = vmatmul.mubr.msk.bf16.vlgmr.msra.gmra.mrb[12].mxu1 %vm1033_vm4, %v5992_v23 }
 0x4ac   : > { %5133 = vmatprep.mubr.msk.bf16.mxu1 %vm5750_vm1, %v5749_v2 }
 0x576   : > { %v1305_v30 = vpop.f32.mrb[8].mxu1 }
 0x577   : > { %v5105_v31 = vpop.f32.mrb[9].mxu1  ;;  %v1311_v4 = vpack.c.bf16 %v1305_v30, %v1305_v30 }
 0x578   : > { %v1308_v32 = vpop.f32.mrb[10].mxu1 }
 0x579   : > { %v5106_v33 = vpop.f32.mrb[11].mxu1 }
 0x57e   : > { %v1438_v35 = vpop.f32.mrb[12].mxu1 }
 0x57f   : > { %v1439_v36 = vadd.f32 %v4653_v34, %v1438_v35  ;;  %v5121_v37 = vpop.f32.mrb[13].mxu1  ;;  %v4676_v35 = vld [vmem:[%s6542_s8 + $0x2] ss:$0 sm:$0xff] }
 0x580   : > { %v1441_v38 = vpop.f32.mrb[14].mxu1 }
 0x581   : > { %v1444_v39 = vpack.c.bf16 %v1439_v36, %v1439_v36  ;;  %v5122_v40 = vpop.f32.mrb[15].mxu1 }
 0x583   : > { %v1515_v42 = vsel %vm1206_vm5, %v1444_v39, 0 }
 0x584   : > { %5132 = vmatpush3.bf16.xpose.msra.mxu1 %v1515_v42  ;;  %v4694_v42 = vld [vmem:[%s5819_s30 + $0x2] ss:$0 sm:$0xff] }
 0x585   : > { %5143 = vmatprep.subr.bf16.mxu1 %v5749_v2 }
 0x58b   : > { %5134 = vmatmul.mubr.msk.bf16.vlgmr.msra.gmra.mrb[16].mxu1 %vm1206_vm5, %v1378_v44 }
 0x58c   : > { %5145 = vmatprep.mubr.msk.bf16.mxu1 %vm5750_vm1, %v5749_v2  ;;  %5144 = vmatpush3.bf16.msra.mxu1 %v1622_v6  ;;  %v5563_v6 = vld [vmem:[%s6544_s3 + $0x38] sm:$0xff]  }
 0x58d   : > { %5155 = vmatprep.subr.bf16.mxu1 %v5749_v2 }
 0x65e   : > { %v1551_v45 = vpop.f32.mrb[16].mxu1 }
 0x65f   : > { %v1552_v46 = vadd.f32 %v1551_v45, %v6048_v61  ;;  %v5135_v47 = vpop.f32.mrb[17].mxu1 }
 0x660   : > { %v1554_v48 = vpop.f32.mrb[18].mxu1 }
 0x661   : > { %v5136_v49 = vpop.f32.mrb[19].mxu1  ;;  %v1557_v50 = vsel %vm1206_vm5, %v1552_v46, -inf }
 0x662   : > { %1558 = vmax.xlane.f32.xlu0 %v1557_v50 }
 0x6ef   : > { %v1559_v51 = vpop.xlane.xlu0 %1558 }
 0x6f0   : > { %v1560_v52 = vsub.f32 %v1552_v46, %v1559_v51 }
 0x6f2   : > { %v1561_v53 = vmul.f32 1.442695, %v1560_v52 }
 0x6f4   : > { %5612 = vpow2.f32 %v1561_v53 }
 0x6fe   : > { %v5613_v56 = vpop.eup %5612 }
 0x6ff   : > { %v1563_v57 = vsel %vm1206_vm5, %v5613_v56, 0.0 }
 0x700   : > { %1564 = vadd.xlane.f32.xlu1 %v1563_v57 }
 0x78d   : > { %v1565_v58 = vpop.xlane.xlu1 %1564 }
 0x78e   : > { %5614 = vrcp.f32 %v1565_v58 }
 0x798   : > { %v5615_v59 = vpop.eup %5614 }
 0x799   : > { %v1567_v62 = vmul.f32 %v5615_v59, %v5613_v56 }
 0x79b   : > { %v1568_v63 = vpack.c.bf16 %v1567_v62, %v1567_v62 }
 0x79d   : > { %5140 = vmatmul.mubr.msk.bf16.vlgmr.msra.gmra.mrb[20].mxu0 %vm1206_vm5, %v1568_v63 }
 0x79e   : > { %5150 = vmatpush3.bf16.msra.mxu0 %v1668_v0  ;;  %5151 = vmatprep.mubr.msk.bf16.mxu0 %vm5750_vm1, %v5749_v2 }
 0x79f   : > { %5163 = vmatprep.subr.bf16.mxu0 %v5749_v2 }
 0x7a5   : > { %5152 = vmatmul.mubr.msk.bf16.vlgmr.msra.gmra.mrb[24].mxu0 %vm1206_vm5, %v1311_v4 }
 0x7a6   : > { %5164 = vmatpush3.bf16.msra.mxu0 %v5556_v3  ;;  %5167 = vmatprep.mubr.msk.bf16.mxu0 %vm5750_vm1, %v5749_v2 }
 0x7a7   : > { %5165 = vmatprep.subr.bf16.mxu0 %v5749_v2 }
 0x7aa   : > { %5166 = vmatpush3.bf16.msra.mxu0 %v5557_v5  ;;  %v5562_v5 = vld [vmem:[%s6544_s3 + $0x30] sm:$0xff]  }
 0x7ab   : > { %5179 = vmatprep.subr.bf16.mxu0 %v5749_v2 }
 0x7ad   : > { %5168 = vmatmul.mubr.msk.bf16.vlgmr.msra.gmra.mrb[28].mxu0 %vm1033_vm4, %v5992_v23 }
 0x7ae   : > { %5181 = vmatprep.mubr.msk.bf16.mxu0 %vm5750_vm1, %v5749_v2 }
 0x870   : > { %v1609_v7 = vpop.f32.mrb[20].mxu0 }
 0x871   : > { %v1615_v9 = vpack.c.bf16 %v1609_v7, %v1609_v7  ;;  %v5141_v10 = vpop.f32.mrb[21].mxu0  ;;  %v5564_v7 = vld [vmem:[%s5814_s24 + $0x30] sm:$0xff]  }
 0x872   : > { %v1612_v11 = vpop.f32.mrb[22].mxu0 }
 0x873   : > { %v5142_v12 = vpop.f32.mrb[23].mxu0  ;;  %5146 = vmatmul.mubr.msk.bf16.vlgmr.msra.gmra.mrb[20].mxu1 %vm1206_vm5, %v1615_v9  ;;  %v4700_v9 = vld [vmem:[%s6543_s6 + $0x8] sm:$0xf] }
 0x874   : > { %5156 = vmatpush3.bf16.msra.mxu1 %v5558_v8  ;;  %5159 = vmatprep.mubr.msk.bf16.mxu1 %vm5750_vm1, %v5749_v2  ;;  %v5565_v8 = vld [vmem:[%s5814_s24 + $0x38] sm:$0xff]   ;;  %v2019_v10 = vsel %vm942_vm0, %v4700_v9, 0  ;;  %v5566_v12 = vld [vmem:[%s5804_s14 + $0x30] sm:$0xff]  }
 0x875   : > { %5157 = vmatprep.subr.bf16.mxu1 %v5749_v2 }
 0x878   : > { %v1704_v14 = vpop.f32.mrb[24].mxu0  ;;  %5158 = vmatpush3.bf16.msra.mxu1 %v5559_v13 }
 0x879   : > { %v5153_v16 = vpop.f32.mrb[25].mxu0  ;;  %5171 = vmatprep.subr.bf16.mxu1 %v5749_v2 }
 0x87a   : > { %v1707_v17 = vpop.f32.mrb[26].mxu0 }
 0x87b   : > { %v5154_v18 = vpop.f32.mrb[27].mxu0  ;;  %5160 = vmatmul.mubr.msk.bf16.vlgmr.msra.gmra.mrb[24].mxu1 %vm1033_vm4, %v5992_v23  ;;  %v5567_v17 = vld [vmem:[%s5804_s14 + $0x38] sm:$0xff]  }
 0x87c   : > { %5172 = vmatpush3.bf16.msra.mxu1 %v5560_v15  ;;  %5175 = vmatprep.mubr.msk.bf16.mxu1 %vm5750_vm1, %v5749_v2 }
 0x87d   : > { %5173 = vmatprep.subr.bf16.mxu1 %v5749_v2 }
 0x880   : > { %v1835_v22 = vpop.f32.mrb[28].mxu0  ;;  %5174 = vmatpush3.bf16.msra.mxu1 %v5561_v20 }
 0x881   : > { %v1836_v24 = vadd.f32 %v4685_v21, %v1835_v22  ;;  %v5169_v25 = vpop.f32.mrb[29].mxu0  ;;  %5185 = vmatprep.subr.bf16.mxu1 %v5749_v2 }
 0x882   : > { %v1838_v26 = vpop.f32.mrb[30].mxu0 }
 0x883   : > { %v1841_v27 = vpack.c.bf16 %v1836_v24, %v1836_v24  ;;  %v5170_v28 = vpop.f32.mrb[31].mxu0  ;;  %5176 = vmatmul.mubr.msk.bf16.vlgmr.msra.gmra.mrb[28].mxu1 %vm1033_vm4, %v5992_v23  ;;  %v4725_v24 = vld [vmem:[%s5819_s30 + $0x3] ss:$0 sm:$0xff] }
 0x884   : > { %5187 = vmatprep.mubr.msk.bf16.mxu1 %vm5750_vm1, %v5749_v2 }
 0x885   : > { %v1912_v29 = vsel %vm1206_vm5, %v1841_v27, 0 }
 0x886   : > { %5180 = vmatpush3.bf16.xpose.msra.mxu0 %v1912_v29 }
 0x887   : > { %5191 = vmatprep.subr.bf16.mxu0 %v5749_v2 }
 0x946   : > { %v1658_v30 = vpop.f32.mrb[20].mxu1 }
 0x947   : > { %v6119_v31 = vadd.f32 %v1704_v14, %v1658_v30  ;;  %v5147_v32 = vpop.f32.mrb[21].mxu1 }
 0x948   : > { %v1661_v33 = vpop.f32.mrb[22].mxu1 }
 0x949   : > { %v5148_v34 = vpop.f32.mrb[23].mxu1 }
 0x94e   : > { %v1769_v36 = vpop.f32.mrb[24].mxu1 }
 0x94f   : > { %v1770_v37 = vadd.f32 %v4676_v35, %v1769_v36  ;;  %v5161_v38 = vpop.f32.mrb[25].mxu1 }
 0x950   : > { %v1772_v39 = vpop.f32.mrb[26].mxu1 }
 0x951   : > { %v1775_v40 = vpack.c.bf16 %v1770_v37, %v1770_v37  ;;  %v5162_v41 = vpop.f32.mrb[27].mxu1  ;;  %v4716_v37 = vld [vmem:[%s5809_s19 + $0x3] ss:$0 sm:$0xff] }
 0x953   : > { %5182 = vmatmul.mubr.msk.bf16.vlgmr.msra.gmra.mrb[32].mxu0 %vm1206_vm5, %v1775_v40 }
 0x954   : > { %5193 = vmatprep.mubr.msk.bf16.mxu0 %vm5750_vm1, %v5749_v2  ;;  %5192 = vmatpush3.bf16.msra.mxu0 %v2019_v10 }
 0x955   : > { %5205 = vmatprep.subr.bf16.mxu0 %v5749_v2 }
 0x956   : > { %v1901_v43 = vpop.f32.mrb[28].mxu1 }
 0x957   : > { %v1902_v44 = vadd.f32 %v4694_v42, %v1901_v43  ;;  %v5177_v45 = vpop.f32.mrb[29].mxu1 }
 0x958   : > { %v1904_v46 = vpop.f32.mrb[30].mxu1 }
 0x959   : > { %v1907_v47 = vpack.c.bf16 %v1902_v44, %v1902_v44  ;;  %v5178_v48 = vpop.f32.mrb[31].mxu1  ;;  %v4707_v44 = vld [vmem:[%s6542_s8 + $0x3] ss:$0 sm:$0xff] }
 0x95b   : > { %v1970_v49 = vsel %vm942_vm0, %v1907_v47, 0 }
 0x95c   : > { %5186 = vmatpush3.bf16.msra.mxu1 %v1970_v49 }
 0x95d   : > { %5197 = vmatprep.subr.bf16.mxu1 %v5749_v2 }
 0xa26   : > { %v1948_v50 = vpop.f32.mrb[32].mxu0 }
 0xa27   : > { %v1949_v51 = vadd.f32 %v1948_v50, %v6048_v61  ;;  %v5183_v52 = vpop.f32.mrb[33].mxu0 }
 0xa28   : > { %v1951_v53 = vpop.f32.mrb[34].mxu0 }
 0xa29   : > { %v5184_v56 = vpop.f32.mrb[35].mxu0  ;;  %v1954_v57 = vsel %vm1206_vm5, %v1949_v51, -inf }
 0xa2a   : > { %1955 = vmax.xlane.f32.xlu1 %v1954_v57 }
 0xab7   : > { %v1956_v58 = vpop.xlane.xlu1 %1955 }
 0xab8   : > { %v1957_v59 = vsub.f32 %v1949_v51, %v1956_v58 }
 0xaba   : > { %v1958_v60 = vmul.f32 1.442695, %v1957_v59 }
 0xabc   : > { %5616 = vpow2.f32 %v1958_v60 }
 0xac6   : > { %v5617_v62 = vpop.eup %5616 }
 0xac7   : > { %v1960_v63 = vsel %vm1206_vm5, %v5617_v62, 0.0 }
 0xac8   : > { %1961 = vadd.xlane.f32.xlu1 %v1960_v63 }
 0xb55   : > { %v1962_v0 = vpop.xlane.xlu1 %1961 }
 0xb56   : > { %5618 = vrcp.f32 %v1962_v0 }
 0xb60   : > { %v5619_v3 = vpop.eup %5618 }
 0xb61   : > { %v1964_v4 = vmul.f32 %v5619_v3, %v5617_v62  ;;  %v4731_v3 = vld [vmem:[%s6543_s6 + $0xc] sm:$0xf] }
 0xb63   : > { %v1965_v1 = vpack.c.bf16 %v1964_v4, %v1964_v4  ;;  %v2371_v4 = vsel %vm942_vm0, %v4731_v3, 0  ;;  %v5576_v3 = vld [vmem:[%s6544_s3 + $0x48] sm:$0xff]  }
 0xb65   : > { %5188 = vmatmul.mubr.msk.bf16.vlgmr.msra.gmra.mrb[32].mxu1 %vm1206_vm5, %v1965_v1 }
 0xb66   : > { %5198 = vmatpush3.bf16.msra.mxu1 %v5562_v5  ;;  %5201 = vmatprep.mubr.msk.bf16.mxu1 %vm5750_vm1, %v5749_v2 }
 0xb67   : > { %5199 = vmatprep.subr.bf16.mxu1 %v5749_v2 }
 0xb6a   : > { %5200 = vmatpush3.bf16.msra.mxu1 %v5563_v6 }
 0xb6b   : > { %5213 = vmatprep.subr.bf16.mxu1 %v5749_v2 }
 0xb6d   : > { %5202 = vmatmul.mubr.msk.bf16.vlgmr.msra.gmra.mrb[36].mxu1 %vm1033_vm4, %v5992_v23 }
 0xb6e   : > { %5214 = vmatpush3.bf16.msra.mxu1 %v5564_v7  ;;  %5217 = vmatprep.mubr.msk.bf16.mxu1 %vm5750_vm1, %v5749_v2 }
 0xb6f   : > { %5215 = vmatprep.subr.bf16.mxu1 %v5749_v2 }
 0xb72   : > { %5216 = vmatpush3.bf16.msra.mxu1 %v5565_v8 }
 0xb73   : > { %5227 = vmatprep.subr.bf16.mxu1 %v5749_v2 }
 0xb75   : > { %5218 = vmatmul.mubr.msk.bf16.vlgmr.msra.gmra.mrb[40].mxu1 %vm1033_vm4, %v5992_v23 }
 0xb76   : > { %5229 = vmatprep.mubr.msk.bf16.mxu1 %vm5750_vm1, %v5749_v2 }
 0xc38   : > { %v2006_v11 = vpop.f32.mrb[32].mxu1 }
 0xc39   : > { %v2012_v13 = vpack.c.bf16 %v2006_v11, %v2006_v11  ;;  %v5189_v14 = vpop.f32.mrb[33].mxu1 }
 0xc3a   : > { %v2009_v15 = vpop.f32.mrb[34].mxu1 }
 0xc3b   : > { %v5190_v16 = vpop.f32.mrb[35].mxu1  ;;  %5194 = vmatmul.mubr.msk.bf16.vlgmr.msra.gmra.mrb[36].mxu0 %vm1206_vm5, %v2012_v13  ;;  %v4733_v13 = vld [vmem:[%s6541_s12] ss:$0 sm:$0xff] }
 0xc3c   : > { %5206 = vmatpush3.bf16.msra.mxu0 %v5566_v12  ;;  %5209 = vmatprep.mubr.msk.bf16.mxu0 %vm5750_vm1, %v5749_v2 }
 0xc3d   : > { %5207 = vmatprep.subr.bf16.mxu0 %v5749_v2 }
 0xc40   : > { %v2121_v18 = vpop.f32.mrb[36].mxu1  ;;  %5208 = vmatpush3.bf16.msra.mxu0 %v5567_v17 }
 0xc41   : > { %v5203_v20 = vpop.f32.mrb[37].mxu1  ;;  %5221 = vmatprep.subr.bf16.mxu0 %v5749_v2  ;;  %v2122_v46 = vadd.f32 %v4707_v44, %v2121_v18 }
 0xc42   : > { %v2124_v21 = vpop.f32.mrb[38].mxu1 }
 0xc43   : > { %v5204_v22 = vpop.f32.mrb[39].mxu1  ;;  %5210 = vmatmul.mubr.msk.bf16.vlgmr.msra.gmra.mrb[40].mxu0 %vm1033_vm4, %v5992_v23  ;;  %v2127_v47 = vpack.c.bf16 %v2122_v46, %v2122_v46 }
 0xc44   : > { %5223 = vmatprep.mubr.msk.bf16.mxu0 %vm5750_vm1, %v5749_v2 }
 0xc48   : > { %v2253_v25 = vpop.f32.mrb[40].mxu1 }
 0xc49   : > { %v2254_v26 = vadd.f32 %v4725_v24, %v2253_v25  ;;  %v5219_v27 = vpop.f32.mrb[41].mxu1  ;;  %v5568_v25 = vld [vmem:[%s6552_s1] sm:$0xff]  }
 0xc4a   : > { %v2256_v28 = vpop.f32.mrb[42].mxu1  ;;  %v5571_v27 = vld [vmem:[%s6553_s16 + $0x8] sm:$0xff]  }
 0xc4b   : > { %v2259_v29 = vpack.c.bf16 %v2254_v26, %v2254_v26  ;;  %v5220_v30 = vpop.f32.mrb[43].mxu1  ;;  %v5570_v26 = vld [vmem:[%s6553_s16] sm:$0xff]  }
 0xc4d   : > { %v2322_v32 = vsel %vm942_vm0, %v2259_v29, 0 }
 0xc4e   : > { %5228 = vmatpush3.bf16.msra.mxu1 %v2322_v32 }
 0xc4f   : > { %5239 = vmatprep.subr.bf16.mxu1 %v5749_v2 }
 0xd0e   : > { %v2055_v33 = vpop.f32.mrb[36].mxu0 }
 0xd0f   : > { %v2061_v23 = vadd.f32 %v2055_v33, %v6119_v31  ;;  %v5195_v34 = vpop.f32.mrb[37].mxu0  ;;  %v4734_v33 = vld [vmem:[%s6554_s29] ss:$0 sm:$0xff] }
 0xd10   : > { %v2058_v35 = vpop.f32.mrb[38].mxu0  ;;  %v4735_v34 = vld [vmem:[%s6555_s5] ss:$0 sm:$0xff] }
 0xd11   : > { %v5196_v36 = vpop.f32.mrb[39].mxu0 }
 0xd16   : > { %v2187_v38 = vpop.f32.mrb[40].mxu0 }
 0xd17   : > { %v2188_v39 = vadd.f32 %v4716_v37, %v2187_v38  ;;  %v5211_v40 = vpop.f32.mrb[41].mxu0  ;;  %v5572_v38 = vld [vmem:[%s6553_s16 + $0x10] sm:$0xff]  }
 0xd18   : > { %v2190_v41 = vpop.f32.mrb[42].mxu0  ;;  %v4736_v40 = vld [vmem:[%s6556_s9] ss:$0 sm:$0xff] }
 0xd19   : > { %v2193_v42 = vpack.c.bf16 %v2188_v39, %v2188_v39  ;;  %v5212_v43 = vpop.f32.mrb[43].mxu0  ;;  %v5573_v39 = vld [vmem:[%s6553_s16 + $0x18] sm:$0xff]  }
 0xd1b   : > { %v2264_v45 = vsel %vm1206_vm5, %v2193_v42, 0 }
 0xd1c   : > { %5222 = vmatpush3.bf16.xpose.msra.mxu0 %v2264_v45 }
 0xd1d   : > { %5233 = vmatprep.subr.bf16.mxu0 %v5749_v2 }
 0xd23   : > { %5224 = vmatmul.mubr.msk.bf16.vlgmr.msra.gmra.mrb[44].mxu0 %vm1206_vm5, %v2127_v47 }
 0xd24   : > { %5235 = vmatprep.mubr.msk.bf16.mxu0 %vm5750_vm1, %v5749_v2  ;;  %5234 = vmatpush3.bf16.msra.mxu0 %v2371_v4  ;;  %v5577_v4 = vld [vmem:[%s5814_s24 + $0x48] sm:$0xff]  }
 0xd25   : > { %5247 = vmatprep.subr.bf16.mxu0 %v5749_v2 }
 0xdf6   : > { %v2300_v31 = vpop.f32.mrb[44].mxu0 }
 0xdf7   : > { %v2301_v48 = vadd.f32 %v2300_v31, %v6048_v61  ;;  %v5225_v49 = vpop.f32.mrb[45].mxu0  ;;  %v4740_v31 = vld [vmem:[%s6557_s13] ss:$0 sm:$0xff] }
 0xdf8   : > { %v2303_v50 = vpop.f32.mrb[46].mxu0 }
 0xdf9   : > { %v5226_v51 = vpop.f32.mrb[47].mxu0  ;;  %v2306_v52 = vsel %vm1206_vm5, %v2301_v48, -inf }
 0xdfa   : > { %2307 = vmax.xlane.f32.xlu1 %v2306_v52 }
 0xe87   : > { %v2308_v53 = vpop.xlane.xlu1 %2307 }
 0xe88   : > { %v2309_v56 = vsub.f32 %v2301_v48, %v2308_v53 }
 0xe8a   : > { %v2310_v57 = vmul.f32 1.442695, %v2309_v56 }
 0xe8c   : > { %5620 = vpow2.f32 %v2310_v57 }
 0xe96   : > { %v5621_v58 = vpop.eup %5620 }
 0xe97   : > { %v2312_v59 = vsel %vm1206_vm5, %v5621_v58, 0.0 }
 0xe98   : > { %2313 = vadd.xlane.f32.xlu1 %v2312_v59 }
 0xf25   : > { %v2314_v60 = vpop.xlane.xlu1 %2313 }
 0xf26   : > { %5622 = vrcp.f32 %v2314_v60 }
 0xf30   : > { %v5623_v62 = vpop.eup %5622 }
 0xf31   : > { %v2316_v63 = vmul.f32 %v5623_v62, %v5621_v58 }
 0xf33   : > { %v2317_v0 = vpack.c.bf16 %v2316_v63, %v2316_v63  ;;  %v5574_v63 = vld [vmem:[%s6544_s3 + $0x40] sm:$0xff]  }
 0xf35   : > { %5230 = vmatmul.mubr.msk.bf16.vlgmr.msra.gmra.mrb[44].mxu1 %vm1206_vm5, %v2317_v0  ;;  %v5575_v0 = vld [vmem:[%s5814_s24 + $0x40] sm:$0xff]  }
 0xf36   : > { %5243 = vmatprep.mubr.msk.bf16.mxu1 %vm5750_vm1, %v5749_v2  ;;  %5240 = vmatpush3.bf16.msra.mxu1 %v5568_v25 }
 0xf37   : > { %5241 = vmatprep.subr.bf16.mxu1 %v5749_v2 }
0x1008   : > { %v2358_v5 = vpop.f32.mrb[44].mxu1 }
0x1009   : > { %v2364_v1 = vpack.c.bf16 %v2358_v5, %v2358_v5  ;;  %v5231_v6 = vpop.f32.mrb[45].mxu1 }
0x100a   : > { %v2361_v7 = vpop.f32.mrb[46].mxu1 }
0x100b   : > { %v5232_v8 = vpop.f32.mrb[47].mxu1  ;;  %5236 = vmatmul.mubr.msk.bf16.vlgmr.msra.gmra.mrb[48].mxu0 %vm1206_vm5, %v2364_v1 }
0x100c   : > { %5255 = vmatprep.mubr.msk.bf16.mxu0 %vm5750_vm1, %v5749_v2  ;;  %5248 = vmatpush3.bf16.msra.mxu0 %v5570_v26  ;;  %v4746_v8 = vld [vmem:[%s6558_s17] ss:$0 sm:$0xff] }
0x100d   : > { %5249 = vmatprep.subr.bf16.mxu0 %v5749_v2 }
0x1010   : > { %5250 = vmatpush3.bf16.msra.mxu0 %v5571_v27 }
0x1011   : > { %5251 = vmatprep.subr.bf16.mxu0 %v5749_v2 }
0x1014   : > { %5252 = vmatpush3.bf16.msra.mxu0 %v5572_v38 }
0x1015   : > { %5253 = vmatprep.subr.bf16.mxu0 %v5749_v2 }
0x1018   : > { %5254 = vmatpush3.bf16.msra.mxu0 %v5573_v39  ;;  %v5580_v39 = vld [vmem:[%s6544_s3 + $0x50] sm:$0xff]  }
0x1019   : > { %5275 = vmatprep.subr.bf16.mxu0 %v5749_v2 }
0x10de   : > { %v2407_v9 = vpop.f32.mrb[48].mxu0 }
0x10df   : > { %v2413_v10 = vadd.f32 %v2407_v9, %v2061_v23  ;;  %v5237_v11 = vpop.f32.mrb[49].mxu0 }
0x10e0   : > { %v2410_v12 = vpop.f32.mrb[50].mxu0 }
0x10e1   : > { %v2414_v14 = vadd.f32 %v2413_v10, %v5987_v19  ;;  %v5238_v15 = vpop.f32.mrb[51].mxu0  ;;  %v5569_v19 = vld [vmem:[%s6552_s1 + $0x8] sm:$0xff]   ;;  %v4747_v10 = vld [vmem:[%s6559_s25] ss:$0 sm:$0xff] }
0x10e2   : > { %5242 = vmatpush3.bf16.msra.mxu1 %v5569_v19  ;;  %v5579_v15 = vld [vmem:[%s5804_s14 + $0x48] sm:$0xff]  }
0x10e3   : > { %v2422_v16 = vadd.f32 %v4733_v13, %v2414_v14  ;;  %5259 = vmatprep.subr.bf16.mxu1 %v5749_v2  ;;  %v5578_v13 = vld [vmem:[%s5804_s14 + $0x40] sm:$0xff]  }
0x10e5   : > { %v2425_v17 = vsel %vm1033_vm4, %v2422_v16, 0.0 }
0x10e6   : > { %2426 = vadd.xlane.f32.xlu1 %v2425_v17 }
0x1173   : > { %v2427_v18 = vpop.xlane.xlu1 %2426 }
0x1174   : > { %v2429_v20 = vmul.f32 0.03125, %v2427_v18 }
0x1176   : > { %v2430_v21 = vsub.f32 %v2422_v16, %v2429_v20  ;;  %v4771_v16 = vld [vmem:[%s5819_s30 + $0x4] ss:$0 sm:$0xff] }
0x1178   : > { %v2431_v22 = vmul.f32 %v2430_v21, %v2430_v21 }
0x117a   : > { %v2432_v24 = vsel %vm1033_vm4, %v2431_v22, 0.0 }
0x117b   : > { %2433 = vadd.xlane.f32.xlu1 %v2432_v24 }
0x1208   : > { %v2434_v28 = vpop.xlane.xlu1 %2433 }
0x1209   : > { %v2435_v29 = vmul.f32 0.03125, %v2434_v28 }
0x120b   : > { %v2436_v30 = vadd.f32 1e-05, %v2435_v29  ;;  %v4762_v29 = vld [vmem:[%s5809_s19 + $0x4] ss:$0 sm:$0xff] }
0x120d   : > { %5624 = vrsqrt.f32 %v2436_v30 }
0x1217   : > { %v5625_v32 = vpop.eup %5624 }
0x1218   : > { %v2438_v23 = vmul.f32 %v5625_v32, %v2430_v21 }
0x121a   : > { %v2445_v35 = vmul.f32 %v4734_v33, %v2438_v23 }
0x121c   : > { %v2452_v36 = vadd.f32 %v4735_v34, %v2445_v35 }
0x121e   : > { %v2453_v37 = vpack.c.bf16 %v2452_v36, %v2452_v36 }
0x1220   : > { %5244 = vmatmul.mubr.msk.bf16.vlgmr.msra.gmra.mrb[48].mxu1 %vm1033_vm4, %v2453_v37 }
0x1221   : > { %5263 = vmatprep.mubr.msk.bf16.mxu1 %vm5750_vm1, %v5749_v2  ;;  %5260 = vmatpush3.bf16.msra.mxu1 %v5574_v63 }
0x1222   : > { %5261 = vmatprep.subr.bf16.mxu1 %v5749_v2 }
0x1225   : > { %5262 = vmatpush3.bf16.msra.mxu1 %v5576_v3 }
0x1226   : > { %5267 = vmatprep.subr.bf16.mxu1 %v5749_v2 }
0x12f3   : > { %v2514_v41 = vpop.f32.mrb[48].mxu1 }
0x12f4   : > { %v2515_v42 = vadd.f32 %v4736_v40, %v2514_v41  ;;  %v5245_v43 = vpop.f32.mrb[49].mxu1  ;;  %v5581_v41 = vld [vmem:[%s6544_s3 + $0x58] sm:$0xff]  }
0x12f5   : > { %v2517_v44 = vpop.f32.mrb[50].mxu1  ;;  %v5583_v43 = vld [vmem:[%s5814_s24 + $0x58] sm:$0xff]  }
0x12f6   : > { %v2520_v45 = vmax.f32 %v2515_v42, 0.0  ;;  %v5246_v46 = vpop.f32.mrb[51].mxu1  ;;  %v5582_v42 = vld [vmem:[%s5814_s24 + $0x50] sm:$0xff]  }
0x12f8   : > { %v2521_v47 = vpack.c.bf16 %v2520_v45, %v2520_v45 }
0x12fa   : > { %5256 = vmatmul.mubr.msk.bf16.vlgmr.msra.gmra.mrb[52].mxu0 %vm2561_vm10, %v2521_v47 }
0x12fb   : > { %5279 = vmatprep.mubr.msk.bf16.mxu0 %vm5750_vm1, %v5749_v2  ;;  %5276 = vmatpush3.bf16.msra.mxu0 %v5575_v0 }
0x12fc   : > { %5277 = vmatprep.subr.bf16.mxu0 %v5749_v2 }
0x12ff   : > { %5278 = vmatpush3.bf16.msra.mxu0 %v5577_v4 }
0x1300   : > { %5289 = vmatprep.subr.bf16.mxu0 %v5749_v2 }
0x13cd   : > { %v2599_v48 = vpop.f32.mrb[52].mxu0 }
0x13ce   : > { %v2600_v49 = vadd.f32 %v4740_v31, %v2599_v48  ;;  %v5257_v50 = vpop.f32.mrb[53].mxu0 }
0x13cf   : > { %v2602_v51 = vpop.f32.mrb[54].mxu0 }
0x13d0   : > { %v5258_v52 = vpop.f32.mrb[55].mxu0  ;;  %v2605_v53 = vadd.f32 %v2600_v49, %v2452_v36  ;;  %v4753_v36 = vld [vmem:[%s6542_s8 + $0x4] ss:$0 sm:$0xff] }
0x13d2   : > { %v2608_v56 = vsel %vm1033_vm4, %v2605_v53, 0.0 }
0x13d3   : > { %2609 = vadd.xlane.f32.xlu1 %v2608_v56 }
0x1460   : > { %v2610_v57 = vpop.xlane.xlu1 %2609 }
0x1461   : > { %v2611_v58 = vmul.f32 0.03125, %v2610_v57 }
0x1463   : > { %v2612_v59 = vsub.f32 %v2605_v53, %v2611_v58  ;;  %v4801_v53 = vld [vmem:[%s5819_s30 + $0x5] ss:$0 sm:$0xff] }
0x1465   : > { %v2613_v60 = vmul.f32 %v2612_v59, %v2612_v59 }
0x1467   : > { %v2614_v62 = vsel %vm1033_vm4, %v2613_v60, 0.0 }
0x1468   : > { %2615 = vadd.xlane.f32.xlu0 %v2614_v62 }
0x14f5   : > { %v2616_v5 = vpop.xlane.xlu0 %2615 }
0x14f6   : > { %v2617_v1 = vmul.f32 0.03125, %v2616_v5 }
0x14f8   : > { %v2618_v6 = vadd.f32 1e-05, %v2617_v1 }
0x14fa   : > { %5626 = vrsqrt.f32 %v2618_v6 }
0x1504   : > { %v5627_v7 = vpop.eup %5626 }
0x1505   : > { %v2620_v9 = vmul.f32 %v5627_v7, %v2612_v59 }
0x1507   : > { %v2627_v11 = vmul.f32 %v4746_v8, %v2620_v9  ;;  %v5584_v9 = vld [vmem:[%s5804_s14 + $0x50] sm:$0xff]  }
0x1509   : > { %v6225_v12 = vadd.f32 %v4747_v10, %v2627_v11  ;;  %v5585_v11 = vld [vmem:[%s5804_s14 + $0x58] sm:$0xff]  }
0x150b   : > { %v6230_v14 = vpack.c.bf16 %v6225_v12, %v6225_v12 }
0x150d   : > { %5264 = vmatmul.mubr.msk.bf16.vlgmr.msra.gmra.mrb[52].mxu1 %vm1033_vm4, %v6230_v14  ;;  %5280 = vmatmul.mubr.msk.bf16.vlgmr.msra.gmra.mrb[56].mxu0 %vm1033_vm4, %v6230_v14 }
0x150e   : > { %5268 = vmatpush3.bf16.msra.mxu1 %v5578_v13  ;;  %5271 = vmatprep.mubr.msk.bf16.mxu1 %vm5750_vm1, %v5749_v2 }
0x150f   : > { %5269 = vmatprep.subr.bf16.mxu1 %v5749_v2  ;;  %5291 = vmatprep.mubr.msk.bf16.mxu0 %vm5750_vm1, %v5749_v2 }
0x1512   : > { %5270 = vmatpush3.bf16.msra.mxu1 %v5579_v15 }
0x1513   : > { %5283 = vmatprep.subr.bf16.mxu1 %v5749_v2 }
0x1515   : > { %5272 = vmatmul.mubr.msk.bf16.vlgmr.msra.gmra.mrb[56].mxu1 %vm1033_vm4, %v6230_v14 }
0x1516   : > { %5285 = vmatprep.mubr.msk.bf16.mxu1 %vm5750_vm1, %v5749_v2 }
0x15e0   : > { %v2698_v17 = vpop.f32.mrb[52].mxu1  ;;  %v2830_v18 = vpop.f32.mrb[56].mxu0 }
0x15e1   : > { %v2831_v20 = vadd.f32 %v4771_v16, %v2830_v18  ;;  %v5265_v21 = vpop.f32.mrb[53].mxu1  ;;  %v5281_v22 = vpop.f32.mrb[57].mxu0  ;;  %v2699_v38 = vadd.f32 %v4753_v36, %v2698_v17  ;;  %v4792_v18 = vld [vmem:[%s5809_s19 + $0x5] ss:$0 sm:$0xff] }
0x15e2   : > { %v2701_v24 = vpop.f32.mrb[54].mxu1  ;;  %v2833_v25 = vpop.f32.mrb[58].mxu0 }
0x15e3   : > { %v2836_v19 = vpack.c.bf16 %v2831_v20, %v2831_v20  ;;  %v5266_v26 = vpop.f32.mrb[55].mxu1  ;;  %v5282_v27 = vpop.f32.mrb[59].mxu0  ;;  %v2704_v40 = vpack.c.bf16 %v2699_v38, %v2699_v38 }
0x15e4   : > { %v4783_v26 = vld [vmem:[%s6542_s8 + $0x5] ss:$0 sm:$0xff] }
0x15e5   : > { %v2899_v28 = vsel %vm942_vm0, %v2836_v19, 0 }
0x15e6   : > { %5290 = vmatpush3.bf16.msra.mxu0 %v2899_v28 }
0x15e7   : > { %5303 = vmatprep.subr.bf16.mxu0 %v5749_v2 }
0x15e8   : > { %v2764_v30 = vpop.f32.mrb[56].mxu1 }
0x15e9   : > { %v2765_v32 = vadd.f32 %v4762_v29, %v2764_v30  ;;  %v5273_v33 = vpop.f32.mrb[57].mxu1 }
0x15ea   : > { %v2767_v23 = vpop.f32.mrb[58].mxu1 }
0x15eb   : > { %v2770_v34 = vpack.c.bf16 %v2765_v32, %v2765_v32  ;;  %v5274_v35 = vpop.f32.mrb[59].mxu1 }
0x15ed   : > { %v2841_v37 = vsel %vm1206_vm5, %v2770_v34, 0 }
0x15ee   : > { %5284 = vmatpush3.bf16.xpose.msra.mxu1 %v2841_v37 }
0x15ef   : > { %5295 = vmatprep.subr.bf16.mxu1 %v5749_v2 }
0x15f5   : > { %5286 = vmatmul.mubr.msk.bf16.vlgmr.msra.gmra.mrb[60].mxu1 %vm1206_vm5, %v2704_v40 }
0x15f6   : > { %5296 = vmatpush3.bf16.msra.mxu1 %v5580_v39  ;;  %5299 = vmatprep.mubr.msk.bf16.mxu1 %vm5750_vm1, %v5749_v2 }
0x15f7   : > { %5297 = vmatprep.subr.bf16.mxu1 %v5749_v2 }
0x15fa   : > { %5298 = vmatpush3.bf16.msra.mxu1 %v5581_v41 }
0x15fb   : > { %5311 = vmatprep.subr.bf16.mxu1 %v5749_v2 }
0x15fd   : > { %5300 = vmatmul.mubr.msk.bf16.vlgmr.msra.gmra.mrb[64].mxu1 %vm1033_vm4, %v6230_v14 }
0x15fe   : > { %5312 = vmatpush3.bf16.msra.mxu1 %v5582_v42  ;;  %5315 = vmatprep.mubr.msk.bf16.mxu1 %vm5750_vm1, %v5749_v2 }
0x15ff   : > { %5313 = vmatprep.subr.bf16.mxu1 %v5749_v2 }
0x1602   : > { %5314 = vmatpush3.bf16.msra.mxu1 %v5583_v43  ;;  %v4777_v43 = vld [vmem:[%s6543_s6 + $0x10] sm:$0xf] }
0x1603   : > { %5325 = vmatprep.subr.bf16.mxu1 %v5749_v2 }
0x1605   : > { %5316 = vmatmul.mubr.msk.bf16.vlgmr.msra.gmra.mrb[68].mxu1 %vm1033_vm4, %v6230_v14 }
0x1606   : > { %5327 = vmatprep.mubr.msk.bf16.mxu1 %vm5750_vm1, %v5749_v2 }
0x16c8   : > { %v2877_v44 = vpop.f32.mrb[60].mxu1 }
0x16c9   : > { %v2878_v45 = vadd.f32 %v2877_v44, %v6048_v61  ;;  %v5287_v46 = vpop.f32.mrb[61].mxu1 }
0x16ca   : > { %v2880_v47 = vpop.f32.mrb[62].mxu1  ;;  %v3299_v46 = vsel %vm942_vm0, %v4777_v43, 0 }
0x16cb   : > { %v5288_v31 = vpop.f32.mrb[63].mxu1  ;;  %v2883_v48 = vsel %vm1206_vm5, %v2878_v45, -inf  ;;  %v5586_v47 = vld [vmem:[%s5804_s14 + $0x60] sm:$0xff]  }
0x16cc   : > { %2884 = vmax.xlane.f32.xlu1 %v2883_v48  ;;  %v5587_v48 = vld [vmem:[%s5804_s14 + $0x68] sm:$0xff]  }
0x16d0   : > { %v3003_v49 = vpop.f32.mrb[64].mxu1 }
0x16d1   : > { %v5301_v50 = vpop.f32.mrb[65].mxu1  ;;  %v3004_v28 = vadd.f32 %v4783_v26, %v3003_v49  ;;  %v4807_v49 = vld [vmem:[%s6543_s6 + $0x14] sm:$0xf] }
0x16d2   : > { %v3006_v51 = vpop.f32.mrb[66].mxu1  ;;  %v3253_v50 = vsel %vm942_vm0, %v4807_v49, 0 }
0x16d3   : > { %v5302_v52 = vpop.f32.mrb[67].mxu1  ;;  %v3009_v29 = vpack.c.bf16 %v3004_v28, %v3004_v28 }
0x16d4   : > { %v5588_v52 = vld [vmem:[%s6544_s3 + $0x60] sm:$0xff]  }
0x16d8   : > { %v3135_v56 = vpop.f32.mrb[68].mxu1 }
0x16d9   : > { %v3136_v57 = vadd.f32 %v4801_v53, %v3135_v56  ;;  %v5317_v58 = vpop.f32.mrb[69].mxu1 }
0x16da   : > { %v3138_v59 = vpop.f32.mrb[70].mxu1 }
0x16db   : > { %v3141_v60 = vpack.c.bf16 %v3136_v57, %v3136_v57  ;;  %v5318_v62 = vpop.f32.mrb[71].mxu1  ;;  %v5589_v59 = vld [vmem:[%s6544_s3 + $0x68] sm:$0xff]  }
0x16dc   : > { %v5590_v62 = vld [vmem:[%s5814_s24 + $0x60] sm:$0xff]  }
0x16dd   : > { %v3204_v63 = vsel %vm942_vm0, %v3141_v60, 0 }
0x16de   : > { %5326 = vmatpush3.bf16.msra.mxu1 %v3204_v63 }
0x16df   : > { %5337 = vmatprep.subr.bf16.mxu1 %v5749_v2 }
0x1759   : > { %v2885_v0 = vpop.xlane.xlu1 %2884 }
0x175a   : > { %v2886_v3 = vsub.f32 %v2878_v45, %v2885_v0 }
0x175c   : > { %v2887_v4 = vmul.f32 1.442695, %v2886_v3 }
0x175e   : > { %5628 = vpow2.f32 %v2887_v4  ;;  %v5591_v4 = vld [vmem:[%s5814_s24 + $0x68] sm:$0xff]  }
0x1768   : > { %v5629_v5 = vpop.eup %5628 }
0x1769   : > { %v2889_v1 = vsel %vm1206_vm5, %v5629_v5, 0.0 }
0x176a   : > { %2890 = vadd.xlane.f32.xlu0 %v2889_v1 }
0x17f7   : > { %v2891_v6 = vpop.xlane.xlu0 %2890 }
0x17f8   : > { %5630 = vrcp.f32 %v2891_v6 }
0x1802   : > { %v5631_v7 = vpop.eup %5630 }
0x1803   : > { %v2893_v8 = vmul.f32 %v5631_v7, %v5629_v5  ;;  %v4824_v5 = vld [vmem:[%s5809_s19 + $0x6] ss:$0 sm:$0xff] }
0x1805   : > { %v2894_v10 = vpack.c.bf16 %v2893_v8, %v2893_v8 }
0x1807   : > { %5292 = vmatmul.mubr.msk.bf16.vlgmr.msra.gmra.mrb[60].mxu0 %vm1206_vm5, %v2894_v10 }
0x1808   : > { %5304 = vmatpush3.bf16.msra.mxu0 %v5584_v9  ;;  %5307 = vmatprep.mubr.msk.bf16.mxu0 %vm5750_vm1, %v5749_v2 }
0x1809   : > { %5305 = vmatprep.subr.bf16.mxu0 %v5749_v2 }
0x180c   : > { %5306 = vmatpush3.bf16.msra.mxu0 %v5585_v11 }
0x180d   : > { %5319 = vmatprep.subr.bf16.mxu0 %v5749_v2 }
0x180f   : > { %5308 = vmatmul.mubr.msk.bf16.vlgmr.msra.gmra.mrb[64].mxu0 %vm1033_vm4, %v6230_v14 }
0x1810   : > { %5321 = vmatprep.mubr.msk.bf16.mxu0 %vm5750_vm1, %v5749_v2 }
0x18da   : > { %v2935_v13 = vpop.f32.mrb[60].mxu0 }
0x18db   : > { %v5293_v15 = vpop.f32.mrb[61].mxu0  ;;  %v2941_v31 = vpack.c.bf16 %v2935_v13, %v2935_v13 }
0x18dc   : > { %v2938_v16 = vpop.f32.mrb[62].mxu0 }
0x18dd   : > { %v5294_v17 = vpop.f32.mrb[63].mxu0 }
0x18e2   : > { %v3069_v20 = vpop.f32.mrb[64].mxu0 }
0x18e3   : > { %v3070_v21 = vadd.f32 %v4792_v18, %v3069_v20  ;;  %v5309_v22 = vpop.f32.mrb[65].mxu0  ;;  %v4815_v20 = vld [vmem:[%s6542_s8 + $0x6] ss:$0 sm:$0xff] }
0x18e4   : > { %v3072_v24 = vpop.f32.mrb[66].mxu0 }
0x18e5   : > { %v3075_v25 = vpack.c.bf16 %v3070_v21, %v3070_v21  ;;  %v5310_v19 = vpop.f32.mrb[67].mxu0 }
0x18e7   : > { %v3146_v27 = vsel %vm1206_vm5, %v3075_v25, 0 }
0x18e8   : > { %5320 = vmatpush3.bf16.xpose.msra.mxu0 %v3146_v27  ;;  %v4833_v27 = vld [vmem:[%s5819_s30 + $0x6] ss:$0 sm:$0xff] }
0x18e9   : > { %5331 = vmatprep.subr.bf16.mxu0 %v5749_v2 }
0x18ef   : > { %5322 = vmatmul.mubr.msk.bf16.vlgmr.msra.gmra.mrb[68].mxu0 %vm1206_vm5, %v3009_v29 }
0x18f0   : > { %5333 = vmatprep.mubr.msk.bf16.mxu0 %vm5750_vm1, %v5749_v2  ;;  %5332 = vmatpush3.bf16.msra.mxu0 %v3253_v50  ;;  %v5593_v50 = vld [vmem:[%s6544_s3 + $0x78] sm:$0xff]  }
0x18f1   : > { %5343 = vmatprep.subr.bf16.mxu0 %v5749_v2 }
0x19c2   : > { %v3182_v30 = vpop.f32.mrb[68].mxu0 }
0x19c3   : > { %v3183_v32 = vadd.f32 %v3182_v30, %v6048_v61  ;;  %v5323_v33 = vpop.f32.mrb[69].mxu0 }
0x19c4   : > { %v3185_v23 = vpop.f32.mrb[70].mxu0 }
0x19c5   : > { %v5324_v34 = vpop.f32.mrb[71].mxu0  ;;  %v3188_v35 = vsel %vm1206_vm5, %v3183_v32, -inf }
0x19c6   : > { %3189 = vmax.xlane.f32.xlu1 %v3188_v35 }
0x1a53   : > { %v3190_v36 = vpop.xlane.xlu1 %3189 }
0x1a54   : > { %v3191_v37 = vsub.f32 %v3183_v32, %v3190_v36 }
0x1a56   : > { %v3192_v38 = vmul.f32 1.442695, %v3191_v37 }
0x1a58   : > { %5632 = vpow2.f32 %v3192_v38 }
0x1a62   : > { %v5633_v39 = vpop.eup %5632 }
0x1a63   : > { %v3194_v40 = vsel %vm1206_vm5, %v5633_v39, 0.0 }
0x1a64   : > { %3195 = vadd.xlane.f32.xlu0 %v3194_v40 }
0x1af1   : > { %v3196_v41 = vpop.xlane.xlu0 %3195 }
0x1af2   : > { %5634 = vrcp.f32 %v3196_v41 }
0x1afc   : > { %v5635_v42 = vpop.eup %5634 }
0x1afd   : > { %v3198_v44 = vmul.f32 %v5635_v42, %v5633_v39 }
0x1aff   : > { %v3199_v45 = vpack.c.bf16 %v3198_v44, %v3198_v44 }
0x1b01   : > { %5328 = vmatmul.mubr.msk.bf16.vlgmr.msra.gmra.mrb[72].mxu1 %vm1206_vm5, %v3199_v45 }
0x1b02   : > { %5338 = vmatpush3.bf16.msra.mxu1 %v3299_v46  ;;  %5339 = vmatprep.mubr.msk.bf16.mxu1 %vm5750_vm1, %v5749_v2 }
0x1b03   : > { %5351 = vmatprep.subr.bf16.mxu1 %v5749_v2 }
0x1b09   : > { %5340 = vmatmul.mubr.msk.bf16.vlgmr.msra.gmra.mrb[76].mxu1 %vm1206_vm5, %v2941_v31 }
0x1b0a   : > { %5352 = vmatpush3.bf16.msra.mxu1 %v5586_v47  ;;  %5355 = vmatprep.mubr.msk.bf16.mxu1 %vm5750_vm1, %v5749_v2 }
0x1b0b   : > { %5353 = vmatprep.subr.bf16.mxu1 %v5749_v2 }
0x1b0e   : > { %5354 = vmatpush3.bf16.msra.mxu1 %v5587_v48  ;;  %v5592_v48 = vld [vmem:[%s6544_s3 + $0x70] sm:$0xff]   ;;  %s4913_s3 = sshll.u32 %s5927_s0, 4  ;;  %s5752_s0 = smov [#allocation3]  }
0x1b0f   : > { %5367 = vmatprep.subr.bf16.mxu1 %v5749_v2 }
0x1b11   : > { %5356 = vmatmul.mubr.msk.bf16.vlgmr.msra.gmra.mrb[80].mxu1 %vm1033_vm4, %v6230_v14 }
0x1b12   : > { %5369 = vmatprep.mubr.msk.bf16.mxu1 %vm5750_vm1, %v5749_v2 }
0x1bd4   : > { %v3240_v51 = vpop.f32.mrb[72].mxu1 }
0x1bd5   : > { %v3246_v53 = vpack.c.bf16 %v3240_v51, %v3240_v51  ;;  %v5329_v56 = vpop.f32.mrb[73].mxu1  ;;  %v5594_v51 = vld [vmem:[%s5814_s24 + $0x70] sm:$0xff]  }
0x1bd6   : > { %v3243_v57 = vpop.f32.mrb[74].mxu1 }
0x1bd7   : > { %v5330_v58 = vpop.f32.mrb[75].mxu1  ;;  %5334 = vmatmul.mubr.msk.bf16.vlgmr.msra.gmra.mrb[72].mxu0 %vm1206_vm5, %v3246_v53  ;;  %v4839_v53 = vld [vmem:[%s6543_s6 + $0x18] sm:$0xf] }
0x1bd8   : > { %5344 = vmatpush3.bf16.msra.mxu0 %v5588_v52  ;;  %5347 = vmatprep.mubr.msk.bf16.mxu0 %vm5750_vm1, %v5749_v2  ;;  %v5595_v52 = vld [vmem:[%s5814_s24 + $0x78] sm:$0xff]   ;;  %v3650_v56 = vsel %vm942_vm0, %v4839_v53, 0  ;;  %v5596_v58 = vld [vmem:[%s5804_s14 + $0x70] sm:$0xff]  }
0x1bd9   : > { %5345 = vmatprep.subr.bf16.mxu0 %v5749_v2 }
0x1bdc   : > { %v3335_v60 = vpop.f32.mrb[76].mxu1  ;;  %5346 = vmatpush3.bf16.msra.mxu0 %v5589_v59 }
0x1bdd   : > { %v5341_v63 = vpop.f32.mrb[77].mxu1  ;;  %5359 = vmatprep.subr.bf16.mxu0 %v5749_v2 }
0x1bde   : > { %v3338_v0 = vpop.f32.mrb[78].mxu1 }
0x1bdf   : > { %v5342_v3 = vpop.f32.mrb[79].mxu1  ;;  %5348 = vmatmul.mubr.msk.bf16.vlgmr.msra.gmra.mrb[76].mxu0 %vm1033_vm4, %v6230_v14  ;;  %v5597_v0 = vld [vmem:[%s5804_s14 + $0x78] sm:$0xff]  }
0x1be0   : > { %5360 = vmatpush3.bf16.msra.mxu0 %v5590_v62  ;;  %5363 = vmatprep.mubr.msk.bf16.mxu0 %vm5750_vm1, %v5749_v2 }
0x1be1   : > { %5361 = vmatprep.subr.bf16.mxu0 %v5749_v2 }
0x1be4   : > { %v3466_v1 = vpop.f32.mrb[80].mxu1  ;;  %5362 = vmatpush3.bf16.msra.mxu0 %v5591_v4 }
0x1be5   : > { %v3467_v6 = vadd.f32 %v4824_v5, %v3466_v1  ;;  %v5357_v7 = vpop.f32.mrb[81].mxu1  ;;  %5373 = vmatprep.subr.bf16.mxu0 %v5749_v2 }
0x1be6   : > { %v3469_v8 = vpop.f32.mrb[82].mxu1 }
0x1be7   : > { %v3472_v9 = vpack.c.bf16 %v3467_v6, %v3467_v6  ;;  %v5358_v10 = vpop.f32.mrb[83].mxu1  ;;  %5364 = vmatmul.mubr.msk.bf16.vlgmr.msra.gmra.mrb[80].mxu0 %vm1033_vm4, %v6230_v14  ;;  %v4864_v6 = vld [vmem:[%s5819_s30 + $0x7] ss:$0 sm:$0xff] }
0x1be8   : > { %5375 = vmatprep.mubr.msk.bf16.mxu0 %vm5750_vm1, %v5749_v2 }
0x1be9   : > { %v3543_v11 = vsel %vm1206_vm5, %v3472_v9, 0 }
0x1bea   : > { %5368 = vmatpush3.bf16.xpose.msra.mxu1 %v3543_v11 }
0x1beb   : > { %5379 = vmatprep.subr.bf16.mxu1 %v5749_v2 }
0x1caa   : > { %v3289_v13 = vpop.f32.mrb[72].mxu0 }
0x1cab   : > { %v6342_v15 = vadd.f32 %v3335_v60, %v3289_v13  ;;  %v5335_v16 = vpop.f32.mrb[73].mxu0 }
0x1cac   : > { %v3292_v17 = vpop.f32.mrb[74].mxu0 }
0x1cad   : > { %v5336_v18 = vpop.f32.mrb[75].mxu0 }
0x1cb2   : > { %v3400_v21 = vpop.f32.mrb[76].mxu0 }
0x1cb3   : > { %v3401_v22 = vadd.f32 %v4815_v20, %v3400_v21  ;;  %v5349_v24 = vpop.f32.mrb[77].mxu0 }
0x1cb4   : > { %v3403_v25 = vpop.f32.mrb[78].mxu0 }
0x1cb5   : > { %v3406_v19 = vpack.c.bf16 %v3401_v22, %v3401_v22  ;;  %v5350_v26 = vpop.f32.mrb[79].mxu0  ;;  %v4855_v22 = vld [vmem:[%s5809_s19 + $0x7] ss:$0 sm:$0xff] }
0x1cb7   : > { %5370 = vmatmul.mubr.msk.bf16.vlgmr.msra.gmra.mrb[84].mxu1 %vm1206_vm5, %v3406_v19 }
0x1cb8   : > { %5381 = vmatprep.mubr.msk.bf16.mxu1 %vm5750_vm1, %v5749_v2  ;;  %5380 = vmatpush3.bf16.msra.mxu1 %v3650_v56 }
0x1cb9   : > { %5393 = vmatprep.subr.bf16.mxu1 %v5749_v2 }
0x1cba   : > { %v3532_v28 = vpop.f32.mrb[80].mxu0 }
0x1cbb   : > { %v3533_v29 = vadd.f32 %v4833_v27, %v3532_v28  ;;  %v5365_v30 = vpop.f32.mrb[81].mxu0 }
0x1cbc   : > { %v3535_v32 = vpop.f32.mrb[82].mxu0 }
0x1cbd   : > { %v3538_v33 = vpack.c.bf16 %v3533_v29, %v3533_v29  ;;  %v5366_v23 = vpop.f32.mrb[83].mxu0  ;;  %v4846_v29 = vld [vmem:[%s6542_s8 + $0x7] ss:$0 sm:$0xff] }
0x1cbf   : > { %v3601_v34 = vsel %vm942_vm0, %v3538_v33, 0 }
0x1cc0   : > { %5374 = vmatpush3.bf16.msra.mxu0 %v3601_v34 }
0x1cc1   : > { %5385 = vmatprep.subr.bf16.mxu0 %v5749_v2 }
0x1d8a   : > { %v3579_v35 = vpop.f32.mrb[84].mxu1 }
0x1d8b   : > { %v3580_v36 = vadd.f32 %v3579_v35, %v6048_v61  ;;  %v5371_v37 = vpop.f32.mrb[85].mxu1 }
0x1d8c   : > { %v3582_v38 = vpop.f32.mrb[86].mxu1 }
0x1d8d   : > { %v5372_v39 = vpop.f32.mrb[87].mxu1  ;;  %v3585_v40 = vsel %vm1206_vm5, %v3580_v36, -inf }
0x1d8e   : > { %3586 = vmax.xlane.f32.xlu1 %v3585_v40 }
0x1e1b   : > { %v3587_v41 = vpop.xlane.xlu1 %3586 }
0x1e1c   : > { %v3588_v42 = vsub.f32 %v3580_v36, %v3587_v41 }
0x1e1e   : > { %v3589_v43 = vmul.f32 1.442695, %v3588_v42 }
0x1e20   : > { %5636 = vpow2.f32 %v3589_v43 }
0x1e2a   : > { %v5637_v44 = vpop.eup %5636 }
0x1e2b   : > { %v3591_v45 = vsel %vm1206_vm5, %v5637_v44, 0.0 }
0x1e2c   : > { %3592 = vadd.xlane.f32.xlu0 %v3591_v45 }
0x1eb9   : > { %v3593_v46 = vpop.xlane.xlu0 %3592 }
0x1eba   : > { %5638 = vrcp.f32 %v3593_v46  ;;  %v4870_v46 = vld [vmem:[%s6543_s6 + $0x1c] sm:$0xf] }
0x1ec4   : > { %v5639_v47 = vpop.eup %5638 }
0x1ec5   : > { %v3595_v31 = vmul.f32 %v5639_v47, %v5637_v44  ;;  %v4002_v47 = vsel %vm942_vm0, %v4870_v46, 0  ;;  %v5652_v46 = vld [vmem:[%s5781_s21] sm:$0x1] }
0x1ec7   : > { %v3596_v49 = vpack.c.bf16 %v3595_v31, %v3595_v31 }
0x1ec9   : > { %5376 = vmatmul.mubr.msk.bf16.vlgmr.msra.gmra.mrb[84].mxu0 %vm1206_vm5, %v3596_v49 }
0x1eca   : > { %5386 = vmatpush3.bf16.msra.mxu0 %v5592_v48  ;;  %5389 = vmatprep.mubr.msk.bf16.mxu0 %vm5750_vm1, %v5749_v2 }
0x1ecb   : > { %5387 = vmatprep.subr.bf16.mxu0 %v5749_v2 }
0x1ece   : > { %5388 = vmatpush3.bf16.msra.mxu0 %v5593_v50 }
0x1ecf   : > { %5401 = vmatprep.subr.bf16.mxu0 %v5749_v2 }
0x1ed1   : > { %5390 = vmatmul.mubr.msk.bf16.vlgmr.msra.gmra.mrb[88].mxu0 %vm1033_vm4, %v6230_v14 }
0x1ed2   : > { %5402 = vmatpush3.bf16.msra.mxu0 %v5594_v51  ;;  %5405 = vmatprep.mubr.msk.bf16.mxu0 %vm5750_vm1, %v5749_v2 }
0x1ed3   : > { %5403 = vmatprep.subr.bf16.mxu0 %v5749_v2 }
0x1ed6   : > { %5404 = vmatpush3.bf16.msra.mxu0 %v5595_v52 }
0x1ed7   : > { %5415 = vmatprep.subr.bf16.mxu0 %v5749_v2 }
0x1ed9   : > { %5406 = vmatmul.mubr.msk.bf16.vlgmr.msra.gmra.mrb[92].mxu0 %vm1033_vm4, %v6230_v14 }
0x1eda   : > { %5417 = vmatprep.mubr.msk.bf16.mxu0 %vm5750_vm1, %v5749_v2 }
0x1f9c   : > { %v3637_v57 = vpop.f32.mrb[84].mxu0 }
0x1f9d   : > { %v3643_v59 = vpack.c.bf16 %v3637_v57, %v3637_v57  ;;  %v5377_v60 = vpop.f32.mrb[85].mxu0 }
0x1f9e   : > { %v3640_v62 = vpop.f32.mrb[86].mxu0 }
0x1f9f   : > { %v5378_v63 = vpop.f32.mrb[87].mxu0  ;;  %5382 = vmatmul.mubr.msk.bf16.vlgmr.msra.gmra.mrb[88].mxu1 %vm1206_vm5, %v3643_v59 }
0x1fa0   : > { %5394 = vmatpush3.bf16.msra.mxu1 %v5596_v58  ;;  %5397 = vmatprep.mubr.msk.bf16.mxu1 %vm5750_vm1, %v5749_v2  ;;  %v4873_v58 = vld [vmem:[%s6541_s12 + $0x1] ss:$0 sm:$0xff] }
0x1fa1   : > { %5395 = vmatprep.subr.bf16.mxu1 %v5749_v2 }
0x1fa4   : > { %v3752_v3 = vpop.f32.mrb[88].mxu0  ;;  %5396 = vmatpush3.bf16.msra.mxu1 %v5597_v0 }
0x1fa5   : > { %v5391_v4 = vpop.f32.mrb[89].mxu0  ;;  %5409 = vmatprep.subr.bf16.mxu1 %v5749_v2  ;;  %v3753_v32 = vadd.f32 %v4846_v29, %v3752_v3 }
0x1fa6   : > { %v3755_v5 = vpop.f32.mrb[90].mxu0 }
0x1fa7   : > { %v5392_v1 = vpop.f32.mrb[91].mxu0  ;;  %5398 = vmatmul.mubr.msk.bf16.vlgmr.msra.gmra.mrb[92].mxu1 %vm1033_vm4, %v6230_v14  ;;  %v3758_v33 = vpack.c.bf16 %v3753_v32, %v3753_v32 }
0x1fa8   : > { %5411 = vmatprep.mubr.msk.bf16.mxu1 %vm5750_vm1, %v5749_v2 }
0x1fac   : > { %v3884_v7 = vpop.f32.mrb[92].mxu0 }
0x1fad   : > { %v3885_v8 = vadd.f32 %v4864_v6, %v3884_v7  ;;  %v5407_v9 = vpop.f32.mrb[93].mxu0  ;;  %v5598_v6 = vld [vmem:[%s6552_s1 + $0x10] sm:$0xff]   ;;  %v5600_v7 = vld [vmem:[%s6553_s16 + $0x20] sm:$0xff]  }
0x1fae   : > { %v3887_v10 = vpop.f32.mrb[94].mxu0 }
0x1faf   : > { %v3890_v11 = vpack.c.bf16 %v3885_v8, %v3885_v8  ;;  %v5408_v13 = vpop.f32.mrb[95].mxu0  ;;  %v5601_v8 = vld [vmem:[%s6553_s16 + $0x28] sm:$0xff]  }
0x1fb1   : > { %v3953_v16 = vsel %vm942_vm0, %v3890_v11, 0 }
0x1fb2   : > { %5416 = vmatpush3.bf16.msra.mxu0 %v3953_v16  ;;  %v4876_v16 = vld [vmem:[%s6554_s29 + $0x1] ss:$0 sm:$0xff] }
0x1fb3   : > { %5427 = vmatprep.subr.bf16.mxu0 %v5749_v2 }
0x2072   : > { %v3686_v17 = vpop.f32.mrb[88].mxu1 }
0x2073   : > { %v3692_v14 = vadd.f32 %v3686_v17, %v6342_v15  ;;  %v5383_v18 = vpop.f32.mrb[89].mxu1 }
0x2074   : > { %v3689_v20 = vpop.f32.mrb[90].mxu1 }
0x2075   : > { %v5384_v21 = vpop.f32.mrb[91].mxu1 }
0x207a   : > { %v3818_v24 = vpop.f32.mrb[92].mxu1 }
0x207b   : > { %v3819_v25 = vadd.f32 %v4855_v22, %v3818_v24  ;;  %v5399_v19 = vpop.f32.mrb[93].mxu1  ;;  %v5602_v22 = vld [vmem:[%s6553_s16 + $0x30] sm:$0xff]   ;;  %v5603_v24 = vld [vmem:[%s6553_s16 + $0x38] sm:$0xff]  }
0x207c   : > { %v3821_v26 = vpop.f32.mrb[94].mxu1 }
0x207d   : > { %v3824_v27 = vpack.c.bf16 %v3819_v25, %v3819_v25  ;;  %v5400_v28 = vpop.f32.mrb[95].mxu1  ;;  %v4883_v25 = vld [vmem:[%s6556_s9 + $0x1] ss:$0 sm:$0xff] }
0x207f   : > { %v3895_v30 = vsel %vm1206_vm5, %v3824_v27, 0 }
0x2080   : > { %5410 = vmatpush3.bf16.xpose.msra.mxu1 %v3895_v30 }
0x2081   : > { %5421 = vmatprep.subr.bf16.mxu1 %v5749_v2 }
0x2087   : > { %5412 = vmatmul.mubr.msk.bf16.vlgmr.msra.gmra.mrb[96].mxu1 %vm1206_vm5, %v3758_v33  ;;  %v4896_v33 = vld [vmem:[%s6557_s13 + $0x1] ss:$0 sm:$0xff] }
0x2088   : > { %5423 = vmatprep.mubr.msk.bf16.mxu1 %vm5750_vm1, %v5749_v2  ;;  %5422 = vmatpush3.bf16.msra.mxu1 %v4002_v47  ;;  %v5653_v47 = vld [vmem:[%s6037_s22] sm:$0x1]  ;;  %s6561_s22 = sld [smem:[#allocation24_spill]] }
0x2089   : > { %5435 = vmatprep.subr.bf16.mxu1 %v5749_v2 }
0x215a   : > { %v3931_v15 = vpop.f32.mrb[96].mxu1 }
0x215b   : > { %v3932_v23 = vadd.f32 %v3931_v15, %v6048_v61  ;;  %v5413_v34 = vpop.f32.mrb[97].mxu1 }
0x215c   : > { %v3934_v35 = vpop.f32.mrb[98].mxu1 }
0x215d   : > { %v5414_v36 = vpop.f32.mrb[99].mxu1  ;;  %v3937_v37 = vsel %vm1206_vm5, %v3932_v23, -inf }
0x215e   : > { %3938 = vmax.xlane.f32.xlu1 %v3937_v37 }
0x21eb   : > { %v3939_v38 = vpop.xlane.xlu1 %3938 }
0x21ec   : > { %v3940_v39 = vsub.f32 %v3932_v23, %v3939_v38 }
0x21ee   : > { %v3941_v40 = vmul.f32 1.442695, %v3940_v39  ;;  %v4273_v39 = vld [vmem:[#allocation2] sm:$0x1] }
0x21f0   : > { %5640 = vpow2.f32 %v3941_v40 }
0x21fa   : > { %v5641_v41 = vpop.eup %5640 }
0x21fb   : > { %v3943_v42 = vsel %vm1206_vm5, %v5641_v41, 0.0 }
0x21fc   : > { %3944 = vadd.xlane.f32.xlu0 %v3943_v42 }
0x2289   : > { %v3945_v43 = vpop.xlane.xlu0 %3944 }
0x228a   : > { %5642 = vrcp.f32 %v3945_v43 }
0x2294   : > { %v5643_v44 = vpop.eup %5642 }
0x2295   : > { %v3947_v45 = vmul.f32 %v5643_v44, %v5641_v41 }
0x2297   : > { %v3948_v61 = vpack.c.bf16 %v3947_v45, %v3947_v45 }
0x2299   : > { %5418 = vmatmul.mubr.msk.bf16.vlgmr.msra.gmra.mrb[96].mxu0 %vm1206_vm5, %v3948_v61 }
0x229a   : > { %5431 = vmatprep.mubr.msk.bf16.mxu0 %vm5750_vm1, %v5749_v2  ;;  %5428 = vmatpush3.bf16.msra.mxu0 %v5598_v6 }
0x229b   : > { %5429 = vmatprep.subr.bf16.mxu0 %v5749_v2 }
0x236c   : > { %v3989_v31 = vpop.f32.mrb[96].mxu0 }
0x236d   : > { %v3995_v48 = vpack.c.bf16 %v3989_v31, %v3989_v31  ;;  %v5419_v49 = vpop.f32.mrb[97].mxu0 }
0x236e   : > { %v3992_v50 = vpop.f32.mrb[98].mxu0 }
0x236f   : > { %v5420_v51 = vpop.f32.mrb[99].mxu0  ;;  %5424 = vmatmul.mubr.msk.bf16.vlgmr.msra.gmra.mrb[100].mxu1 %vm1206_vm5, %v3995_v48 }
0x2370   : > { %5443 = vmatprep.mubr.msk.bf16.mxu1 %vm5750_vm1, %v5749_v2  ;;  %5436 = vmatpush3.bf16.msra.mxu1 %v5600_v7 }
0x2371   : > { %5437 = vmatprep.subr.bf16.mxu1 %v5749_v2 }
0x2374   : > { %5438 = vmatpush3.bf16.msra.mxu1 %v5601_v8 }
0x2375   : > { %5439 = vmatprep.subr.bf16.mxu1 %v5749_v2 }
0x2378   : > { %5440 = vmatpush3.bf16.msra.mxu1 %v5602_v22 }
0x2379   : > { %5441 = vmatprep.subr.bf16.mxu1 %v5749_v2 }
0x237c   : > { %5442 = vmatpush3.bf16.msra.mxu1 %v5603_v24 }
0x237d   : > { %5460 = vmatprep.subr.bf16.mxu1 %v5749_v2 }
0x2442   : > { %v4038_v52 = vpop.f32.mrb[100].mxu1 }
0x2443   : > { %v4044_v53 = vadd.f32 %v4038_v52, %v3692_v14  ;;  %v5425_v56 = vpop.f32.mrb[101].mxu1  ;;  %v4877_v14 = vld [vmem:[%s6555_s5 + $0x1] ss:$0 sm:$0xff] }
0x2444   : > { %v4041_v57 = vpop.f32.mrb[102].mxu1 }
0x2445   : > { %v4045_v59 = vadd.f32 %v4044_v53, %v6225_v12  ;;  %v5426_v60 = vpop.f32.mrb[103].mxu1  ;;  %v5599_v12 = vld [vmem:[%s6552_s1 + $0x18] sm:$0xff]   ;;  %s6560_s1 = sld [smem:[#allocation23_spill]]  ;;  %v4904_v53 = vld [vmem:[%s6558_s17 + $0x1] ss:$0 sm:$0xff] }
0x2446   : > { %5430 = vmatpush3.bf16.msra.mxu0 %v5599_v12  ;;  %v4905_v57 = vld [vmem:[%s6559_s25 + $0x1] ss:$0 sm:$0xff] }
0x2447   : > { %v4054_v62 = vadd.f32 %v4873_v58, %v4045_v59  ;;  %5447 = vmatprep.subr.mxu0 %v5749_v2 }
0x2449   : > { %v4059_v63 = vsel %vm1033_vm4, %v4054_v62, 0.0 }
0x244a   : > { %4060 = vadd.xlane.f32.xlu1 %v4059_v63 }
0x244b   : > { %v5605_v59 = vld [vmem:[%s6560_s1 + $0x8] sm:$0xff]  }
0x24d7   : > { %v4061_v0 = vpop.xlane.xlu1 %4060 }
0x24d8   : > { %v4062_v3 = vmul.f32 0.03125, %v4061_v0 }
0x24da   : > { %v4063_v4 = vsub.f32 %v4054_v62, %v4062_v3 }
0x24dc   : > { %v4064_v5 = vmul.f32 %v4063_v4, %v4063_v4 }
0x24de   : > { %v4065_v1 = vsel %vm1033_vm4, %v4064_v5, 0.0 }
0x24df   : > { %4066 = vadd.xlane.f32.xlu0 %v4065_v1  ;;  %v4370_v1 = vld [vmem:[%s6561_s22] sm:$0x1]  ;;  %s904_s22 = sand.u32 1, %s5709_s7  }
0x24e0   : > { %s905_s5 = scalar_lea.vmem [#allocation3], %s904_s22  ;;  %s4511_s8 = scalar_lea.sflag [#allocation4], %s904_s22 }
0x24e1   : > { %s4523_s6 = sshll.u32 %s905_s5, 4  ;;  %s6465_s6 = int_to_ptr.vmem [resolvable:$true] %s4523_s6 }
0x24e2   : > { %s5655_s9 = scalar_lea.vmem %s6465_s6, 16 }
0x24e3   : > { %p5656_p11 = scmp.ne.s32.totalorder %s6465_s6, %s5655_s9 }
0x24e5   : > { %p5657_p12 = pnand %p5656_p11, %p5944_p5 }
0x24e7   : > { %p5658_p13 = pneg %p5657_p12 }
0x256c   : > { %v4067_v9 = vpop.xlane.xlu0 %4066 }
0x256d   : > { %v4068_v10 = vmul.f32 0.03125, %v4067_v9 }
0x256f   : > { %v4069_v11 = vadd.f32 1e-05, %v4068_v10 }
0x2571   : > { %5644 = vrsqrt.f32 %v4069_v11 }
0x257b   : > { %v5645_v13 = vpop.eup %5644 }
0x257c   : > { %v4071_v17 = vmul.f32 %v5645_v13, %v4063_v4 }
0x257e   : > { %v4078_v18 = vmul.f32 %v4876_v16, %v4071_v17 }
0x2580   : > { %v4085_v20 = vadd.f32 %v4877_v14, %v4078_v18  ;;  %v5606_v18 = vld [vmem:[%s5894_s20] sm:$0xff]  }
0x2582   : > { %v4086_v21 = vpack.c.bf16 %v4085_v20, %v4085_v20 }
0x2584   : > { %5432 = vmatmul.mubr.msk.bf16.vlgmr.msra.gmra.mrb[100].mxu0 %vm1033_vm4, %v4086_v21 }
0x2585   : > { %5449 = vmatprep.mubr.msk.f32.mxu0 %vm5750_vm1, %v5749_v2 }
0x2657   : > { %v4149_v19 = vpop.f32.mrb[100].mxu0 }
0x2658   : > { %v4150_v26 = vadd.f32 %v4883_v25, %v4149_v19  ;;  %v5433_v27 = vpop.f32.mrb[101].mxu0 }
0x2659   : > { %v4152_v28 = vpop.f32.mrb[102].mxu0  ;;  %v4427_v27 = vld [vmem:[%s6563_s11] sm:$0x1]  ;;  %s5659_s11 = sshll.u32 %s5752_s0, 4  ;;  %s5660_s11 = int_to_ptr.vmem [resolvable:$false] %s5659_s11 }
0x265a   : > { %v4155_v29 = vmax.f32 %v4150_v26, 0.0  ;;  %v5434_v30 = vpop.f32.mrb[103].mxu0  ;;  %s5661_s12 = scalar_lea.vmem %s5660_s11, 32  ;;  %p5662_p0 = scmp.lt.s32.totalorder %s6465_s6, %s5660_s11 }
0x265b   : > { %p5663_p1 = scmp.lt.s32.totalorder %s5661_s12, %s5655_s9 }
0x265c   : > { %v4156_v32 = vpack.c.bf16 %v4155_v29, %v4155_v29 }
0x265d   : > { %p5664_p2 = por %p5663_p1, %p5662_p0 }
0x265e   : > { %5444 = vmatmul.mubr.msk.bf16.vlgmr.msra.gmra.mrb[104].mxu1 %vm2561_vm10, %v4156_v32 }
0x265f   : > { %5464 = vmatprep.mubr.msk.bf16.mxu1 %vm5750_vm1, %v5749_v2  ;;  %5461 = vmatpush3.bf16.msra.mxu1 %v5606_v18  ;;  %p5665_p3 = pnand %p5664_p2, %p5658_p13 }
0x2660   : > { %5462 = vmatprep.subr.bf16.mxu1 %v5749_v2 }
0x2731   : > { %v4235_v15 = vpop.f32.mrb[104].mxu1 }
0x2732   : > { %v4236_v23 = vadd.f32 %v4896_v33, %v4235_v15  ;;  %v5445_v34 = vpop.f32.mrb[105].mxu1 }
0x2733   : > { %v4238_v35 = vpop.f32.mrb[106].mxu1 }
0x2734   : > { %v5446_v36 = vpop.f32.mrb[107].mxu1  ;;  %v4241_v37 = vadd.f32 %v4236_v23, %v4085_v20  ;;  %v5607_v20 = vld [vmem:[%s5894_s20 + $0x8] sm:$0xff]  }
0x2735   : > { %5463 = vmatpush3.bf16.msra.mxu1 %v5607_v20 }
0x2736   : > { %v4246_v38 = vsel %vm1033_vm4, %v4241_v37, 0.0 }
0x2737   : > { %4247 = vadd.xlane.f32.xlu1 %v4246_v38 }
0x2748   : > { %4276 = vperm.xlu1 %5541, %v4273_v39  }
0x27c4   : > { %v4248_v40 = vpop.xlane.xlu1 %4247 }
0x27c5   : > { %v4249_v41 = vmul.f32 0.03125, %v4248_v40 }
0x27c7   : > { %v4250_v42 = vsub.f32 %v4241_v37, %v4249_v41 }
0x27c8   : > { %v4277_v45 = vpop.permute.xlu1 %4276 }
0x27c9   : > { %v4251_v43 = vmul.f32 %v4250_v42, %v4250_v42  ;;  %v4282_v61 = vrot.slane %v4277_v45, %v996_v55  ;;  %v5604_v55 = vld [vmem:[%s6560_s1] sm:$0xff]   ;;  %s6562_s1 = sld [smem:[#allocation25_spill]] }
0x27cb   : > { %v4252_v44 = vsel %vm1033_vm4, %v4251_v43, 0.0  ;;  %vm4283_vm11 = vcmp.eq.f32.partialorder %v4282_v61, %v5652_v46 }
0x27cc   : > { %4253 = vadd.xlane.f32.xlu0 %v4252_v44  ;;  %v4284_v31 = vsel %vm4283_vm11, %v5653_v47, 0.0 }
0x27cd   : > { %v4286_v48 = vsel %vm4285_vm12, %v4284_v31, 0.0 }
0x27cf   : > { %v4426_v19 = vld [vmem:[%s6562_s1] sm:$0x1]  ;;  %s6463_s1 = scalar_lea.hbm %s5904_s2, %s4913_s3 }
0x27d0   : > { %4287 = vadd.xlane.f32.xlu0 %v4286_v48 }
0x2859   : > { %v4254_v49 = vpop.xlane.xlu0 %4253 }
0x285a   : > { %v4255_v50 = vmul.f32 0.03125, %v4254_v49 }
0x285c   : > { %v4256_v51 = vadd.f32 1e-05, %v4255_v50 }
0x285d   : > { %v4288_v60 = vpop.xlane.xlu0 %4287 }
0x285e   : > { %5646 = vrsqrt.f32 %v4256_v51  ;;  %v4289_v62 = vmax.f32 %v4288_v60, 1e-09 }
0x2860   : > { %5648 = vrcp.f32 %v4289_v62 }
0x2868   : > { %v5647_v52 = vpop.eup %5646 }
0x2869   : > { %v4258_v56 = vmul.f32 %v5647_v52, %v4250_v42 }
0x286a   : > { %v5649_v63 = vpop.eup %5648 }
0x286b   : > { %v4265_v54 = vmul.f32 %v4904_v53, %v4258_v56 }
0x286d   : > { %v4272_v58 = vadd.f32 %v4905_v57, %v4265_v54 }
0x286f   : > { %5448 = vmatpush3.msra.mxu0 %v4272_v58 }
0x2870   : > { %5450 = vmatmul.mubr.msk.f32.vlgmr.msra.gmra.mrb[104].mxu0 %vm1206_vm5, %v4284_v31  ;;  %5452 = vmatprep.subr.bf16.mxu0 %v5749_v2 }
0x2871   : > { %5453 = vmatpush3.bf16.msra.mxu0 %v5604_v55  ;;  %5456 = vmatprep.mubr.msk.bf16.mxu0 %vm5750_vm1, %v5749_v2 }
0x2872   : > { %5454 = vmatprep.subr.bf16.mxu0 %v5749_v2  ;;  %v4452_v2 = vld [vmem:[%s5899_s26] sm:$0x1] }
0x2875   : > { %5455 = vmatpush3.bf16.msra.mxu0 %v5605_v59 }
0x2943   : > { %v4359_v0 = vpop.f32.mrb[104].mxu0 }
0x2944   : > { %v4364_v3 = vmul.f32 %v5649_v63, %v4359_v0  ;;  %v5451_v4 = vpop.f32.mrb[105].mxu0 }
0x2946   : > { %v4365_v5 = vpack.c.bf16 %v4364_v3, %v4364_v3 }
0x2948   : > { %5457 = vmatmul.mubr.msk.bf16.vlgmr.msra.gmra.mrb[108].mxu0 %vm1033_vm4, %v4365_v5 }
0x2a1b   : > { %v4420_v6 = vpop.f32.mrb[108].mxu0 }
0x2a1c   : > { %v4421_v12 = vadd.f32 %v4420_v6, %v4370_v1  ;;  %v5458_v7 = vpop.f32.mrb[109].mxu0 }
0x2a1d   : > { %v4423_v8 = vpop.f32.mrb[110].mxu0 }
0x2a1e   : > { %v5459_v9 = vpop.f32.mrb[111].mxu0  ;;  %v4429_v10 = vsel %vm4428_vm13, %v4421_v12, 0.0 }
0x2a1f   : > { %4430 = vadd.xlane.f32.xlu0 %v4429_v10 }
0x2aac   : > { %v4431_v11 = vpop.xlane.xlu0 %4430 }
0x2aad   : > { %v4432_v13 = vmul.f32 0.03125, %v4431_v11 }
0x2aaf   : > { %v4433_v16 = vsub.f32 %v4421_v12, %v4432_v13 }
0x2ab1   : > { %v4434_v17 = vmul.f32 %v4433_v16, %v4433_v16 }
0x2ab3   : > { %v4435_v14 = vsel %vm4428_vm13, %v4434_v17, 0.0 }
0x2ab4   : > { %4436 = vadd.xlane.f32.xlu0 %v4435_v14 }
0x2b41   : > { %v4437_v21 = vpop.xlane.xlu0 %4436 }
0x2b42   : > { %v4438_v22 = vmul.f32 0.03125, %v4437_v21 }
0x2b44   : > { %v4439_v24 = vadd.f32 1e-05, %v4438_v22 }
0x2b46   : > { %5650 = vrsqrt.f32 %v4439_v24 }
0x2b50   : > { %v5651_v25 = vpop.eup %5650 }
0x2b51   : > { %v4441_v26 = vmul.f32 %v5651_v25, %v4433_v16 }
0x2b53   : > { %v4442_v28 = vmul.f32 %v4441_v26, %v4426_v19 }
0x2b55   : > { %v4443_v29 = vadd.f32 %v4442_v28, %v4427_v27 }
0x2b57   : > { %vm4444_vm14 = vcmp.gt.f32.partialorder %v4443_v29, 0.0  ;;  %v4445_v30 = vmul.f32 0.01, %v4443_v29 }
0x2b59   : > { %v4446_v32 = vsel %vm4444_vm14, %v4443_v29, %v4445_v30 }
0x2b5a   : > { %v4447_v33 = vpack.c.bf16 %v4446_v32, %v4446_v32 }
0x2b5c   : > { %5465 = vmatmul.mubr.msk.bf16.vlgmr.msra.gmra.mrb[108].mxu1 %vm1033_vm4, %v4447_v33 }
0x2c2f   : > { %v4502_v15 = vpop.f32.mrb[108].mxu1 }
0x2c30   : > { %v4503_v23 = vadd.f32 %v4502_v15, %v4452_v2  ;;  %v5466_v34 = vpop.f32.mrb[109].mxu1 }
0x2c31   : > { %v4505_v35 = vpop.f32.mrb[110].mxu1 }
0x2c32   : > { %v5467_v36 = vpop.f32.mrb[111].mxu1  ;;  %4509 = vst.msk [vmem:[%s905_s5] sm:$0x1] %vm4508_vm15, %v4503_v23 }
0x2c33   : > { %5668 = shalt.err (!%p5665_p3)
}
0x2c34   : > { %s5669_s5 = scalar_lea.hbm %s6463_s1, 16  ;;  %s5673_s3 = scalar_lea.hbm %s5904_s2, 32 }
0x2c35   : > { %p5670_p4 = scmp.ne.s32.totalorder %s6463_s1, %s5669_s5  ;;  %p5674_p9 = scmp.lt.u32.totalorder %s6463_s1, %s5904_s2 }
0x2c36   : > { %p5675_p10 = scmp.lt.u32.totalorder %s5673_s3, %s5669_s5  ;;  %p5677_p12 = scmp.lt.u32.totalorder %s5669_s5, %s6463_s1 }
0x2c37   : > { %p5671_p7 = pnand %p5670_p4, %p5944_p5 }
0x2c38   : > { %p5676_p11 = por %p5675_p10, %p5674_p9 }
0x2c39   : > { %p5672_p8 = pneg %p5671_p7 }
0x2c3a   : > { %p5678_p0 = por %p5677_p12, %p5676_p11 }
0x2c3c   : > { %p5679_p13 = pnand %p5678_p0, %p5672_p8 }
0x2c3e   : > { %5682 = shalt.err (!%p5679_p13)
}
0x2c3f   : > { %5468 = dma.vmem_to_hbm [thread:$0]  (%p5944_p5), %s6465_s6, 16, %s6463_s1, %s4511_s8  }
0x2c40 PF: > { %p5474_p1 = scmp.ge.s32.totalorder %s5717_s15, 2  ;;  %s4535_s9 = sand.u32 1, %s5705_s4  }
0x2c41   : > { %s4536_s12 = scalar_lea.sflag [#allocation4], %s4535_s9 }
0x2c42   : > { %p5471_p2 = pnand %p5474_p1, %p5948_p6 }
0x2c44   : > { %5700 = dma.done.wait (!%p5471_p2), %s4536_s12, 16  }
0x2c45   : > { %5702 = vsyncadd (!%p5471_p2), %s4536_s12, 4294967280  ;;  %p71_p3 = scmp.ge.s32.totalorder %s5931_s18, 4   ;;  %s6564_s4 = smov %s5709_s7 }
0x2c46   : > { %s6565_s7 = smov %s5713_s10  ;;  %s6566_s10 = smov %s5942_s23 }
0x2c47   : > { %s6567_s15 = smov %s5931_s18  ;;  %73 = sbr.rel (!%p71_p3) target bundleno = 59 (0x3b), region = 261 }
0x2c4e   :  { %4540 = vsyncpa [#allocation4], 1 }
0x2c4f   :  { %4542 = vsyncpa [#allocation4 + $0x1], 1 }

</bundles_post_ra>
